<compile_context>
chip_gen: v5e
topology: v5e:2x2
jax: 0.10.0
libtpu: 0.0.40
codegen_flags: <defaults>
</compile_context>

<pallas_src>
import functools
import numpy as np
import jax
import jax.numpy as jnp
from jax import lax
from jax.experimental import pallas as pl
from jax.experimental.pallas import tpu as pltpu

LEAKY_SLOPE = 0.01   # nn.LeakyReLU default negative_slope
BN_EPS = 1e-5        # nn.BatchNorm2d default eps


# -----------------------------------------------------------------------------
# Fused Pallas kernel: strided 3x3 conv + (conv3x3 + BN + LeakyReLU) x 2
# -----------------------------------------------------------------------------
def _down_fused_kernel(planes_ref, mask_ref, w0_ref, b0_ref,
                       w1_ref, s1_ref, c1_ref,
                       w2_ref, s2_ref, c2_ref,
                       out_ref, a1_ref, a2_ref,
                       *, Ho, Wo, Cin, Cmid, Cout):
    f32 = jnp.float32
    Wp = Wo + 2                     # padded width of every activation row
    N = Ho * Wp                     # rows of the "wide" (padded-width) output
    L0 = (Ho + 1) * Wp + 1          # per-parity-plane section length (wrapper layout)

    # Re-zero the padded scratch buffers every step (cheap; also keeps the
    # kernel correct when the batch axis is split across TensorCores).
    a1_ref[...] = jnp.zeros(a1_ref.shape, a1_ref.dtype)
    a2_ref[...] = jnp.zeros(a2_ref.shape, a2_ref.dtype)

    mask = mask_ref[...]            # (N, 1) f32: 0.0 on wrap-garbage columns

    # ---- stage 0: Conv2d(Cin, Cin, 3x3, stride=2, pad=1) + bias -------------
    # planes_ref holds the 4 parity planes of the zero-padded input, flattened
    # row-major (width Wp) and concatenated along the row axis with a one-row
    # lead offset per plane; each tap is a contiguous N-row slab.
    acc0 = jnp.zeros((N, Cin), f32)
    for kh in range(3):
        for kw in range(3):
            p = (kh % 2) * 2 + (kw % 2)
            start = p * L0 + (kh // 2) * Wp + (kw // 2)
            acc0 += jnp.dot(planes_ref[0, start:start + N, :],
                            w0_ref[kh * 3 + kw],
                            preferred_element_type=f32)
    acc0 = (acc0 + b0_ref[...]) * mask
    # single contiguous store into the flattened zero-padded buffer for conv1
    a1_ref[Wp + 1:Wp + 1 + N, :] = acc0.astype(a1_ref.dtype)

    # ---- stage 1: Conv2d(Cin, Cmid, 3x3, pad=1) + folded BN + LeakyReLU -----
    acc1 = jnp.zeros((N, Cmid), f32)
    for kh in range(3):
        for kw in range(3):
            start = kh * Wp + kw
            acc1 += jnp.dot(a1_ref[start:start + N, :],
                            w1_ref[kh * 3 + kw],
                            preferred_element_type=f32)
    acc1 = acc1 * s1_ref[...] + c1_ref[...]
    acc1 = jnp.where(acc1 >= 0, acc1, LEAKY_SLOPE * acc1) * mask
    # Dropout(p=0.2) between the convs: identity in eval mode.
    a2_ref[Wp + 1:Wp + 1 + N, :] = acc1.astype(a2_ref.dtype)

    # ---- stage 2: Conv2d(Cmid, Cout, 3x3, pad=1) + folded BN + LeakyReLU ----
    acc2 = jnp.zeros((N, Cout), f32)
    for kh in range(3):
        for kw in range(3):
            start = kh * Wp + kw
            acc2 += jnp.dot(a2_ref[start:start + N, :],
                            w2_ref[kh * 3 + kw],
                            preferred_element_type=f32)
    acc2 = acc2 * s2_ref[...] + c2_ref[...]
    acc2 = jnp.where(acc2 >= 0, acc2, LEAKY_SLOPE * acc2)

    # "wide" output (padded-width rows); wrapper discards the 2 garbage columns
    out_ref[0] = acc2.astype(out_ref.dtype)


# -----------------------------------------------------------------------------
# Wrapper
# -----------------------------------------------------------------------------
def _build_parity_planes(x_nhwc, Ho, Wo):
    """Space-to-depth planes of the zero-padded input for the stride-2 conv.

    Plane p = (ph*2 + pw) = xpad[ph::2, pw::2] (xpad = pad-1 input), cropped to
    (Ho+1, Wo+1), right-padded to width Wp = Wo+2, flattened row-major, with a
    one-row lead of zeros.  Result: (B, 4*L0, Cin), L0 = (Ho+1)*Wp + 1.
    """
    B, H, W, Cin = x_nhwc.shape
    Wp = Wo + 2
    xp = jnp.pad(x_nhwc, ((0, 0), (1, 2), (1, 2), (0, 0)))
    planes = []
    for ph in range(2):
        for pw in range(2):
            p = xp[:, ph::2, pw::2, :][:, :Ho + 1, :Wo + 1, :]
            p = jnp.pad(p, ((0, 0), (0, 0), (0, Wp - (Wo + 1)), (0, 0)))
            p = p.reshape(B, (Ho + 1) * Wp, Cin)
            p = jnp.pad(p, ((0, 0), (1, 0), (0, 0)))        # lead zero row
            planes.append(p)
    return jnp.concatenate(planes, axis=1)


def down_forward(x_nchw, params):
    """PyTorch Down.forward (default down_layer='strided_conv'), NCHW in/out."""
    B, Cin, H, W = x_nchw.shape
    Ho, Wo = (H + 1) // 2, (W + 1) // 2
    Wp = Wo + 2
    N = Ho * Wp
    L0 = (Ho + 1) * Wp + 1
    L1 = (Ho + 2) * Wp + 2
    Cmid = params["w1"].shape[-1]       # DoubleConv: mid_channels = out_channels
    Cout = params["w2"].shape[-1]

    x = jnp.transpose(x_nchw, (0, 2, 3, 1))                       # NCHW -> NHWC
    planes = _build_parity_planes(x, Ho, Wo).astype(jnp.bfloat16)

    # (N, 1) multiplicative mask: zero the two wrap-garbage columns per row.
    col = np.arange(N) % Wp
    mask = jnp.asarray(((col != 0) & (col != Wp - 1)).astype(np.float32)
                       ).reshape(N, 1)

    # bf16 matmul operands; f32 per-channel affines (folded BN) and bias.
    w0 = params["w0"].reshape(9, Cin, Cin).astype(jnp.bfloat16)
    w1 = params["w1"].reshape(9, Cin, Cmid).astype(jnp.bfloat16)
    w2 = params["w2"].reshape(9, Cmid, Cout).astype(jnp.bfloat16)
    b0 = params["b0"].reshape(1, Cin).astype(jnp.float32)
    s1 = params["s1"].reshape(1, Cmid).astype(jnp.float32)
    c1 = params["c1"].reshape(1, Cmid).astype(jnp.float32)
    s2 = params["s2"].reshape(1, Cout).astype(jnp.float32)
    c2 = params["c2"].reshape(1, Cout).astype(jnp.float32)

    kern = functools.partial(_down_fused_kernel,
                             Ho=Ho, Wo=Wo, Cin=Cin, Cmid=Cmid, Cout=Cout)

    out_wide = pl.pallas_call(
        kern,
        out_shape=jax.ShapeDtypeStruct((B, N, Cout), jnp.float32),
        grid=(B,),
        in_specs=[
            pl.BlockSpec((1, 4 * L0, Cin), lambda b: (b, 0, 0)),  # parity planes
            pl.BlockSpec((N, 1), lambda b: (0, 0)),               # column mask
            pl.BlockSpec((9, Cin, Cin), lambda b: (0, 0, 0)),     # w0
            pl.BlockSpec((1, Cin), lambda b: (0, 0)),             # b0
            pl.BlockSpec((9, Cin, Cmid), lambda b: (0, 0, 0)),    # w1
            pl.BlockSpec((1, Cmid), lambda b: (0, 0)),            # s1
            pl.BlockSpec((1, Cmid), lambda b: (0, 0)),            # c1
            pl.BlockSpec((9, Cmid, Cout), lambda b: (0, 0, 0)),   # w2
            pl.BlockSpec((1, Cout), lambda b: (0, 0)),            # s2
            pl.BlockSpec((1, Cout), lambda b: (0, 0)),            # c2
        ],
        out_specs=pl.BlockSpec((1, N, Cout), lambda b: (b, 0, 0)),
        scratch_shapes=[
            pltpu.VMEM((L1, Cin), jnp.bfloat16),    # conv0 output (padded, flat)
            pltpu.VMEM((L1, Cmid), jnp.bfloat16),   # conv1 output (padded, flat)
        ],
        compiler_params=pltpu.CompilerParams(
            dimension_semantics=("parallel",)),     # megacore-shardable over batch
    )(planes, mask, w0, b0, w1, s1, c1, w2, s2, c2)

    # drop the 2 wrap-garbage columns; NHWC -> NCHW
    out = out_wide.reshape(B, Ho, Wp, Cout)[:, :, 1:1 + Wo, :]
    return jnp.transpose(out, (0, 3, 1, 2))


# -----------------------------------------------------------------------------
# Deterministic parameters (eval-mode BN folded to per-channel scale/bias)
# -----------------------------------------------------------------------------
def make_params(key, cin, cout):
    ks = jax.random.split(key, 6)

    def conv_w(k, ci, co):
        return jax.random.normal(k, (3, 3, ci, co), jnp.float32) / np.sqrt(9 * ci)

    w0 = conv_w(ks[0], cin, cin)
    b0 = jax.random.normal(ks[1], (cin,), jnp.float32) * 0.01
    w1 = conv_w(ks[2], cin, cout)
    b1 = jax.random.normal(ks[3], (cout,), jnp.float32) * 0.01
    w2 = conv_w(ks[4], cout, cout)
    b2 = jax.random.normal(ks[5], (cout,), jnp.float32) * 0.01

    def bn_fold(bias, c):
        gamma = jnp.ones((c,), jnp.float32)
        beta = jnp.zeros((c,), jnp.float32)
        mean = jnp.zeros((c,), jnp.float32)
        var = jnp.ones((c,), jnp.float32)
        scale = gamma / jnp.sqrt(var + BN_EPS)
        return scale, (bias - mean) * scale + beta

    s1, c1 = bn_fold(b1, cout)
    s2, c2 = bn_fold(b2, cout)
    return dict(w0=w0, b0=b0, w1=w1, s1=s1, c1=c1, w2=w2, s2=s2, c2=c2)


# -----------------------------------------------------------------------------
# Pure-JAX reference (f32) for a sanity check
# -----------------------------------------------------------------------------
def reference_forward(x_nchw, params):
    x = jnp.transpose(x_nchw, (0, 2, 3, 1))
    dn = ("NHWC", "HWIO", "NHWC")
    y = lax.conv_general_dilated(x, params["w0"], (2, 2), [(1, 1), (1, 1)],
                                 dimension_numbers=dn) + params["b0"]

    def block(z, w, s, c):
        z = lax.conv_general_dilated(z, w, (1, 1), [(1, 1), (1, 1)],
                                     dimension_numbers=dn)
        z = z * s + c
        return jnp.where(z >= 0, z, LEAKY_SLOPE * z)

    y = block(y, params["w1"], params["s1"], params["c1"])
    y = block(y, params["w2"], params["s2"], params["c2"])
    return jnp.transpose(y, (0, 3, 1, 2))


if __name__ == "__main__":
    key = jax.random.PRNGKey(0)
    kx, kp = jax.random.split(key)

    B, Cin, H, W = 2, 4, 16, 16       # Down(in_channels=4, out_channels=32)
    Cout = 32
    x = jax.random.normal(kx, (B, Cin, H, W), jnp.float32)
    params = make_params(kp, Cin, Cout)

    fwd = jax.jit(lambda a: down_forward(a, params))
    y = fwd(x)
    jax.block_until_ready(y)

    assert y.shape == (B, Cout, H // 2, W // 2), y.shape
    assert bool(jnp.all(jnp.isfinite(y)))

    y_ref = reference_forward(x, params)
    err = float(jnp.max(jnp.abs(y - y_ref)))
    # bf16 matmul operands / bf16 VMEM intermediates vs. an all-f32 reference.
    assert err < 2e-1, f"mismatch vs f32 reference: max abs err {err}"

    print("KERNEL_OK")
</pallas_src>

<mosaic_0001>
module attributes {stable_mosaic.version = 11 : i64} {
  func.func @_down_fused_kernel(%arg0: i32, %arg1: memref<1x364x4xbf16, #tpu.memory_space<vmem>>, %arg2: memref<80x1xf32, #tpu.memory_space<vmem>>, %arg3: memref<9x4x4xbf16, #tpu.memory_space<vmem>>, %arg4: memref<1x4xf32, #tpu.memory_space<vmem>>, %arg5: memref<9x4x32xbf16, #tpu.memory_space<vmem>>, %arg6: memref<1x32xf32, #tpu.memory_space<vmem>>, %arg7: memref<1x32xf32, #tpu.memory_space<vmem>>, %arg8: memref<9x32x32xbf16, #tpu.memory_space<vmem>>, %arg9: memref<1x32xf32, #tpu.memory_space<vmem>>, %arg10: memref<1x32xf32, #tpu.memory_space<vmem>>, %arg11: memref<1x80x32xf32, #tpu.memory_space<vmem>>, %arg12: memref<102x4xbf16, #tpu.memory_space<vmem>>, %arg13: memref<102x32xbf16, #tpu.memory_space<vmem>>) attributes {dimension_semantics = [#tpu.dimension_semantics<parallel>], iteration_bounds = array<i64: 2>, scalar_prefetch = 0 : i64, scratch_operands = 2 : i64, tpu.core_type = #tpu.core_type<tc>, window_params = [{transform_indices = @transform_0, window_bounds = array<i64: 1, 364, 4>}, {pipeline_mode = #tpu.pipeline_mode<synchronous>, transform_indices = @transform_1, window_bounds = array<i64: 80, 1>}, {pipeline_mode = #tpu.pipeline_mode<synchronous>, transform_indices = @transform_2, window_bounds = array<i64: 9, 4, 4>}, {pipeline_mode = #tpu.pipeline_mode<synchronous>, transform_indices = @transform_3, window_bounds = array<i64: 1, 4>}, {pipeline_mode = #tpu.pipeline_mode<synchronous>, transform_indices = @transform_4, window_bounds = array<i64: 9, 4, 32>}, {pipeline_mode = #tpu.pipeline_mode<synchronous>, transform_indices = @transform_5, window_bounds = array<i64: 1, 32>}, {pipeline_mode = #tpu.pipeline_mode<synchronous>, transform_indices = @transform_6, window_bounds = array<i64: 1, 32>}, {pipeline_mode = #tpu.pipeline_mode<synchronous>, transform_indices = @transform_7, window_bounds = array<i64: 9, 32, 32>}, {pipeline_mode = #tpu.pipeline_mode<synchronous>, transform_indices = @transform_8, window_bounds = array<i64: 1, 32>}, {pipeline_mode = #tpu.pipeline_mode<synchronous>, transform_indices = @transform_9, window_bounds = array<i64: 1, 32>}, {transform_indices = @transform_10, window_bounds = array<i64: 1, 80, 32>}]} {
    %cst = arith.constant 0.000000e+00 : bf16
    %0 = vector.broadcast %cst : bf16 to vector<102x4xbf16>
    %c0 = arith.constant 0 : index
    %c0_0 = arith.constant 0 : index
    %1 = vector.load %arg12[%c0, %c0_0] : memref<102x4xbf16, #tpu.memory_space<vmem>>, vector<102x4xbf16>
    tpu.vector_store %arg12[%c0, %c0_0], %0 {strides = array<i32>} : memref<102x4xbf16, #tpu.memory_space<vmem>>, vector<102x4xbf16>,
    %cst_1 = arith.constant 0.000000e+00 : bf16
    %2 = vector.broadcast %cst_1 : bf16 to vector<102x32xbf16>
    %c0_2 = arith.constant 0 : index
    %c0_3 = arith.constant 0 : index
    %3 = vector.load %arg13[%c0_2, %c0_3] : memref<102x32xbf16, #tpu.memory_space<vmem>>, vector<102x32xbf16>
    tpu.vector_store %arg13[%c0_2, %c0_3], %2 {strides = array<i32>} : memref<102x32xbf16, #tpu.memory_space<vmem>>, vector<102x32xbf16>,
    %c0_4 = arith.constant 0 : index
    %c0_5 = arith.constant 0 : index
    %4 = vector.load %arg2[%c0_4, %c0_5] : memref<80x1xf32, #tpu.memory_space<vmem>>, vector<80x1xf32>
    %cst_6 = arith.constant 0.000000e+00 : f32
    %5 = vector.broadcast %cst_6 : f32 to vector<80x4xf32>
    %c0_7 = arith.constant 0 : index
    %c0_8 = arith.constant 0 : index
    %c0_9 = arith.constant 0 : index
    %6 = vector.load %arg1[%c0_7, %c0_8, %c0_9] : memref<1x364x4xbf16, #tpu.memory_space<vmem>>, vector<1x80x4xbf16>
    %7 = vector.shape_cast %6 : vector<1x80x4xbf16> to vector<80x4xbf16>
    %c0_10 = arith.constant 0 : index
    %c0_11 = arith.constant 0 : index
    %c0_12 = arith.constant 0 : index
    %8 = vector.load %arg3[%c0_10, %c0_11, %c0_12] : memref<9x4x4xbf16, #tpu.memory_space<vmem>>, vector<1x4x4xbf16>
    %9 = vector.shape_cast %8 : vector<1x4x4xbf16> to vector<4x4xbf16>
    %cst_13 = arith.constant dense<0.000000e+00> : vector<80x4xf32>
    %10 = tpu.matmul %7, %9, %cst_13 {dimension_numbers = #tpu.dot_dimension_numbers<[1], [0], [0], [1], [0, 0, 1, 1], [], []>} : vector<80x4xbf16>, vector<4x4xbf16>, vector<80x4xf32> -> vector<80x4xf32>
    %11 = arith.addf %5, %10 : vector<80x4xf32>
    %c0_14 = arith.constant 0 : index
    %c91 = arith.constant 91 : index
    %c0_15 = arith.constant 0 : index
    %12 = vector.load %arg1[%c0_14, %c91, %c0_15] : memref<1x364x4xbf16, #tpu.memory_space<vmem>>, vector<1x80x4xbf16>
    %13 = vector.shape_cast %12 : vector<1x80x4xbf16> to vector<80x4xbf16>
    %c1 = arith.constant 1 : index
    %c0_16 = arith.constant 0 : index
    %c0_17 = arith.constant 0 : index
    %14 = vector.load %arg3[%c1, %c0_16, %c0_17] : memref<9x4x4xbf16, #tpu.memory_space<vmem>>, vector<1x4x4xbf16>
    %15 = vector.shape_cast %14 : vector<1x4x4xbf16> to vector<4x4xbf16>
    %cst_18 = arith.constant dense<0.000000e+00> : vector<80x4xf32>
    %16 = tpu.matmul %13, %15, %cst_18 {dimension_numbers = #tpu.dot_dimension_numbers<[1], [0], [0], [1], [0, 0, 1, 1], [], []>} : vector<80x4xbf16>, vector<4x4xbf16>, vector<80x4xf32> -> vector<80x4xf32>
    %17 = arith.addf %11, %16 : vector<80x4xf32>
    %c0_19 = arith.constant 0 : index
    %c1_20 = arith.constant 1 : index
    %c0_21 = arith.constant 0 : index
    %18 = vector.load %arg1[%c0_19, %c1_20, %c0_21] : memref<1x364x4xbf16, #tpu.memory_space<vmem>>, vector<1x80x4xbf16>
    %19 = vector.shape_cast %18 : vector<1x80x4xbf16> to vector<80x4xbf16>
    %c2 = arith.constant 2 : index
    %c0_22 = arith.constant 0 : index
    %c0_23 = arith.constant 0 : index
    %20 = vector.load %arg3[%c2, %c0_22, %c0_23] : memref<9x4x4xbf16, #tpu.memory_space<vmem>>, vector<1x4x4xbf16>
    %21 = vector.shape_cast %20 : vector<1x4x4xbf16> to vector<4x4xbf16>
    %cst_24 = arith.constant dense<0.000000e+00> : vector<80x4xf32>
    %22 = tpu.matmul %19, %21, %cst_24 {dimension_numbers = #tpu.dot_dimension_numbers<[1], [0], [0], [1], [0, 0, 1, 1], [], []>} : vector<80x4xbf16>, vector<4x4xbf16>, vector<80x4xf32> -> vector<80x4xf32>
    %23 = arith.addf %17, %22 : vector<80x4xf32>
    %c0_25 = arith.constant 0 : index
    %c182 = arith.constant 182 : index
    %c0_26 = arith.constant 0 : index
    %24 = vector.load %arg1[%c0_25, %c182, %c0_26] : memref<1x364x4xbf16, #tpu.memory_space<vmem>>, vector<1x80x4xbf16>
    %25 = vector.shape_cast %24 : vector<1x80x4xbf16> to vector<80x4xbf16>
    %c3 = arith.constant 3 : index
    %c0_27 = arith.constant 0 : index
    %c0_28 = arith.constant 0 : index
    %26 = vector.load %arg3[%c3, %c0_27, %c0_28] : memref<9x4x4xbf16, #tpu.memory_space<vmem>>, vector<1x4x4xbf16>
    %27 = vector.shape_cast %26 : vector<1x4x4xbf16> to vector<4x4xbf16>
    %cst_29 = arith.constant dense<0.000000e+00> : vector<80x4xf32>
    %28 = tpu.matmul %25, %27, %cst_29 {dimension_numbers = #tpu.dot_dimension_numbers<[1], [0], [0], [1], [0, 0, 1, 1], [], []>} : vector<80x4xbf16>, vector<4x4xbf16>, vector<80x4xf32> -> vector<80x4xf32>
    %29 = arith.addf %23, %28 : vector<80x4xf32>
    %c0_30 = arith.constant 0 : index
    %c273 = arith.constant 273 : index
    %c0_31 = arith.constant 0 : index
    %30 = vector.load %arg1[%c0_30, %c273, %c0_31] : memref<1x364x4xbf16, #tpu.memory_space<vmem>>, vector<1x80x4xbf16>
    %31 = vector.shape_cast %30 : vector<1x80x4xbf16> to vector<80x4xbf16>
    %c4 = arith.constant 4 : index
    %c0_32 = arith.constant 0 : index
    %c0_33 = arith.constant 0 : index
    %32 = vector.load %arg3[%c4, %c0_32, %c0_33] : memref<9x4x4xbf16, #tpu.memory_space<vmem>>, vector<1x4x4xbf16>
    %33 = vector.shape_cast %32 : vector<1x4x4xbf16> to vector<4x4xbf16>
    %cst_34 = arith.constant dense<0.000000e+00> : vector<80x4xf32>
    %34 = tpu.matmul %31, %33, %cst_34 {dimension_numbers = #tpu.dot_dimension_numbers<[1], [0], [0], [1], [0, 0, 1, 1], [], []>} : vector<80x4xbf16>, vector<4x4xbf16>, vector<80x4xf32> -> vector<80x4xf32>
    %35 = arith.addf %29, %34 : vector<80x4xf32>
    %c0_35 = arith.constant 0 : index
    %c183 = arith.constant 183 : index
    %c0_36 = arith.constant 0 : index
    %36 = vector.load %arg1[%c0_35, %c183, %c0_36] : memref<1x364x4xbf16, #tpu.memory_space<vmem>>, vector<1x80x4xbf16>
    %37 = vector.shape_cast %36 : vector<1x80x4xbf16> to vector<80x4xbf16>
    %c5 = arith.constant 5 : index
    %c0_37 = arith.constant 0 : index
    %c0_38 = arith.constant 0 : index
    %38 = vector.load %arg3[%c5, %c0_37, %c0_38] : memref<9x4x4xbf16, #tpu.memory_space<vmem>>, vector<1x4x4xbf16>
    %39 = vector.shape_cast %38 : vector<1x4x4xbf16> to vector<4x4xbf16>
    %cst_39 = arith.constant dense<0.000000e+00> : vector<80x4xf32>
    %40 = tpu.matmul %37, %39, %cst_39 {dimension_numbers = #tpu.dot_dimension_numbers<[1], [0], [0], [1], [0, 0, 1, 1], [], []>} : vector<80x4xbf16>, vector<4x4xbf16>, vector<80x4xf32> -> vector<80x4xf32>
    %41 = arith.addf %35, %40 : vector<80x4xf32>
    %c0_40 = arith.constant 0 : index
    %c10 = arith.constant 10 : index
    %c0_41 = arith.constant 0 : index
    %42 = vector.load %arg1[%c0_40, %c10, %c0_41] : memref<1x364x4xbf16, #tpu.memory_space<vmem>>, vector<1x80x4xbf16>
    %43 = vector.shape_cast %42 : vector<1x80x4xbf16> to vector<80x4xbf16>
    %c6 = arith.constant 6 : index
    %c0_42 = arith.constant 0 : index
    %c0_43 = arith.constant 0 : index
    %44 = vector.load %arg3[%c6, %c0_42, %c0_43] : memref<9x4x4xbf16, #tpu.memory_space<vmem>>, vector<1x4x4xbf16>
    %45 = vector.shape_cast %44 : vector<1x4x4xbf16> to vector<4x4xbf16>
    %cst_44 = arith.constant dense<0.000000e+00> : vector<80x4xf32>
    %46 = tpu.matmul %43, %45, %cst_44 {dimension_numbers = #tpu.dot_dimension_numbers<[1], [0], [0], [1], [0, 0, 1, 1], [], []>} : vector<80x4xbf16>, vector<4x4xbf16>, vector<80x4xf32> -> vector<80x4xf32>
    %47 = arith.addf %41, %46 : vector<80x4xf32>
    %c0_45 = arith.constant 0 : index
    %c101 = arith.constant 101 : index
    %c0_46 = arith.constant 0 : index
    %48 = vector.load %arg1[%c0_45, %c101, %c0_46] : memref<1x364x4xbf16, #tpu.memory_space<vmem>>, vector<1x80x4xbf16>
    %49 = vector.shape_cast %48 : vector<1x80x4xbf16> to vector<80x4xbf16>
    %c7 = arith.constant 7 : index
    %c0_47 = arith.constant 0 : index
    %c0_48 = arith.constant 0 : index
    %50 = vector.load %arg3[%c7, %c0_47, %c0_48] : memref<9x4x4xbf16, #tpu.memory_space<vmem>>, vector<1x4x4xbf16>
    %51 = vector.shape_cast %50 : vector<1x4x4xbf16> to vector<4x4xbf16>
    %cst_49 = arith.constant dense<0.000000e+00> : vector<80x4xf32>
    %52 = tpu.matmul %49, %51, %cst_49 {dimension_numbers = #tpu.dot_dimension_numbers<[1], [0], [0], [1], [0, 0, 1, 1], [], []>} : vector<80x4xbf16>, vector<4x4xbf16>, vector<80x4xf32> -> vector<80x4xf32>
    %53 = arith.addf %47, %52 : vector<80x4xf32>
    %c0_50 = arith.constant 0 : index
    %c11 = arith.constant 11 : index
    %c0_51 = arith.constant 0 : index
    %54 = vector.load %arg1[%c0_50, %c11, %c0_51] : memref<1x364x4xbf16, #tpu.memory_space<vmem>>, vector<1x80x4xbf16>
    %55 = vector.shape_cast %54 : vector<1x80x4xbf16> to vector<80x4xbf16>
    %c8 = arith.constant 8 : index
    %c0_52 = arith.constant 0 : index
    %c0_53 = arith.constant 0 : index
    %56 = vector.load %arg3[%c8, %c0_52, %c0_53] : memref<9x4x4xbf16, #tpu.memory_space<vmem>>, vector<1x4x4xbf16>
    %57 = vector.shape_cast %56 : vector<1x4x4xbf16> to vector<4x4xbf16>
    %cst_54 = arith.constant dense<0.000000e+00> : vector<80x4xf32>
    %58 = tpu.matmul %55, %57, %cst_54 {dimension_numbers = #tpu.dot_dimension_numbers<[1], [0], [0], [1], [0, 0, 1, 1], [], []>} : vector<80x4xbf16>, vector<4x4xbf16>, vector<80x4xf32> -> vector<80x4xf32>
    %59 = arith.addf %53, %58 : vector<80x4xf32>
    %c0_55 = arith.constant 0 : index
    %c0_56 = arith.constant 0 : index
    %60 = vector.load %arg4[%c0_55, %c0_56] : memref<1x4xf32, #tpu.memory_space<vmem>>, vector<1x4xf32>
    %61 = vector.broadcast %60 : vector<1x4xf32> to vector<80x4xf32>
    %62 = arith.addf %59, %61 : vector<80x4xf32>
    %63 = vector.broadcast %4 : vector<80x1xf32> to vector<80x4xf32>
    %64 = arith.mulf %62, %63 : vector<80x4xf32>
    %65 = arith.truncf %64 : vector<80x4xf32> to vector<80x4xbf16>
    %c11_57 = arith.constant 11 : index
    %c0_58 = arith.constant 0 : index
    %66 = vector.load %arg12[%c11_57, %c0_58] : memref<102x4xbf16, #tpu.memory_space<vmem>>, vector<80x4xbf16>
    tpu.vector_store %arg12[%c11_57, %c0_58], %65 {strides = array<i32>} : memref<102x4xbf16, #tpu.memory_space<vmem>>, vector<80x4xbf16>,
    %cst_59 = arith.constant 0.000000e+00 : f32
    %67 = vector.broadcast %cst_59 : f32 to vector<80x32xf32>
    %c0_60 = arith.constant 0 : index
    %c0_61 = arith.constant 0 : index
    %68 = vector.load %arg12[%c0_60, %c0_61] : memref<102x4xbf16, #tpu.memory_space<vmem>>, vector<80x4xbf16>
    %c0_62 = arith.constant 0 : index
    %c0_63 = arith.constant 0 : index
    %c0_64 = arith.constant 0 : index
    %69 = vector.load %arg5[%c0_62, %c0_63, %c0_64] : memref<9x4x32xbf16, #tpu.memory_space<vmem>>, vector<1x4x32xbf16>
    %70 = vector.shape_cast %69 : vector<1x4x32xbf16> to vector<4x32xbf16>
    %cst_65 = arith.constant dense<0.000000e+00> : vector<80x32xf32>
    %71 = tpu.matmul %68, %70, %cst_65 {dimension_numbers = #tpu.dot_dimension_numbers<[1], [0], [0], [1], [0, 0, 1, 1], [], []>} : vector<80x4xbf16>, vector<4x32xbf16>, vector<80x32xf32> -> vector<80x32xf32>
    %72 = arith.addf %67, %71 : vector<80x32xf32>
    %c1_66 = arith.constant 1 : index
    %c0_67 = arith.constant 0 : index
    %73 = vector.load %arg12[%c1_66, %c0_67] : memref<102x4xbf16, #tpu.memory_space<vmem>>, vector<80x4xbf16>
    %c1_68 = arith.constant 1 : index
    %c0_69 = arith.constant 0 : index
    %c0_70 = arith.constant 0 : index
    %74 = vector.load %arg5[%c1_68, %c0_69, %c0_70] : memref<9x4x32xbf16, #tpu.memory_space<vmem>>, vector<1x4x32xbf16>
    %75 = vector.shape_cast %74 : vector<1x4x32xbf16> to vector<4x32xbf16>
    %cst_71 = arith.constant dense<0.000000e+00> : vector<80x32xf32>
    %76 = tpu.matmul %73, %75, %cst_71 {dimension_numbers = #tpu.dot_dimension_numbers<[1], [0], [0], [1], [0, 0, 1, 1], [], []>} : vector<80x4xbf16>, vector<4x32xbf16>, vector<80x32xf32> -> vector<80x32xf32>
    %77 = arith.addf %72, %76 : vector<80x32xf32>
    %c2_72 = arith.constant 2 : index
    %c0_73 = arith.constant 0 : index
    %78 = vector.load %arg12[%c2_72, %c0_73] : memref<102x4xbf16, #tpu.memory_space<vmem>>, vector<80x4xbf16>
    %c2_74 = arith.constant 2 : index
    %c0_75 = arith.constant 0 : index
    %c0_76 = arith.constant 0 : index
    %79 = vector.load %arg5[%c2_74, %c0_75, %c0_76] : memref<9x4x32xbf16, #tpu.memory_space<vmem>>, vector<1x4x32xbf16>
    %80 = vector.shape_cast %79 : vector<1x4x32xbf16> to vector<4x32xbf16>
    %cst_77 = arith.constant dense<0.000000e+00> : vector<80x32xf32>
    %81 = tpu.matmul %78, %80, %cst_77 {dimension_numbers = #tpu.dot_dimension_numbers<[1], [0], [0], [1], [0, 0, 1, 1], [], []>} : vector<80x4xbf16>, vector<4x32xbf16>, vector<80x32xf32> -> vector<80x32xf32>
    %82 = arith.addf %77, %81 : vector<80x32xf32>
    %c10_78 = arith.constant 10 : index
    %c0_79 = arith.constant 0 : index
    %83 = vector.load %arg12[%c10_78, %c0_79] : memref<102x4xbf16, #tpu.memory_space<vmem>>, vector<80x4xbf16>
    %c3_80 = arith.constant 3 : index
    %c0_81 = arith.constant 0 : index
    %c0_82 = arith.constant 0 : index
    %84 = vector.load %arg5[%c3_80, %c0_81, %c0_82] : memref<9x4x32xbf16, #tpu.memory_space<vmem>>, vector<1x4x32xbf16>
    %85 = vector.shape_cast %84 : vector<1x4x32xbf16> to vector<4x32xbf16>
    %cst_83 = arith.constant dense<0.000000e+00> : vector<80x32xf32>
    %86 = tpu.matmul %83, %85, %cst_83 {dimension_numbers = #tpu.dot_dimension_numbers<[1], [0], [0], [1], [0, 0, 1, 1], [], []>} : vector<80x4xbf16>, vector<4x32xbf16>, vector<80x32xf32> -> vector<80x32xf32>
    %87 = arith.addf %82, %86 : vector<80x32xf32>
    %c11_84 = arith.constant 11 : index
    %c0_85 = arith.constant 0 : index
    %88 = vector.load %arg12[%c11_84, %c0_85] : memref<102x4xbf16, #tpu.memory_space<vmem>>, vector<80x4xbf16>
    %c4_86 = arith.constant 4 : index
    %c0_87 = arith.constant 0 : index
    %c0_88 = arith.constant 0 : index
    %89 = vector.load %arg5[%c4_86, %c0_87, %c0_88] : memref<9x4x32xbf16, #tpu.memory_space<vmem>>, vector<1x4x32xbf16>
    %90 = vector.shape_cast %89 : vector<1x4x32xbf16> to vector<4x32xbf16>
    %cst_89 = arith.constant dense<0.000000e+00> : vector<80x32xf32>
    %91 = tpu.matmul %88, %90, %cst_89 {dimension_numbers = #tpu.dot_dimension_numbers<[1], [0], [0], [1], [0, 0, 1, 1], [], []>} : vector<80x4xbf16>, vector<4x32xbf16>, vector<80x32xf32> -> vector<80x32xf32>
    %92 = arith.addf %87, %91 : vector<80x32xf32>
    %c12 = arith.constant 12 : index
    %c0_90 = arith.constant 0 : index
    %93 = vector.load %arg12[%c12, %c0_90] : memref<102x4xbf16, #tpu.memory_space<vmem>>, vector<80x4xbf16>
    %c5_91 = arith.constant 5 : index
    %c0_92 = arith.constant 0 : index
    %c0_93 = arith.constant 0 : index
    %94 = vector.load %arg5[%c5_91, %c0_92, %c0_93] : memref<9x4x32xbf16, #tpu.memory_space<vmem>>, vector<1x4x32xbf16>
    %95 = vector.shape_cast %94 : vector<1x4x32xbf16> to vector<4x32xbf16>
    %cst_94 = arith.constant dense<0.000000e+00> : vector<80x32xf32>
    %96 = tpu.matmul %93, %95, %cst_94 {dimension_numbers = #tpu.dot_dimension_numbers<[1], [0], [0], [1], [0, 0, 1, 1], [], []>} : vector<80x4xbf16>, vector<4x32xbf16>, vector<80x32xf32> -> vector<80x32xf32>
    %97 = arith.addf %92, %96 : vector<80x32xf32>
    %c20 = arith.constant 20 : index
    %c0_95 = arith.constant 0 : index
    %98 = vector.load %arg12[%c20, %c0_95] : memref<102x4xbf16, #tpu.memory_space<vmem>>, vector<80x4xbf16>
    %c6_96 = arith.constant 6 : index
    %c0_97 = arith.constant 0 : index
    %c0_98 = arith.constant 0 : index
    %99 = vector.load %arg5[%c6_96, %c0_97, %c0_98] : memref<9x4x32xbf16, #tpu.memory_space<vmem>>, vector<1x4x32xbf16>
    %100 = vector.shape_cast %99 : vector<1x4x32xbf16> to vector<4x32xbf16>
    %cst_99 = arith.constant dense<0.000000e+00> : vector<80x32xf32>
    %101 = tpu.matmul %98, %100, %cst_99 {dimension_numbers = #tpu.dot_dimension_numbers<[1], [0], [0], [1], [0, 0, 1, 1], [], []>} : vector<80x4xbf16>, vector<4x32xbf16>, vector<80x32xf32> -> vector<80x32xf32>
    %102 = arith.addf %97, %101 : vector<80x32xf32>
    %c21 = arith.constant 21 : index
    %c0_100 = arith.constant 0 : index
    %103 = vector.load %arg12[%c21, %c0_100] : memref<102x4xbf16, #tpu.memory_space<vmem>>, vector<80x4xbf16>
    %c7_101 = arith.constant 7 : index
    %c0_102 = arith.constant 0 : index
    %c0_103 = arith.constant 0 : index
    %104 = vector.load %arg5[%c7_101, %c0_102, %c0_103] : memref<9x4x32xbf16, #tpu.memory_space<vmem>>, vector<1x4x32xbf16>
    %105 = vector.shape_cast %104 : vector<1x4x32xbf16> to vector<4x32xbf16>
    %cst_104 = arith.constant dense<0.000000e+00> : vector<80x32xf32>
    %106 = tpu.matmul %103, %105, %cst_104 {dimension_numbers = #tpu.dot_dimension_numbers<[1], [0], [0], [1], [0, 0, 1, 1], [], []>} : vector<80x4xbf16>, vector<4x32xbf16>, vector<80x32xf32> -> vector<80x32xf32>
    %107 = arith.addf %102, %106 : vector<80x32xf32>
    %c22 = arith.constant 22 : index
    %c0_105 = arith.constant 0 : index
    %108 = vector.load %arg12[%c22, %c0_105] : memref<102x4xbf16, #tpu.memory_space<vmem>>, vector<80x4xbf16>
    %c8_106 = arith.constant 8 : index
    %c0_107 = arith.constant 0 : index
    %c0_108 = arith.constant 0 : index
    %109 = vector.load %arg5[%c8_106, %c0_107, %c0_108] : memref<9x4x32xbf16, #tpu.memory_space<vmem>>, vector<1x4x32xbf16>
    %110 = vector.shape_cast %109 : vector<1x4x32xbf16> to vector<4x32xbf16>
    %cst_109 = arith.constant dense<0.000000e+00> : vector<80x32xf32>
    %111 = tpu.matmul %108, %110, %cst_109 {dimension_numbers = #tpu.dot_dimension_numbers<[1], [0], [0], [1], [0, 0, 1, 1], [], []>} : vector<80x4xbf16>, vector<4x32xbf16>, vector<80x32xf32> -> vector<80x32xf32>
    %112 = arith.addf %107, %111 : vector<80x32xf32>
    %c0_110 = arith.constant 0 : index
    %c0_111 = arith.constant 0 : index
    %113 = vector.load %arg6[%c0_110, %c0_111] : memref<1x32xf32, #tpu.memory_space<vmem>>, vector<1x32xf32>
    %114 = vector.broadcast %113 : vector<1x32xf32> to vector<80x32xf32>
    %115 = arith.mulf %112, %114 : vector<80x32xf32>
    %c0_112 = arith.constant 0 : index
    %c0_113 = arith.constant 0 : index
    %116 = vector.load %arg7[%c0_112, %c0_113] : memref<1x32xf32, #tpu.memory_space<vmem>>, vector<1x32xf32>
    %117 = vector.broadcast %116 : vector<1x32xf32> to vector<80x32xf32>
    %118 = arith.addf %115, %117 : vector<80x32xf32>
    %cst_114 = arith.constant 0.000000e+00 : f32
    %119 = vector.broadcast %cst_114 : f32 to vector<80x32xf32>
    %120 = arith.cmpf oge, %118, %119 : vector<80x32xf32>
    %cst_115 = arith.constant 0.00999999977 : f32
    %121 = vector.broadcast %cst_115 : f32 to vector<80x32xf32>
    %122 = arith.mulf %121, %118 : vector<80x32xf32>
    %123 = arith.select %120, %118, %122 : vector<80x32xi1>, vector<80x32xf32>
    %124 = vector.broadcast %4 : vector<80x1xf32> to vector<80x32xf32>
    %125 = arith.mulf %123, %124 : vector<80x32xf32>
    %126 = arith.truncf %125 : vector<80x32xf32> to vector<80x32xbf16>
    %c11_116 = arith.constant 11 : index
    %c0_117 = arith.constant 0 : index
    %127 = vector.load %arg13[%c11_116, %c0_117] : memref<102x32xbf16, #tpu.memory_space<vmem>>, vector<80x32xbf16>
    tpu.vector_store %arg13[%c11_116, %c0_117], %126 {strides = array<i32>} : memref<102x32xbf16, #tpu.memory_space<vmem>>, vector<80x32xbf16>,
    %cst_118 = arith.constant 0.000000e+00 : f32
    %128 = vector.broadcast %cst_118 : f32 to vector<80x32xf32>
    %c0_119 = arith.constant 0 : index
    %c0_120 = arith.constant 0 : index
    %129 = vector.load %arg13[%c0_119, %c0_120] : memref<102x32xbf16, #tpu.memory_space<vmem>>, vector<80x32xbf16>
    %c0_121 = arith.constant 0 : index
    %c0_122 = arith.constant 0 : index
    %c0_123 = arith.constant 0 : index
    %130 = vector.load %arg8[%c0_121, %c0_122, %c0_123] : memref<9x32x32xbf16, #tpu.memory_space<vmem>>, vector<1x32x32xbf16>
    %131 = vector.shape_cast %130 : vector<1x32x32xbf16> to vector<32x32xbf16>
    %cst_124 = arith.constant dense<0.000000e+00> : vector<80x32xf32>
    %132 = tpu.matmul %129, %131, %cst_124 {dimension_numbers = #tpu.dot_dimension_numbers<[1], [0], [0], [1], [0, 0, 1, 1], [], []>} : vector<80x32xbf16>, vector<32x32xbf16>, vector<80x32xf32> -> vector<80x32xf32>
    %133 = arith.addf %128, %132 : vector<80x32xf32>
    %c1_125 = arith.constant 1 : index
    %c0_126 = arith.constant 0 : index
    %134 = vector.load %arg13[%c1_125, %c0_126] : memref<102x32xbf16, #tpu.memory_space<vmem>>, vector<80x32xbf16>
    %c1_127 = arith.constant 1 : index
    %c0_128 = arith.constant 0 : index
    %c0_129 = arith.constant 0 : index
    %135 = vector.load %arg8[%c1_127, %c0_128, %c0_129] : memref<9x32x32xbf16, #tpu.memory_space<vmem>>, vector<1x32x32xbf16>
    %136 = vector.shape_cast %135 : vector<1x32x32xbf16> to vector<32x32xbf16>
    %cst_130 = arith.constant dense<0.000000e+00> : vector<80x32xf32>
    %137 = tpu.matmul %134, %136, %cst_130 {dimension_numbers = #tpu.dot_dimension_numbers<[1], [0], [0], [1], [0, 0, 1, 1], [], []>} : vector<80x32xbf16>, vector<32x32xbf16>, vector<80x32xf32> -> vector<80x32xf32>
    %138 = arith.addf %133, %137 : vector<80x32xf32>
    %c2_131 = arith.constant 2 : index
    %c0_132 = arith.constant 0 : index
    %139 = vector.load %arg13[%c2_131, %c0_132] : memref<102x32xbf16, #tpu.memory_space<vmem>>, vector<80x32xbf16>
    %c2_133 = arith.constant 2 : index
    %c0_134 = arith.constant 0 : index
    %c0_135 = arith.constant 0 : index
    %140 = vector.load %arg8[%c2_133, %c0_134, %c0_135] : memref<9x32x32xbf16, #tpu.memory_space<vmem>>, vector<1x32x32xbf16>
    %141 = vector.shape_cast %140 : vector<1x32x32xbf16> to vector<32x32xbf16>
    %cst_136 = arith.constant dense<0.000000e+00> : vector<80x32xf32>
    %142 = tpu.matmul %139, %141, %cst_136 {dimension_numbers = #tpu.dot_dimension_numbers<[1], [0], [0], [1], [0, 0, 1, 1], [], []>} : vector<80x32xbf16>, vector<32x32xbf16>, vector<80x32xf32> -> vector<80x32xf32>
    %143 = arith.addf %138, %142 : vector<80x32xf32>
    %c10_137 = arith.constant 10 : index
    %c0_138 = arith.constant 0 : index
    %144 = vector.load %arg13[%c10_137, %c0_138] : memref<102x32xbf16, #tpu.memory_space<vmem>>, vector<80x32xbf16>
    %c3_139 = arith.constant 3 : index
    %c0_140 = arith.constant 0 : index
    %c0_141 = arith.constant 0 : index
    %145 = vector.load %arg8[%c3_139, %c0_140, %c0_141] : memref<9x32x32xbf16, #tpu.memory_space<vmem>>, vector<1x32x32xbf16>
    %146 = vector.shape_cast %145 : vector<1x32x32xbf16> to vector<32x32xbf16>
    %cst_142 = arith.constant dense<0.000000e+00> : vector<80x32xf32>
    %147 = tpu.matmul %144, %146, %cst_142 {dimension_numbers = #tpu.dot_dimension_numbers<[1], [0], [0], [1], [0, 0, 1, 1], [], []>} : vector<80x32xbf16>, vector<32x32xbf16>, vector<80x32xf32> -> vector<80x32xf32>
    %148 = arith.addf %143, %147 : vector<80x32xf32>
    %c11_143 = arith.constant 11 : index
    %c0_144 = arith.constant 0 : index
    %149 = vector.load %arg13[%c11_143, %c0_144] : memref<102x32xbf16, #tpu.memory_space<vmem>>, vector<80x32xbf16>
    %c4_145 = arith.constant 4 : index
    %c0_146 = arith.constant 0 : index
    %c0_147 = arith.constant 0 : index
    %150 = vector.load %arg8[%c4_145, %c0_146, %c0_147] : memref<9x32x32xbf16, #tpu.memory_space<vmem>>, vector<1x32x32xbf16>
    %151 = vector.shape_cast %150 : vector<1x32x32xbf16> to vector<32x32xbf16>
    %cst_148 = arith.constant dense<0.000000e+00> : vector<80x32xf32>
    %152 = tpu.matmul %149, %151, %cst_148 {dimension_numbers = #tpu.dot_dimension_numbers<[1], [0], [0], [1], [0, 0, 1, 1], [], []>} : vector<80x32xbf16>, vector<32x32xbf16>, vector<80x32xf32> -> vector<80x32xf32>
    %153 = arith.addf %148, %152 : vector<80x32xf32>
    %c12_149 = arith.constant 12 : index
    %c0_150 = arith.constant 0 : index
    %154 = vector.load %arg13[%c12_149, %c0_150] : memref<102x32xbf16, #tpu.memory_space<vmem>>, vector<80x32xbf16>
    %c5_151 = arith.constant 5 : index
    %c0_152 = arith.constant 0 : index
    %c0_153 = arith.constant 0 : index
    %155 = vector.load %arg8[%c5_151, %c0_152, %c0_153] : memref<9x32x32xbf16, #tpu.memory_space<vmem>>, vector<1x32x32xbf16>
    %156 = vector.shape_cast %155 : vector<1x32x32xbf16> to vector<32x32xbf16>
    %cst_154 = arith.constant dense<0.000000e+00> : vector<80x32xf32>
    %157 = tpu.matmul %154, %156, %cst_154 {dimension_numbers = #tpu.dot_dimension_numbers<[1], [0], [0], [1], [0, 0, 1, 1], [], []>} : vector<80x32xbf16>, vector<32x32xbf16>, vector<80x32xf32> -> vector<80x32xf32>
    %158 = arith.addf %153, %157 : vector<80x32xf32>
    %c20_155 = arith.constant 20 : index
    %c0_156 = arith.constant 0 : index
    %159 = vector.load %arg13[%c20_155, %c0_156] : memref<102x32xbf16, #tpu.memory_space<vmem>>, vector<80x32xbf16>
    %c6_157 = arith.constant 6 : index
    %c0_158 = arith.constant 0 : index
    %c0_159 = arith.constant 0 : index
    %160 = vector.load %arg8[%c6_157, %c0_158, %c0_159] : memref<9x32x32xbf16, #tpu.memory_space<vmem>>, vector<1x32x32xbf16>
    %161 = vector.shape_cast %160 : vector<1x32x32xbf16> to vector<32x32xbf16>
    %cst_160 = arith.constant dense<0.000000e+00> : vector<80x32xf32>
    %162 = tpu.matmul %159, %161, %cst_160 {dimension_numbers = #tpu.dot_dimension_numbers<[1], [0], [0], [1], [0, 0, 1, 1], [], []>} : vector<80x32xbf16>, vector<32x32xbf16>, vector<80x32xf32> -> vector<80x32xf32>
    %163 = arith.addf %158, %162 : vector<80x32xf32>
    %c21_161 = arith.constant 21 : index
    %c0_162 = arith.constant 0 : index
    %164 = vector.load %arg13[%c21_161, %c0_162] : memref<102x32xbf16, #tpu.memory_space<vmem>>, vector<80x32xbf16>
    %c7_163 = arith.constant 7 : index
    %c0_164 = arith.constant 0 : index
    %c0_165 = arith.constant 0 : index
    %165 = vector.load %arg8[%c7_163, %c0_164, %c0_165] : memref<9x32x32xbf16, #tpu.memory_space<vmem>>, vector<1x32x32xbf16>
    %166 = vector.shape_cast %165 : vector<1x32x32xbf16> to vector<32x32xbf16>
    %cst_166 = arith.constant dense<0.000000e+00> : vector<80x32xf32>
    %167 = tpu.matmul %164, %166, %cst_166 {dimension_numbers = #tpu.dot_dimension_numbers<[1], [0], [0], [1], [0, 0, 1, 1], [], []>} : vector<80x32xbf16>, vector<32x32xbf16>, vector<80x32xf32> -> vector<80x32xf32>
    %168 = arith.addf %163, %167 : vector<80x32xf32>
    %c22_167 = arith.constant 22 : index
    %c0_168 = arith.constant 0 : index
    %169 = vector.load %arg13[%c22_167, %c0_168] : memref<102x32xbf16, #tpu.memory_space<vmem>>, vector<80x32xbf16>
    %c8_169 = arith.constant 8 : index
    %c0_170 = arith.constant 0 : index
    %c0_171 = arith.constant 0 : index
    %170 = vector.load %arg8[%c8_169, %c0_170, %c0_171] : memref<9x32x32xbf16, #tpu.memory_space<vmem>>, vector<1x32x32xbf16>
    %171 = vector.shape_cast %170 : vector<1x32x32xbf16> to vector<32x32xbf16>
    %cst_172 = arith.constant dense<0.000000e+00> : vector<80x32xf32>
    %172 = tpu.matmul %169, %171, %cst_172 {dimension_numbers = #tpu.dot_dimension_numbers<[1], [0], [0], [1], [0, 0, 1, 1], [], []>} : vector<80x32xbf16>, vector<32x32xbf16>, vector<80x32xf32> -> vector<80x32xf32>
    %173 = arith.addf %168, %172 : vector<80x32xf32>
    %c0_173 = arith.constant 0 : index
    %c0_174 = arith.constant 0 : index
    %174 = vector.load %arg9[%c0_173, %c0_174] : memref<1x32xf32, #tpu.memory_space<vmem>>, vector<1x32xf32>
    %175 = vector.broadcast %174 : vector<1x32xf32> to vector<80x32xf32>
    %176 = arith.mulf %173, %175 : vector<80x32xf32>
    %c0_175 = arith.constant 0 : index
    %c0_176 = arith.constant 0 : index
    %177 = vector.load %arg10[%c0_175, %c0_176] : memref<1x32xf32, #tpu.memory_space<vmem>>, vector<1x32xf32>
    %178 = vector.broadcast %177 : vector<1x32xf32> to vector<80x32xf32>
    %179 = arith.addf %176, %178 : vector<80x32xf32>
    %cst_177 = arith.constant 0.000000e+00 : f32
    %180 = vector.broadcast %cst_177 : f32 to vector<80x32xf32>
    %181 = arith.cmpf oge, %179, %180 : vector<80x32xf32>
    %cst_178 = arith.constant 0.00999999977 : f32
    %182 = vector.broadcast %cst_178 : f32 to vector<80x32xf32>
    %183 = arith.mulf %182, %179 : vector<80x32xf32>
    %184 = arith.select %181, %179, %183 : vector<80x32xi1>, vector<80x32xf32>
    %c0_179 = arith.constant 0 : index
    %c0_180 = arith.constant 0 : index
    %c0_181 = arith.constant 0 : index
    %185 = vector.load %arg11[%c0_179, %c0_180, %c0_181] : memref<1x80x32xf32, #tpu.memory_space<vmem>>, vector<1x80x32xf32>
    %186 = vector.shape_cast %185 : vector<1x80x32xf32> to vector<80x32xf32>
    %187 = vector.shape_cast %184 : vector<80x32xf32> to vector<1x80x32xf32>
    tpu.vector_store %arg11[%c0_179, %c0_180, %c0_181], %187 {strides = array<i32>} : memref<1x80x32xf32, #tpu.memory_space<vmem>>, vector<1x80x32xf32>,
    return
  }
  func.func @transform_0(%arg0: i32) -> (i32, i32, i32) {
    %c0_i32 = arith.constant 0 : i32
    %c0_i32_0 = arith.constant 0 : i32
    %c0_i32_1 = arith.constant 0 : i32
    return %arg0, %c0_i32, %c0_i32_0 : i32, i32, i32
  }
  func.func @transform_1(%arg0: i32) -> (i32, i32) {
    %c0_i32 = arith.constant 0 : i32
    %c0_i32_0 = arith.constant 0 : i32
    %c0_i32_1 = arith.constant 0 : i32
    return %c0_i32, %c0_i32_0 : i32, i32
  }
  func.func @transform_2(%arg0: i32) -> (i32, i32, i32) {
    %c0_i32 = arith.constant 0 : i32
    %c0_i32_0 = arith.constant 0 : i32
    %c0_i32_1 = arith.constant 0 : i32
    %c0_i32_2 = arith.constant 0 : i32
    return %c0_i32, %c0_i32_0, %c0_i32_1 : i32, i32, i32
  }
  func.func @transform_3(%arg0: i32) -> (i32, i32) {
    %c0_i32 = arith.constant 0 : i32
    %c0_i32_0 = arith.constant 0 : i32
    %c0_i32_1 = arith.constant 0 : i32
    return %c0_i32, %c0_i32_0 : i32, i32
  }
  func.func @transform_4(%arg0: i32) -> (i32, i32, i32) {
    %c0_i32 = arith.constant 0 : i32
    %c0_i32_0 = arith.constant 0 : i32
    %c0_i32_1 = arith.constant 0 : i32
    %c0_i32_2 = arith.constant 0 : i32
    return %c0_i32, %c0_i32_0, %c0_i32_1 : i32, i32, i32
  }
  func.func @transform_5(%arg0: i32) -> (i32, i32) {
    %c0_i32 = arith.constant 0 : i32
    %c0_i32_0 = arith.constant 0 : i32
    %c0_i32_1 = arith.constant 0 : i32
    return %c0_i32, %c0_i32_0 : i32, i32
  }
  func.func @transform_6(%arg0: i32) -> (i32, i32) {
    %c0_i32 = arith.constant 0 : i32
    %c0_i32_0 = arith.constant 0 : i32
    %c0_i32_1 = arith.constant 0 : i32
    return %c0_i32, %c0_i32_0 : i32, i32
  }
  func.func @transform_7(%arg0: i32) -> (i32, i32, i32) {
    %c0_i32 = arith.constant 0 : i32
    %c0_i32_0 = arith.constant 0 : i32
    %c0_i32_1 = arith.constant 0 : i32
    %c0_i32_2 = arith.constant 0 : i32
    return %c0_i32, %c0_i32_0, %c0_i32_1 : i32, i32, i32
  }
  func.func @transform_8(%arg0: i32) -> (i32, i32) {
    %c0_i32 = arith.constant 0 : i32
    %c0_i32_0 = arith.constant 0 : i32
    %c0_i32_1 = arith.constant 0 : i32
    return %c0_i32, %c0_i32_0 : i32, i32
  }
  func.func @transform_9(%arg0: i32) -> (i32, i32) {
    %c0_i32 = arith.constant 0 : i32
    %c0_i32_0 = arith.constant 0 : i32
    %c0_i32_1 = arith.constant 0 : i32
    return %c0_i32, %c0_i32_0 : i32, i32
  }
  func.func @transform_10(%arg0: i32) -> (i32, i32, i32) {
    %c0_i32 = arith.constant 0 : i32
    %c0_i32_0 = arith.constant 0 : i32
    %c0_i32_1 = arith.constant 0 : i32
    return %arg0, %c0_i32, %c0_i32_0 : i32, i32, i32
  }
}

</mosaic_0001>

<bundles_post_ra>
// kernel: _lambda_.1
= control target key start
LH: loop header
LB: loop body
LE: loop exit
PB: predicated region body
PF: predicated region fallthrough
CT: control target
= control target key end

     0   :  { %s4681_s13 = smov 0   ;;  %s5954_s0 = inlined_call_operand.vmem [shape: bf16[2,364,4], index: 0, kind: input, shape index: {}]   ;;  %s5955_s1 = inlined_call_operand.vmem [shape: f32[80,1], index: 1, kind: input, shape index: {}]   ;;  %s5956_s2 = inlined_call_operand.vmem [shape: bf16[9,4,4], index: 2, kind: input, shape index: {}]   ;;  %s5957_s3 = inlined_call_operand.vmem [shape: f32[1,4], index: 3, kind: input, shape index: {}]   ;;  %s5958_s4 = inlined_call_operand.vmem [shape: bf16[9,4,32], index: 4, kind: input, shape index: {}]   ;;  %s5959_s5 = inlined_call_operand.vmem [shape: f32[1,32], index: 5, kind: input, shape index: {}, may-alias: {5,8}]   ;;  %s5960_s6 = inlined_call_operand.vmem [shape: f32[1,32], index: 6, kind: input, shape index: {}]   ;;  %s5961_s7 = inlined_call_operand.vmem [shape: bf16[9,32,32], index: 7, kind: input, shape index: {}]   ;;  %s5962_s8 = inlined_call_operand.vmem [shape: f32[1,32], index: 8, kind: input, shape index: {}, may-alias: {5,8}]   ;;  %s5963_s9 = inlined_call_operand.vmem [shape: f32[1,32], index: 9, kind: input, shape index: {}]   ;;  %s5964_s10 = inlined_call_operand.vmem [shape: f32[2,80,32], index: 10, kind: output, shape index: {}]  }
   0x1 LB: > { %s4004_s14 = sadd.s32 4294967295, %s4623_s13   ;;  %p4008_p0 = scmp.ge.s32.totalorder %s4623_s13, 1  ;;  %s4623_s13 = sphi %s4681_s13, %s20_s13  }
   0x2   : > { %p312_p1 = scmp.lt.s32.totalorder %s4623_s13, 3 }
   0x4   : > { %p313_p2 = pnand %p4008_p0, %p312_p1 }
   0x5   : > { %p350_p3 = scmp.lt.s32.totalorder (!%p313_p2), %s4004_s14, 1 }
   0x6   : > { %316 = sbr.rel (%p313_p2) target bundleno = 1056 (0x420), region = 60 }
   0xb   : > { %v4011_v0 = vld [vmem:[%s5956_s2 + $0x2] sm:$0x3]  ;;  %vm523_vm0 = vcmask 1041408   ;;  %v4062_v1 = vld [vmem:[%s5956_s2 + $0x4] sm:$0x3]  ;;  %s5968_s14 = smov (!%p350_p3, %s4004_s14), 1 }
   0xc   : > { %v525_v2 = vsel %vm523_vm0, %v4011_v0, 0  ;;  %v740_v3 = vsel %vm523_vm0, %v4062_v1, 0  ;;  %v4088_v4 = vld [vmem:[%s5956_s2 + $0x6] sm:$0x3]  ;;  %v411_v6 = vld [vmem:[%s5956_s2] sm:$0x3] }
   0xd   : > { %534 = vmatpush.bf16.msra.mxu0 %v525_v2  ;;  %4595 = vmatpush.bf16.msra.mxu3 %v525_v2  ;;  %v855_v5 = vsel %vm523_vm0, %v4088_v4, 0  ;;  %s4598_s23 = smul.u32 184, %s5968_s14  ;;  %v602_v7 = vsel %vm523_vm0, %v411_v6, 0  ;;  %vm507_vm1 = vcmask 31744   ;;  %vm453_vm2 = vsmask.f32 6400 }
   0xe   : > { %4597 = vmatpush.bf16.msra.mxu2 %v740_v3  ;;  %4596 = vmatpush.bf16.msra.mxu1 %v602_v7  ;;  %vm679_vm3 = vsmask.f32 7424  ;;  %v4114_v60 = vld [vmem:[%s5956_s2 + $0x8] sm:$0x3]  ;;  %vm1054_vm4 = vsmask.f32 4352 }
   0xf   : > { %s4711_s26 = scalar_lea.vmem %s5954_s0, %s4598_s23  ;;  %v1002_v62 = vsel %vm523_vm0, %v4114_v60, 0  ;;  %vm827_vm5 = vcmask 1044480   ;;  %vm1211_vm6 = vcmask 1046528   ;;  %vm1326_vm7 = vsmask.f32 5376  ;;  %s4599_s12 = smul.u32 80, %s5968_s14 }
  0x10   : > { %v4014_v8 = vld [vmem:[%s4711_s26 + $0x2c] sm:$0xe]  ;;  %v4509_v9 = vld [vmem:[%s4711_s26 + $0x2c] sm:$0xf0]  ;;  %v4510_v10 = vld [vmem:[%s4711_s26 + $0x34] sm:$0xff]  ;;  %vm361_vm8 = vcmask 27648  }
  0x11   : > { %864 = vmatpush.bf16.msrb.mxu3 %v855_v5  ;;  %611 = vmatpush.bf16.msrb.mxu0 %v602_v7  ;;  %v4015_v11 = vor.u32 %v4509_v9, %v4014_v8  ;;  %v4511_v12 = vld [vmem:[%s4711_s26 + $0x3c] sm:$0xff]  ;;  %v4515_v13 = vld [vmem:[%s4711_s26 + $0x8] sm:$0xff]  ;;  %v463_v14 = vshrl.u32 %v4510_v10, 16  ;;  %v466_v15 = vshll.u32 %v4510_v10, 16  ;;  %v4516_v16 = vld [vmem:[%s4711_s26 + $0x10] sm:$0xff]  ;;  %vm1760_vm9 = vcmask 27649   ;;  %s5905_s17 = scalar_lea.vmem %s5964_s10, %s4599_s12 }
  0x12   : > { %v4505_v17 = vld [vmem:[%s4711_s26 + $0x8] sm:$0xff]  ;;  %v472_v20 = vshrl.u32 %v4511_v12, 16  ;;  %v475_v21 = vshll.u32 %v4511_v12, 16  ;;  %v688_v24 = vshll.u32 %v4515_v13, 16  ;;  %v692_v25 = vshrl.u32 %v4515_v13, 16  ;;  %v4517_v43 = vld [vmem:[%s4711_s26 + $0x18] sm:$0xff] }
  0x13   : > { %v455_v18 = vshrl.u32 %v4015_v11, 16  ;;  %v458_v19 = vshll.u32 %v4015_v11, 16  ;;  %v465_v22 = vrot.slane %v463_v14, 1  ;;  %v468_v23 = vrot.slane %v466_v15, 2  ;;  %4058 = vmatmul.msk.bf16.vlgmr.msra.gmra.mxu1 %vm507_vm1, %v4505_v17  ;;  %v4512_v35 = vld [vmem:[%s4711_s26 + $0x44] sm:$0xff]  ;;  %v4506_v48 = vld [vmem:[%s4711_s26 + $0x10] sm:$0xff] }
  0x14   : > { %v474_v28 = vrot.slane %v472_v20, 1  ;;  %v477_v29 = vrot.slane %v475_v21, 2  ;;  %v690_v31 = vrot.slane %v688_v24, 1  ;;  %v696_v32 = vshll.u32 %v4516_v16, 16  ;;  %v4504_v52 = vld [vmem:[%s4711_s26] sm:$0xff]  ;;  %v4513_v54 = vld [vmem:[%s4711_s26 + $0x4c] sm:$0xff] }
  0x15   : > { %v457_v26 = vrot.slane %v455_v18, 1  ;;  %v460_v27 = vrot.slane %v458_v19, 2  ;;  %v469_v30 = vor.u32 %v468_v23, %v465_v22  ;;  %v481_v41 = vshrl.u32 %v4512_v35, 16  ;;  %v4514_v55 = vld [vmem:[%s4711_s26] sm:$0xff]  ;;  %v4507_v6 = vld [vmem:[%s4711_s26 + $0x18] sm:$0xff]  ;;  %v4525_v23 = vld [vmem:[%s4711_s26 + $0x90] sm:$0xff] }
  0x16   : > { %v478_v34 = vor.u32 %v477_v29, %v474_v28  ;;  %v694_v36 = vor.u32 %v692_v25, %v690_v31  ;;  %v698_v37 = vrot.slane %v696_v32, 1  ;;  %v484_v42 = vshll.u32 %v4512_v35, 16  ;;  %v4518_v61 = vld [vmem:[%s4711_s26 + $0x20] sm:$0xff]  ;;  %v648_v12 = vld [vmem:[%s4711_s26 + $0x28] sm:$0x1]  ;;  %v4526_v60 = vld [vmem:[%s4711_s26 + $0x98] sm:$0xff] }
  0x17   : > { %v461_v33 = vor.u32 %v460_v27, %v457_v26  ;;  %v483_v44 = vrot.slane %v481_v41, 1  ;;  %v700_v46 = vshrl.u32 %v4516_v16, 16  ;;  %v704_v47 = vshll.u32 %v4517_v43, 16  ;;  %v4524_v16 = vld [vmem:[%s4711_s26 + $0x88] sm:$0xff]  ;;  %v4198_v29 = vld [vmem:[%s5956_s2 + $0x10] sm:$0x3] }
  0x18   : > { %v479_v39 = vsel %vm453_vm2, %v469_v30, %v478_v34  ;;  %v699_v40 = vsel %vm679_vm3, %v694_v36, %v698_v37  ;;  %v486_v45 = vrot.slane %v484_v42, 2  ;;  %v490_v57 = vshrl.u32 %v4513_v54, 16  ;;  %v4172_v21 = vld [vmem:[%s5956_s2 + $0xe] sm:$0x3]  ;;  %v4146_v22 = vld [vmem:[%s5956_s2 + $0xc] sm:$0x3] }
  0x19   : > { %v470_v38 = vsel %vm453_vm2, %v461_v33, %v469_v30  ;;  %4033 = vmatmul.msk.bf16.vlgmr.msra.gmra.mxu3 %vm507_vm1, %v479_v39  ;;  %4084 = vmatmul.msk.bf16.vlgmr.msra.gmra.mxu2 %vm507_vm1, %v699_v40  ;;  %v702_v50 = vor.u32 %v700_v46, %v698_v37  ;;  %v706_v51 = vrot.slane %v704_v47, 1  ;;  %v493_v58 = vshll.u32 %v4513_v54, 16  ;;  %v4140_v28 = vld [vmem:[%s5956_s2 + $0xa] sm:$0x3]  ;;  %v4508_v39 = vld [vmem:[%s4711_s26 + $0x20] sm:$0xff] }
  0x1a   : > { %4032 = vmatmul.msk.bf16.vlgmr.msra.gmra.mxu0 %vm507_vm1, %v470_v38  ;;  %v487_v49 = vor.u32 %v486_v45, %v483_v44  ;;  %v683_v59 = vshll.u32 %v4514_v55, 16  ;;  %v492_v63 = vrot.slane %v490_v57, 1  ;;  %v681_v1 = vshrl.u32 %v4514_v55, 16  ;;  %v4091_v40 = vld [vmem:[%s4711_s26 + $0x58] sm:$0x8] }
  0x1b   : > { %749 = vmatpush.bf16.msra.mxu0 %v740_v3  ;;  %v707_v56 = vsel %vm679_vm3, %v702_v50, %v706_v51  ;;  %v495_v0 = vrot.slane %v493_v58, 2  ;;  %v422_v3 = vld [vmem:[%s4711_s26 + $0x54] sm:$0x3]  ;;  %v708_v4 = vshrl.u32 %v4517_v43, 16  ;;  %v712_v5 = vshll.u32 %v4518_v61, 16  ;;  %v4776_v43 = vld [vmem:[%s4711_s26 + $0x60] sm:$0xff] }
  0x1c   : > { %v488_v53 = vsel %vm453_vm2, %v478_v34, %v487_v49  ;;  %v685_v2 = vrot.slane %v683_v59, 1  ;;  %v446_v7 = vunpack.c.l.b16 %v422_v3  ;;  %v672_v18 = vunpack.c.l.b16 %v648_v12  ;;  %v4519_v41 = vld [vmem:[%s4711_s26 + $0x58] sm:$0xf0]  ;;  %v4791_v3 = vld [vmem:[%s4711_s26 + $0xc] sm:$0xff] }
  0x1d   : > { %v496_v8 = vor.u32 %v495_v0, %v492_v63  ;;  %v710_v10 = vor.u32 %v708_v4, %v706_v51  ;;  %v714_v11 = vrot.slane %v712_v5, 1  ;;  %v945_v24 = vshll.u32 %v4524_v16, 16 }
  0x1e   : > { %v686_v9 = vor.u32 %v685_v2, %v681_v1  ;;  %v452_v13 = vpack.c.b16 %v446_v7, %v446_v7  ;;  %v1396_v25 = vsel %vm523_vm0, %v4172_v21, 0  ;;  %v1239_v26 = vsel %vm523_vm0, %v4146_v22, 0 }
  0x1f   : > { %v497_v14 = vsel %vm453_vm2, %v487_v49, %v496_v8  ;;  %v715_v17 = vsel %vm679_vm3, %v710_v10, %v714_v11  ;;  %v678_v27 = vpack.c.b16 %v672_v18, %v672_v18  ;;  %1405 = vmatpush.bf16.msra.mxu3 %v1396_v25  ;;  %1248 = vmatpush.bf16.msrb.mxu2 %v1239_v26  ;;  %v1124_v30 = vsel %vm523_vm0, %v4140_v28, 0 }
  0x20   : > { %v691_v15 = vsel %vm679_vm3, %v686_v9, %v690_v31  ;;  %v499_v19 = vshrl.u32 %v452_v13, 16  ;;  %v502_v20 = vshll.u32 %v452_v13, 16  ;;  %v1517_v31 = vsel %vm523_vm0, %v4198_v29, 0  ;;  %1133 = vmatpush.bf16.msrb.mxu1 %v1124_v30 }
  0x21   : > { %v716_v34 = vshrl.u32 %v4518_v61, 16  ;;  %v943_v35 = vshrl.u32 %v4524_v16, 16  ;;  %v947_v36 = vrot.slane %v945_v24, 1  ;;  %v950_v37 = vshll.u32 %v4525_v23, 16  ;;  %v4149_v61 = vld [vmem:[%s4711_s26 + $0x4] sm:$0xe] }
  0x22   : > { %v501_v32 = vrot.slane %v499_v19, 1  ;;  %v504_v33 = vrot.slane %v502_v20, 2  ;;  %v720_v38 = vshll.u32 %v678_v27, 16  ;;  %v4092_v44 = vor.u32 %v4519_v41, %v4091_v40  ;;  %v4527_v20 = vld [vmem:[%s4711_s26 + $0xa0] sm:$0xff]  ;;  %v4809_v24 = vld [vmem:[%s4711_s26 + $0x14] sm:$0xff] }
  0x23   : > { %4059 = vmatmul.msk.bf16.gmra.mxu1 %vm507_vm1, %v4506_v48  ;;  %v948_v45 = vor.u32 %v947_v36, %v943_v35  ;;  %v952_v46 = vrot.slane %v950_v37, 1  ;;  %v718_v47 = vor.u32 %v716_v34, %v714_v11  ;;  %v1064_v51 = vshrl.u32 %v4776_v43, 16  ;;  %v4522_v27 = vld [vmem:[%s4711_s26 + $0x70] sm:$0xff] }
  0x24   : > { %v505_v42 = vor.u32 %v504_v33, %v501_v32  ;;  %v722_v48 = vrot.slane %v720_v38, 1  ;;  %v1056_v49 = vshrl.u32 %v4092_v44, 16  ;;  %v1059_v50 = vshll.u32 %v4092_v44, 16  ;;  %v4528_v38 = vld [vmem:[%s4711_s26 + $0xa8] sm:$0xff] }
  0x25   : > { %v953_v54 = vsel %vm679_vm3, %v948_v45, %v952_v46  ;;  %v1066_v58 = vrot.slane %v1064_v51, 3  ;;  %v954_v1 = vshrl.u32 %v4525_v23, 16  ;;  %v958_v2 = vshll.u32 %v4526_v60, 16  ;;  %v4827_v45 = vld [vmem:[%s4711_s26 + $0x78] sm:$0xff] }
  0x26   : > { %v723_v55 = vsel %vm679_vm3, %v718_v47, %v722_v48  ;;  %v1061_v57 = vrot.slane %v1059_v50, 4  ;;  %v829_v7 = vrot.slane %v4776_v43, 3  ;;  %v1213_v12 = vrot.slane %v4791_v3, 1 }
  0x27   : > { %v956_v9 = vor.u32 %v954_v1, %v952_v46  ;;  %v960_v10 = vrot.slane %v958_v2, 1  ;;  %v962_v22 = vshrl.u32 %v4526_v60, 16  ;;  %v966_v23 = vshll.u32 %v4527_v20, 16 }
  0x28   : > { %v1215_v30 = vrot.slane %v4809_v24, 1  ;;  %v1085_v32 = vshll.u32 %v4522_v27, 16  ;;  %v970_v40 = vshrl.u32 %v4527_v20, 16  ;;  %v974_v41 = vshll.u32 %v4528_v38, 16 }
  0x29   : > { %4034 = vmatmul.msk.bf16.gmra.mxu3 %vm507_vm1, %v488_v53  ;;  %4085 = vmatmul.msk.bf16.gmra.mxu2 %vm507_vm1, %v707_v56  ;;  %v506_v53 = vsel %vm453_vm2, %v496_v8, %v505_v42  ;;  %v1058_v56 = vrot.slane %v1056_v49, 3  ;;  %v4521_v8 = vld [vmem:[%s4711_s26 + $0x68] sm:$0xff]  ;;  %v961_v16 = vsel %vm679_vm3, %v956_v9, %v960_v10  ;;  %v964_v28 = vor.u32 %v962_v22, %v960_v10  ;;  %v4823_v42 = vld [vmem:[%s4711_s26 + $0x1c] sm:$0xff]  ;;  %v911_v49 = vld [vmem:[%s4711_s26 + $0xb0] sm:$0x1] }
  0x2a   : > { %4057 = vmatmul.msk.bf16.vlgmr.msrb.gmra.mxu0 %vm507_vm1, %v4504_v52  ;;  %v1067_v52 = vshll.u32 %v4776_v43, 16  ;;  %v1073_v13 = vshrl.u32 %v4521_v8, 16  ;;  %v831_v26 = vrot.slane %v4521_v8, 3  ;;  %v968_v29 = vrot.slane %v966_v23, 1 }
  0x2b   : > { %1011 = vmatpush.bf16.msrb.mxu0 %v1002_v62  ;;  %v4529_v62 = vld [vmem:[%s4711_s26 + $0x4] sm:$0xf0]  ;;  %v1062_v63 = vor.u32 %v1061_v57, %v1058_v56  ;;  %v1216_v35 = vsel %vm1211_vm6, %v1213_v12, %v1215_v30  ;;  %v1087_v37 = vrot.slane %v1085_v32, 4  ;;  %v976_v47 = vrot.slane %v974_v41, 1 }
  0x2c   : > { %v1069_v59 = vrot.slane %v1067_v52, 4  ;;  %v4793_v4 = vor.u32 %v4529_v62, %v4149_v61  ;;  %v1075_v18 = vrot.slane %v1073_v13, 3  ;;  %v832_v33 = vsel %vm827_vm5, %v829_v7, %v831_v26  ;;  %v392_v41 = vld [vmem:[%s5955_s1 + $0x8] sm:$0xff] }
  0x2d   : > { %v969_v34 = vsel %vm679_vm3, %v964_v28, %v968_v29  ;;  %v972_v46 = vor.u32 %v970_v40, %v968_v29  ;;  %v1217_v48 = vrot.slane %v4823_v42, 1  ;;  %v1091_v50 = vshrl.u32 %v4827_v45, 16  ;;  %v391_v28 = vld [vmem:[%s5955_s1] sm:$0xff] }
  0x2e   : > { %v1070_v0 = vor.u32 %v1069_v59, %v1066_v58  ;;  %v1212_v11 = vrot.slane %v4793_v4, 1  ;;  %v1094_v51 = vshll.u32 %v4827_v45, 16  ;;  %v1048_v58 = vld [vmem:[%s4711_s26 + $0x80] sm:$0xf]  ;;  %v978_v62 = vshrl.u32 %v4528_v38, 16 }
  0x2f   : > { %v1093_v56 = vrot.slane %v1091_v50, 3  ;;  %v1052_v61 = vunpack.c.l.b16 %v1048_v58  ;;  %v1452_v20 = vshll.u32 %v4793_v4, 16  ;;  %v1460_v22 = vshll.u32 %v4791_v3, 16 }
  0x30   : > { %v1071_v5 = vsel %vm1054_vm4, %v1062_v63, %v1070_v0  ;;  %v1096_v57 = vrot.slane %v1094_v51, 4  ;;  %vm1761_vm10 = vsmask.f32 7942  ;;  %vm1647_vm12 = vsmask.f32 1280 }
  0x31   : > { %v1053_v2 = vpack.c.b16 %v1052_v61, %v1052_v61  ;;  %vm1762_vm11 = vmand %vm1760_vm9, %vm1761_vm10  ;;  %vm1648_vm13 = vsmask.f32 5392  ;;  %vm374_vm15 = vcmask 26624  }
  0x32   : > { %v1097_v60 = vor.u32 %v1096_v57, %v1093_v56  ;;  %vm5074_vm14 = vmor %vm1647_vm12, %vm1648_vm13 }
  0x33   : > { %4060 = vmatmul.msk.bf16.gmra.mxu1 %vm507_vm1, %v4507_v6  ;;  %v828_v6 = vrot.slane %v4092_v44, 3  ;;  %v833_v44 = vrot.slane %v4522_v27, 3  ;;  %v1100_v9 = vshrl.u32 %v1053_v2, 16  ;;  %v1103_v10 = vshll.u32 %v1053_v2, 16 }
  0x35   : > { %v834_v52 = vsel %vm827_vm5, %v831_v26, %v833_v44 }
  0x39   : > { %4035 = vmatmul.msk.bf16.gmra.mxu3 %vm507_vm1, %v497_v14  ;;  %4086 = vmatmul.msk.bf16.gmra.mxu2 %vm507_vm1, %v715_v17  ;;  %v1076_v14 = vshll.u32 %v4521_v8, 16  ;;  %v1214_v17 = vsel %vm1211_vm6, %v1212_v11, %v1213_v12  ;;  %v796_v12 = vld [vmem:[%s4711_s26 + $0x80] sm:$0x7] }
  0x3a   : > { %4083 = vmatmul.msk.bf16.vlgmr.msra.gmra.mxu0 %vm507_vm1, %v691_v15  ;;  %v830_v15 = vsel %vm827_vm5, %v828_v6, %v829_v7  ;;  %v980_v6 = vor.u32 %v978_v62, %v976_v47 }
  0x3b   : > { %1526 = vmatpush.bf16.msra.mxu0 %v1517_v31  ;;  %v1078_v19 = vrot.slane %v1076_v14, 4  ;;  %v1082_v31 = vshrl.u32 %v4522_v27, 16  ;;  %v4625_v27 = vmov 0  }
  0x3c   : > { %4609 = vset.pattern.permute.xlu0 %v4625_v27  ;;  %4610 = vset.pattern.permute.xlu1 %v4625_v27  ;;  %363 = vst.msk [vmem:[#allocation2 + $0x4] sm:$0xf] %vm361_vm8, %v4625_v27 }
  0x3d   : > { %v1079_v21 = vor.u32 %v1078_v19, %v1075_v18  ;;  %v1084_v36 = vrot.slane %v1082_v31, 3  ;;  %v820_v18 = vunpack.c.l.b16 %v796_v12  ;;  %v1449_v19 = vshrl.u32 %v4793_v4, 16  ;;  %1579 = vperm.xlu0 %4609, %v391_v28   ;;  %4611 = vset.pattern.permute.xlu2 %v4625_v27  ;;  %v400_v12 = vld [vmem:[%s5955_s1 + $0x48] sm:$0xff]  ;;  %362 = vst.msk [vmem:[#allocation2] sm:$0xf] %vm361_vm8, %v4625_v27 }
  0x3e   : > { %v1454_v4 = vrot.slane %v1452_v20, 2  ;;  %v1462_v31 = vrot.slane %v1460_v22, 2  ;;  %v1478_v22 = vshll.u32 %v4823_v42, 16  ;;  %364 = vst.msk [vmem:[#allocation2 + $0x8] sm:$0xf] %vm361_vm8, %v4625_v27 }
  0x3f   : > { %v1080_v25 = vsel %vm1054_vm4, %v1070_v0, %v1079_v21  ;;  %v4842_v0 = vld [vmem:[%s4711_s26 + $0x24] sm:$0xff]  ;;  %v826_v26 = vpack.c.b16 %v820_v18, %v820_v18  ;;  %v1451_v29 = vrot.slane %v1449_v19, 1  ;;  %v394_v18 = vld [vmem:[%s5955_s1 + $0x18] sm:$0xff]  ;;  %365 = vst.msk [vmem:[#allocation2 + $0xc] sm:$0xf] %vm361_vm8, %v4625_v27 }
  0x40   : > { %v1219_v8 = vrot.slane %v4842_v0, 1  ;;  %366 = vst.msk [vmem:[#allocation2 + $0x10] sm:$0xf] %vm361_vm8, %v4625_v27 }
  0x41   : > { %367 = vst.msk [vmem:[#allocation2 + $0x14] sm:$0xf] %vm361_vm8, %v4625_v27 }
  0x42   : > { %v1220_v14 = vsel %vm1211_vm6, %v1217_v48, %v1219_v8  ;;  %368 = vst.msk [vmem:[#allocation2 + $0x18] sm:$0xf] %vm361_vm8, %v4625_v27 }
  0x43   : > { %4061 = vmatmul.msk.bf16.gmra.mxu1 %vm507_vm1, %v4508_v39  ;;  %v1088_v39 = vor.u32 %v1087_v37, %v1084_v36  ;;  %v4534_v36 = vld [vmem:[%s4711_s26 + $0x30] sm:$0xf0]  ;;  %v1455_v37 = vor.u32 %v1454_v4, %v1451_v29  ;;  %369 = vst.msk [vmem:[#allocation2 + $0x1c] sm:$0xf] %vm361_vm8, %v4625_v27 }
  0x44   : > { %370 = vst.msk [vmem:[#allocation2 + $0x20] sm:$0xf] %vm361_vm8, %v4625_v27 }
  0x45   : > { %v1089_v43 = vsel %vm1054_vm4, %v1079_v21, %v1088_v39  ;;  %v1098_v1 = vsel %vm1054_vm4, %v1088_v39, %v1097_v60  ;;  %v1457_v21 = vshrl.u32 %v4791_v3, 16  ;;  %1584 = vperm.xlu0 %4609, %v392_v41   ;;  %371 = vst.msk [vmem:[#allocation2 + $0x24] sm:$0xf] %vm361_vm8, %v4625_v27 }
  0x46   : > { %372 = vst.msk [vmem:[#allocation2 + $0x28] sm:$0xf] %vm361_vm8, %v4625_v27 }
  0x47   : > { %373 = vst.msk [vmem:[#allocation2 + $0x2c] sm:$0xf] %vm361_vm8, %v4625_v27 }
  0x48   : > { %375 = vst.msk [vmem:[#allocation2 + $0x30] sm:$0x7] %vm374_vm15, %v4625_v27 }
  0x49   : > { %4036 = vmatmul.msk.bf16.gmra.mxu3 %vm507_vm1, %v506_v53  ;;  %4087 = vmatmul.msk.bf16.gmra.mxu2 %vm507_vm1, %v723_v55  ;;  %v977_v53 = vsel %vm679_vm3, %v972_v46, %v976_v47  ;;  %v1218_v55 = vsel %vm1211_vm6, %v1215_v30, %v1217_v48  ;;  %v1459_v30 = vrot.slane %v1457_v21, 1  ;;  %v1475_v21 = vshrl.u32 %v4823_v42, 16 }
  0x4a   : > { %4135 = vmatmul.msk.bf16.vlgmr.msrb.gmra.mxu0 %vm507_vm1, %v953_v54  ;;  %v935_v54 = vunpack.c.l.b16 %v911_v49 }
  0x4b   : > { %v1463_v38 = vor.u32 %v1462_v31, %v1459_v30  ;;  %v1477_v31 = vrot.slane %v1475_v21, 1 }
  0x4c   : > { %v941_v59 = vpack.c.b16 %v935_v54, %v935_v54  ;;  %v1469_v54 = vshll.u32 %v4809_v24, 16 }
  0x4d   : > { %v1464_v46 = vsel %vm453_vm2, %v1455_v37, %v1463_v38 }
  0x4e   : > { %v982_v63 = vshll.u32 %v941_v59, 16  ;;  %v1471_v2 = vrot.slane %v1469_v54, 2 }
  0x50   : > { %v984_v7 = vrot.slane %v982_v63, 1 }
  0x52   : > { %v985_v13 = vsel %vm679_vm3, %v980_v6, %v984_v7 }
  0x53   : > { %4141 = vmatmul.msk.bf16.vlgmr.msrb.gmra.mxu1 %vm507_vm1, %v1071_v5  ;;  %v835_v5 = vrot.slane %v4827_v45, 3  ;;  %v4535_v45 = vld [vmem:[%s4711_s26 + $0x38] sm:$0xff] }
  0x54   : > { %v1336_v51 = vshrl.u32 %v4535_v45, 16 }
  0x55   : > { %v836_v11 = vsel %vm827_vm5, %v833_v44, %v835_v5 }
  0x56   : > { %v1338_v62 = vrot.slane %v1336_v51, 2 }
  0x59   : > { %4109 = vmatmul.msk.bf16.vlgmr.msrb.gmra.mxu3 %vm507_vm1, %v830_v15  ;;  %4167 = vmatmul.msk.bf16.vlgmr.msrb.gmra.mxu2 %vm507_vm1, %v1214_v17  ;;  %v1180_v15 = vld [vmem:[%s4711_s26 + $0x2c] sm:$0x1]  ;;  %v1105_v17 = vrot.slane %v1103_v10, 4 }
  0x5a   : > { %4136 = vmatmul.msk.bf16.gmra.mxu0 %vm507_vm1, %v961_v16  ;;  %v1102_v16 = vrot.slane %v1100_v9, 3  ;;  %v1204_v23 = vunpack.c.l.b16 %v1180_v15  ;;  %v4536_v15 = vld [vmem:[%s4711_s26 + $0x40] sm:$0xff] }
  0x5b   : > { %v1345_v19 = vshrl.u32 %v4536_v15, 16  ;;  %v1348_v20 = vshll.u32 %v4536_v15, 16 }
  0x5c   : > { %v1210_v3 = vpack.c.b16 %v1204_v23, %v1204_v23 }
  0x5d   : > { %v1347_v4 = vrot.slane %v1345_v19, 2  ;;  %v1350_v30 = vrot.slane %v1348_v20, 3  ;;  %v396_v20 = vld [vmem:[%s5955_s1 + $0x28] sm:$0xff] }
  0x5e   : > { %v1221_v39 = vrot.slane %v1210_v3, 1  ;;  %v1480_v3 = vrot.slane %v1478_v22, 2 }
  0x5f   : > { %v1351_v42 = vor.u32 %v1350_v30, %v1347_v4  ;;  %v1295_v30 = vld [vmem:[%s4711_s26 + $0x58] sm:$0x7] }
  0x60   : > { %v1222_v47 = vsel %vm1211_vm6, %v1219_v8, %v1221_v39 }
  0x63   : > { %4142 = vmatmul.msk.bf16.gmra.mxu1 %vm507_vm1, %v1080_v25  ;;  %v1106_v25 = vor.u32 %v1105_v17, %v1102_v16 }
  0x69   : > { %4110 = vmatmul.msk.bf16.gmra.mxu3 %vm507_vm1, %v832_v33  ;;  %4168 = vmatmul.msk.bf16.gmra.mxu2 %vm507_vm1, %v1216_v35  ;;  %v1107_v33 = vsel %vm1054_vm4, %v1097_v60, %v1106_v25  ;;  %v4175_v35 = vld [vmem:[%s4711_s26 + $0x30] sm:$0xc]  ;;  %vm1775_vm4 = vcmask 25600  }
  0x6a   : > { %4137 = vmatmul.msk.bf16.gmra.mxu0 %vm507_vm1, %v969_v34  ;;  %v837_v34 = vrot.slane %v826_v26, 3  ;;  %v4176_v40 = vor.u32 %v4534_v36, %v4175_v35  ;;  %v397_v60 = vld [vmem:[%s5955_s1 + $0x30] sm:$0xff]  ;;  %vm1776_vm9 = vmand %vm1775_vm4, %vm1647_vm12  ;;  %vm2984_vm4 = vcmask 261120  }
  0x6b   : > { %1609 = vperm.xlu0 %4609, %v397_v60  }
  0x6c   : > { %v838_v44 = vsel %vm827_vm5, %v835_v5, %v837_v34  ;;  %v1328_v49 = vshrl.u32 %v4176_v40, 16  ;;  %v1331_v50 = vshll.u32 %v4176_v40, 16  ;;  %v1481_v34 = vor.u32 %v1480_v3, %v1477_v31  ;;  %v4537_v40 = vld [vmem:[%s4711_s26 + $0x48] sm:$0xff] }
  0x6d   : > { %v1319_v3 = vunpack.c.l.b16 %v1295_v30 }
  0x6e   : > { %v1330_v58 = vrot.slane %v1328_v49, 2  ;;  %v1333_v59 = vrot.slane %v1331_v50, 3 }
  0x70   : > { %v1334_v6 = vor.u32 %v1333_v59, %v1330_v58  ;;  %v1442_v58 = vld [vmem:[%s4711_s26 + $0x2c] sm:$0x3] }
  0x73   : > { %4143 = vmatmul.msk.bf16.gmra.mxu1 %vm507_vm1, %v1089_v43  ;;  %1624 = vperm.xlu0 %4609, %v400_v12  }
  0x79   : > { %4111 = vmatmul.msk.bf16.gmra.mxu3 %vm507_vm1, %v834_v52  ;;  %4169 = vmatmul.msk.bf16.gmra.mxu2 %vm507_vm1, %v1218_v55  ;;  %v1339_v52 = vshll.u32 %v4535_v45, 16  ;;  %v1357_v45 = vshll.u32 %v4537_v40, 16 }
  0x7a   : > { %4138 = vmatmul.msk.bf16.gmra.mxu0 %vm507_vm1, %v977_v53  ;;  %v1466_v53 = vshrl.u32 %v4809_v24, 16  ;;  %v393_v24 = vld [vmem:[%s5955_s1 + $0x10] sm:$0xff] }
  0x7b   : > { %v1341_v63 = vrot.slane %v1339_v52, 3  ;;  %1589 = vperm.xlu1 %4610, %v393_v24   ;;  %v1359_v54 = vrot.slane %v1357_v45, 3 }
  0x7d   : > { %v1342_v7 = vor.u32 %v1341_v63, %v1338_v62  ;;  %v1446_v63 = vunpack.c.l.b16 %v1442_v58 }
  0x83   : > { %4144 = vmatmul.msk.bf16.gmra.mxu1 %vm507_vm1, %v1098_v1  ;;  %v1468_v1 = vrot.slane %v1466_v53, 1  ;;  %1594 = vperm.xlu1 %4610, %v394_v18  }
  0x85   : > { %v1472_v9 = vor.u32 %v1471_v2, %v1468_v1  ;;  %v395_v2 = vld [vmem:[%s5955_s1 + $0x20] sm:$0xff] }
  0x86   : > { %1599 = vperm.xlu2 %4611, %v395_v2  }
  0x87   : > { %v1473_v16 = vsel %vm453_vm2, %v1463_v38, %v1472_v9  ;;  %v1352_v38 = vsel %vm1326_vm7, %v1342_v7, %v1351_v42  ;;  %v1482_v41 = vsel %vm453_vm2, %v1472_v9, %v1481_v34  ;;  %v1447_v9 = vpack.c.b16 %v1446_v63, %v1446_v63 }
  0x89   : > { %4112 = vmatmul.msk.bf16.gmra.mxu3 %vm507_vm1, %v836_v11  ;;  %4170 = vmatmul.msk.bf16.gmra.mxu2 %vm507_vm1, %v1220_v14  ;;  %v1343_v14 = vsel %vm1326_vm7, %v1334_v6, %v1342_v7  ;;  %v4538_v7 = vld [vmem:[%s4711_s26 + $0x50] sm:$0xff]  ;;  %v1493_v15 = vshrl.u32 %v1447_v9, 16 }
  0x8a   : > { %4139 = vmatmul.msk.bf16.gmra.mxu0 %vm507_vm1, %v985_v13 }
  0x8e   : > { %1604 = vperm.xlu2 %4611, %v396_v20  }
  0x90   : > { %v618_v32 = vpop.f32.mrf.mxu1 }
  0x93   : > { %4145 = vmatmul.msk.bf16.gmra.mxu1 %vm507_vm1, %v1107_v33  ;;  %v398_v33 = vld [vmem:[%s5955_s1 + $0x38] sm:$0xff] }
  0x94   : > { %1614 = vperm.xlu1 %4610, %v398_v33  }
  0x97   : > { %v536_v43 = vpop.f32.mrf.mxu0 }
  0x98   : > { %v4877_v48 = vpop.f32.mrf.mxu1 }
  0x99   : > { %4113 = vmatmul.msk.bf16.gmra.mxu3 %vm507_vm1, %v838_v44  ;;  %4171 = vmatmul.msk.bf16.gmra.mxu2 %vm507_vm1, %v1222_v47  ;;  %v1354_v44 = vshrl.u32 %v4537_v40, 16  ;;  %v1487_v47 = vshll.u32 %v4842_v0, 16 }
  0x9a   : > { %4199 = vmatmul.msk.bf16.vlgmr.msra.gmra.mxu0 %vm507_vm1, %v1464_v46  ;;  %v1484_v46 = vshrl.u32 %v4842_v0, 16 }
  0x9b   : > { %v1356_v53 = vrot.slane %v1354_v44, 2 }
  0x9c   : > { %v541_v55 = vpop.f32.mrf.mxu3  ;;  %v756_v57 = vpop.f32.mrf.mxu2 }
  0x9d   : > { %v619_v56 = vadd.f32 %v618_v32, %v541_v55  ;;  %v1486_v55 = vrot.slane %v1484_v46, 1  ;;  %v1360_v60 = vor.u32 %v1359_v54, %v1356_v53 }
  0x9f   : > { %v4887_v61 = vpop.f32.mrf.mxu0  ;;  %v4889_v5 = vadd.f32 %v756_v57, %v619_v56  ;;  %v1489_v56 = vrot.slane %v1487_v47, 2  ;;  %v1361_v24 = vsel %vm1326_vm7, %v1351_v42, %v1360_v60 }
  0xa0   : > { %v623_v8 = vpop.f32.mrf.mxu1 }
  0xa1   : > { %v1490_v62 = vor.u32 %v1489_v56, %v1486_v55 }
  0xa4   : > { %v4894_v10 = vpop.f32.mrf.mxu3  ;;  %v4896_v11 = vpop.f32.mrf.mxu2 }
  0xa7   : > { %v613_v13 = vpop.f32.mrf.mxu0 }
  0xa8   : > { %v614_v17 = vadd.f32 %v613_v13, %v536_v43  ;;  %v4911_v25 = vpop.f32.mrf.mxu1  ;;  %v1363_v13 = vshrl.u32 %v4538_v7, 16 }
  0xa9   : > { %4193 = vmatmul.msk.bf16.vlgmr.msra.gmra.mxu3 %vm507_vm1, %v1343_v14  ;;  %v1366_v14 = vshll.u32 %v4538_v7, 16 }
  0xaa   : > { %4200 = vmatmul.msk.bf16.gmra.mxu0 %vm507_vm1, %v1473_v16  ;;  %v1496_v16 = vshll.u32 %v1447_v9, 16  ;;  %v1365_v21 = vrot.slane %v1363_v13, 2 }
  0xab   : > { %v1368_v22 = vrot.slane %v1366_v14, 3 }
  0xac   : > { %v546_v23 = vpop.f32.mrf.mxu3  ;;  %v761_v28 = vpop.f32.mrf.mxu2 }
  0xad   : > { %v624_v26 = vadd.f32 %v623_v8, %v546_v23  ;;  %v1491_v8 = vsel %vm453_vm2, %v1481_v34, %v1490_v62  ;;  %v1369_v31 = vor.u32 %v1368_v22, %v1365_v21  ;;  %v399_v34 = vld [vmem:[%s5955_s1 + $0x40] sm:$0xff] }
  0xae   : > { %1619 = vperm.xlu2 %4611, %v399_v34  }
  0xaf   : > { %v4913_v29 = vpop.f32.mrf.mxu0  ;;  %v4915_v32 = vadd.f32 %v761_v28, %v624_v26  ;;  %v1495_v26 = vrot.slane %v1493_v15, 1  ;;  %v1498_v28 = vrot.slane %v1496_v16, 2 }
  0xb0   : > { %v628_v39 = vpop.f32.mrf.mxu1  ;;  %v616_v34 = vadd.f32 %v4913_v29, %v4887_v61 }
  0xb1   : > { %v1499_v33 = vor.u32 %v1498_v28, %v1495_v26 }
  0xb3   : > { %v1500_v40 = vsel %vm453_vm2, %v1490_v62, %v1499_v33  ;;  %v4204_v62 = vld [vmem:[%s5958_s4 + $0x2] sm:$0x3] }
  0xb4   : > { %v4920_v35 = vpop.f32.mrf.mxu3  ;;  %v4922_v36 = vpop.f32.mrf.mxu2  ;;  %v1882_v63 = vsel %vm523_vm0, %v4204_v62, 0 }
  0xb5   : > { %1891 = vmatpush.bf16.msra.mxu1 %v1882_v63 }
  0xb7   : > { %v751_v37 = vpop.f32.mrf.mxu0 }
  0xb8   : > { %v4927_v43 = vadd.f32 %v751_v37, %v614_v17  ;;  %v4938_v59 = vpop.f32.mrf.mxu1  ;;  %v1370_v37 = vsel %vm1326_vm7, %v1360_v60, %v1369_v31 }
  0xb9   : > { %4194 = vmatmul.msk.bf16.gmra.mxu3 %vm507_vm1, %v1352_v38 }
  0xba   : > { %4201 = vmatmul.msk.bf16.gmra.mxu0 %vm507_vm1, %v1482_v41 }
  0xbc   : > { %v551_v49 = vpop.f32.mrf.mxu3  ;;  %v766_v51 = vpop.f32.mrf.mxu2 }
  0xbd   : > { %v629_v50 = vadd.f32 %v628_v39, %v551_v49  ;;  %v1325_v39 = vpack.c.b16 %v1319_v3, %v1319_v3  ;;  %v1790_v3 = vld [vmem:[%s5958_s4] sm:$0x3] }
  0xbe   : > { %v1929_v33 = vsel %vm523_vm0, %v1790_v3, 0 }
  0xbf   : > { %v4933_v52 = vpop.f32.mrf.mxu0  ;;  %v4935_v57 = vadd.f32 %v766_v51, %v629_v50  ;;  %v1372_v41 = vshrl.u32 %v1325_v39, 16  ;;  %v1375_v44 = vshll.u32 %v1325_v39, 16  ;;  %1938 = vmatpush.bf16.msra.mxu2 %v1929_v33 }
  0xc0   : > { %v633_v12 = vpop.f32.mrf.mxu1 }
  0xc1   : > { %v1374_v47 = vrot.slane %v1372_v41, 2  ;;  %v1377_v49 = vrot.slane %v1375_v44, 3 }
  0xc3   : > { %v1378_v53 = vor.u32 %v1377_v49, %v1374_v47 }
  0xc4   : > { %v4940_v1 = vpop.f32.mrf.mxu3  ;;  %v4942_v0 = vpop.f32.mrf.mxu2 }
  0xc5   : > { %v1379_v55 = vsel %vm1326_vm7, %v1369_v31, %v1378_v53  ;;  %v5043_v53 = vld [vmem:[%s5957_s3] ss:$0 sm:$0xff] }
  0xc7   : > { %v1013_v6 = vpop.f32.mrf.mxu0 }
  0xc8   : > { %v4992_v14 = vpop.f32.mrf.mxu1 }
  0xc9   : > { %4195 = vmatmul.msk.bf16.gmra.mxu3 %vm507_vm1, %v1361_v24 }
  0xca   : > { %4202 = vmatmul.msk.bf16.gmra.mxu0 %vm507_vm1, %v1491_v8 }
  0xcc   : > { %v556_v17 = vpop.f32.mrf.mxu3  ;;  %v771_v19 = vpop.f32.mrf.mxu2 }
  0xcd   : > { %v634_v18 = vadd.f32 %v633_v12, %v556_v17 }
  0xcf   : > { %v4955_v23 = vpop.f32.mrf.mxu0  ;;  %v4957_v4 = vadd.f32 %v771_v19, %v634_v18 }
  0xd0   : > { %v1135_v18 = vpop.f32.mrf.mxu1 }
  0xd4   : > { %v4960_v42 = vpop.f32.mrf.mxu3  ;;  %v4996_v16 = vpop.f32.mrf.mxu2 }
  0xd7   : > { %v1018_v38 = vpop.f32.mrf.mxu0 }
  0xd8   : > { %v1137_v21 = vpop.f32.mrf.mxu1 }
  0xd9   : > { %4196 = vmatmul.msk.bf16.gmra.mxu3 %vm507_vm1, %v1370_v37 }
  0xda   : > { %4203 = vmatmul.msk.bf16.gmra.mxu0 %vm507_vm1, %v1500_v40 }
  0xdc   : > { %v866_v45 = vpop.f32.mrf.mxu3  ;;  %v1250_v20 = vpop.f32.mrf.mxu2 }
  0xdd   : > { %v891_v46 = vadd.f32 %v866_v45, %v4927_v43 }
  0xdf   : > { %v4970_v50 = vpop.f32.mrf.mxu0  ;;  %v1038_v51 = vadd.f32 %v1013_v6, %v891_v46 }
  0xe0   : > { %v1140_v39 = vpop.f32.mrf.mxu1 }
  0xe4   : > { %v868_v54 = vpop.f32.mrf.mxu3  ;;  %v1252_v30 = vpop.f32.mrf.mxu2 }
  0xe7   : > { %v1023_v56 = vpop.f32.mrf.mxu0 }
  0xe8   : > { %v1142_v29 = vpop.f32.mrf.mxu1 }
  0xe9   : > { %4197 = vmatmul.msk.bf16.gmra.mxu3 %vm507_vm1, %v1379_v55 }
  0xec   : > { %v871_v58 = vpop.f32.mrf.mxu3  ;;  %v1255_v44 = vpop.f32.mrf.mxu2 }
  0xed   : > { %v893_v60 = vadd.f32 %v871_v58, %v4889_v5 }
  0xef   : > { %v4978_v43 = vpop.f32.mrf.mxu0  ;;  %v4981_v2 = vadd.f32 %v1018_v38, %v893_v60  ;;  %v777_v38 = vadd.f32 %v4933_v52, %v616_v34  ;;  %v621_v52 = vadd.f32 %v4877_v48, %v4894_v10 }
  0xf1   : > { %v892_v41 = vadd.f32 %v868_v54, %v777_v38  ;;  %v779_v62 = vadd.f32 %v4896_v11, %v621_v52  ;;  %v1162_v48 = vadd.f32 %v1140_v39, %v4981_v2  ;;  %v1145_v11 = vpop.f32.mrf.mxu1  ;;  %v1763_v2 = vld [vmem:[#allocation2 + $0x4] sm:$0xe] }
  0xf3   : > { %v1039_v46 = vadd.f32 %v4955_v23, %v892_v41  ;;  %v4237_v41 = vld [vmem:[%s5958_s4 + $0x6] sm:$0x3] }
  0xf4   : > { %v4983_v24 = vpop.f32.mrf.mxu3  ;;  %v1257_v23 = vpop.f32.mrf.mxu2 }
  0xf5   : > { %v1161_v61 = vadd.f32 %v1137_v21, %v1039_v46  ;;  %v894_v10 = vadd.f32 %v4983_v24, %v779_v62 }
  0xf7   : > { %v1028_v6 = vpop.f32.mrf.mxu0  ;;  %v1276_v58 = vadd.f32 %v1252_v30, %v1161_v61  ;;  %v1277_v30 = vadd.f32 %v1255_v44, %v1162_v48  ;;  %v5070_v61 = vpop.permute.xlu1 %1589 }
  0xfc   : > { %v876_v7 = vpop.f32.mrf.mxu3  ;;  %v1260_v38 = vpop.f32.mrf.mxu2 }
  0xfd   : > { %v895_v8 = vadd.f32 %v876_v7, %v4915_v32 }
  0xff   : > { %v4986_v9 = vpop.f32.mrf.mxu0  ;;  %v4988_v5 = vadd.f32 %v1023_v56, %v895_v8  ;;  %v5047_v56 = vpop.permute.xlu0 %1579  ;;  %v4231_v8 = vld [vmem:[%s5958_s4 + $0x4] sm:$0x3] }
 0x104   : > { %v4990_v12 = vpop.f32.mrf.mxu3 }
 0x107   : > { %v1033_v13 = vpop.f32.mrf.mxu0 }
 0x10c   : > { %v881_v15 = vpop.f32.mrf.mxu3 }
 0x10d   : > { %v897_v17 = vadd.f32 %v881_v15, %v4935_v57 }
 0x10f   : > { %v5003_v32 = vadd.f32 %v1028_v6, %v897_v17  ;;  %v5011_v19 = vpop.f32.mrf.mxu0 }
 0x114   : > { %v5017_v57 = vpop.f32.mrf.mxu3 }
 0x117   : > { %v1528_v26 = vpop.f32.mrf.mxu0 }
 0x11c   : > { %v886_v22 = vpop.f32.mrf.mxu3 }
 0x11d   : > { %v899_v28 = vadd.f32 %v886_v22, %v4957_v4  ;;  %v1160_v4 = vadd.f32 %v1135_v18, %v1038_v51 }
 0x11f   : > { %v5028_v31 = vadd.f32 %v1033_v13, %v899_v28  ;;  %v1530_v40 = vpop.f32.mrf.mxu0  ;;  %v1275_v45 = vadd.f32 %v1250_v20, %v1160_v4  ;;  %v1998_v13 = vsel %vm523_vm0, %v4231_v8, 0  ;;  %v5060_v28 = vpop.permute.xlu0 %1584 }
 0x120   : > { %2007 = vmatpush.bf16.msrb.mxu3 %v1998_v13 }
 0x124   : > { %v5036_v37 = vpop.f32.mrf.mxu3 }
 0x127   : > { %v1533_v51 = vpop.f32.mrf.mxu0 }
 0x12c   : > { %v1407_v47 = vpop.f32.mrf.mxu3 }
 0x12d   : > { %v1432_v49 = vadd.f32 %v1407_v47, %v1275_v45  ;;  %v2112_v45 = vsel %vm523_vm0, %v4237_v41, 0  ;;  %v4590_v41 = vld [vmem:[#allocation2] sm:$0xe] }
 0x12e   : > { %2121 = vmatpush.bf16.msrb.mxu0 %v2112_v45 }
 0x12f   : > { %v1553_v55 = vadd.f32 %v1528_v26, %v1432_v49  ;;  %v1041_v26 = vadd.f32 %v4970_v50, %v894_v10  ;;  %v1535_v24 = vpop.f32.mrf.mxu0  ;;  %v626_v49 = vadd.f32 %v4911_v25, %v4920_v35 }
 0x131   : > { %v1567_v54 = vadd.f32 %v5043_v53, %v1553_v55  ;;  %v1163_v50 = vadd.f32 %v1142_v29, %v1041_v26  ;;  %v4575_v29 = vld [vmem:[%s5961_s7 + $0x60] sm:$0xff] }
 0x133   : > { %v1627_v60 = vmul.f32 %v5047_v56, %v1567_v54 }
 0x134   : > { %v1409_v63 = vpop.f32.mrf.mxu3 }
 0x135   : > { %v1637_v6 = vpack.c.bf16 %v1627_v60, %v1627_v60  ;;  %v1433_v7 = vadd.f32 %v1409_v63, %v1276_v58  ;;  %v1278_v58 = vadd.f32 %v1257_v23, %v1163_v50  ;;  %v1147_v60 = vpop.f32.mrf.mxu1  ;;  %v1164_v23 = vadd.f32 %v1145_v11, %v4988_v5 }
 0x137   : > { %v1651_v15 = vshrl.u32 %v1637_v6, 16  ;;  %v1654_v17 = vshll.u32 %v1637_v6, 16  ;;  %v1554_v18 = vadd.f32 %v1530_v40, %v1433_v7  ;;  %v781_v6 = vadd.f32 %v4922_v36, %v626_v49  ;;  %v1538_v35 = vpop.f32.mrf.mxu0  ;;  %v5103_v49 = vpop.permute.xlu2 %1599 }
 0x139   : > { %v1653_v20 = vrot.slane %v1651_v15, 6  ;;  %v1656_v21 = vrot.slane %v1654_v17, 7  ;;  %v1568_v22 = vadd.f32 %v5043_v53, %v1554_v18  ;;  %v896_v13 = vadd.f32 %v4990_v12, %v781_v6  ;;  %v1262_v15 = vpop.f32.mrf.mxu2 }
 0x13a   : > { %v1279_v12 = vadd.f32 %v1260_v38, %v1164_v23  ;;  %v4259_v38 = vld [vmem:[%s5958_s4 + $0x8] sm:$0x3] }
 0x13b   : > { %v1657_v3 = vor.u32 %v1656_v21, %v1653_v20  ;;  %v1628_v33 = vmul.f32 %v5060_v28, %v1568_v22  ;;  %v1043_v26 = vadd.f32 %v4978_v43, %v896_v13 }
 0x13c   : > { %v1412_v34 = vpop.f32.mrf.mxu3 }
 0x13d   : > { %v1764_v39 = vsel %vm1762_vm11, %v1657_v3, %v1763_v2  ;;  %v1638_v40 = vpack.c.bf16 %v1628_v33, %v1628_v33  ;;  %v1434_v4 = vadd.f32 %v1412_v34, %v1277_v30  ;;  %v1658_v62 = vrot.slane %v1657_v3, 4  ;;  %v5091_v2 = vpop.permute.xlu1 %1594 }
 0x13e   : > { %1765 = vst [vmem:[#allocation2 + $0x4] sm:$0xe] %v1764_v39  ;;  %v1150_v39 = vpop.f32.mrf.mxu1  ;;  %vm2861_vm11 = vcmask 257025  }
 0x13f   : > { %v1660_v46 = vshrl.u32 %v1638_v40, 16  ;;  %v1663_v44 = vshll.u32 %v1638_v40, 16  ;;  %v1555_v47 = vadd.f32 %v1533_v51, %v1434_v4  ;;  %v631_v40 = vadd.f32 %v4938_v59, %v4940_v1  ;;  %v1540_v43 = vpop.f32.mrf.mxu0  ;;  %vm2862_vm15 = vmand %vm2861_vm11, %vm1761_vm10 }
 0x140   : > { %v1165_v4 = vadd.f32 %v1147_v60, %v1043_v26 }
 0x141   : > { %v1662_v55 = vrot.slane %v1660_v46, 6  ;;  %v1665_v52 = vrot.slane %v1663_v44, 7  ;;  %v1569_v54 = vadd.f32 %v5043_v53, %v1555_v47  ;;  %v2233_v47 = vsel %vm523_vm0, %v4259_v38, 0 }
 0x142   : > { %2242 = vmatpush.bf16.msrb.mxu1 %v2233_v47 }
 0x143   : > { %v1666_v63 = vor.u32 %v1665_v52, %v1662_v55  ;;  %v1629_v51 = vmul.f32 %v5070_v61, %v1569_v54  ;;  %v1265_v55 = vpop.f32.mrf.mxu2  ;;  %v783_v54 = vadd.f32 %v4942_v0, %v631_v40 }
 0x144   : > { %v1414_v25 = vpop.f32.mrf.mxu3 }
 0x145   : > { %v1667_v7 = vsel %vm5074_vm14, %v1658_v62, %v1666_v63  ;;  %v1639_v8 = vpack.c.bf16 %v1629_v51, %v1629_v51  ;;  %v1435_v48 = vadd.f32 %v1414_v25, %v1278_v58  ;;  %v5082_v10 = vld [vmem:[#allocation2] sm:$0xff]   ;;  %v1668_v30 = vrot.slane %v1666_v63, 4 }
 0x146   : > { %1766 = vst.msk [vmem:[#allocation2 + $0x8] sm:$0xf] %vm361_vm8, %v1667_v7  ;;  %4226 = vmatmul.msk.bf16.vlgmr.msra.gmra.mxu2 %vm507_vm1, %v5082_v10  ;;  %v4589_v44 = vld [vmem:[#allocation2] sm:$0xf0]  ;;  %v1825_v58 = vshll.u32 %v5082_v10, 16  ;;  %v1280_v62 = vadd.f32 %v1262_v15, %v1165_v4  ;;  %v5131_v4 = vpop.permute.xlu2 %1604 }
 0x147   : > { %v1670_v36 = vshrl.u32 %v1639_v8, 16  ;;  %v1673_v17 = vshll.u32 %v1639_v8, 16  ;;  %v1556_v18 = vadd.f32 %v1535_v24, %v1435_v48  ;;  %v4591_v60 = vor.u32 %v4590_v41, %v4589_v44  ;;  %v2044_v25 = vld [vmem:[#allocation2 + $0x4] sm:$0xe] }
 0x148   : > { %v898_v8 = vadd.f32 %v5017_v57, %v783_v54  ;;  %v1827_v15 = vrot.slane %v1825_v58, 1 }
 0x149   : > { %v1672_v20 = vrot.slane %v1670_v36, 6  ;;  %v1675_v21 = vrot.slane %v1673_v17, 7  ;;  %v1570_v22 = vadd.f32 %v5043_v53, %v1556_v18  ;;  %v1971_v17 = vrot.slane %v4591_v60, 1 }
 0x14a   : > { %v2068_v18 = vunpack.c.l.b16 %v2044_v25 }
 0x14b   : > { %v1676_v3 = vor.u32 %v1675_v21, %v1672_v20  ;;  %v1630_v33 = vmul.f32 %v5091_v2, %v1570_v22  ;;  %v1267_v41 = vpop.f32.mrf.mxu2 }
 0x14c   : > { %v1417_v34 = vpop.f32.mrf.mxu3 }
 0x14d   : > { %v1677_v5 = vsel %vm5074_vm14, %v1668_v30, %v1676_v3  ;;  %v1640_v11 = vpack.c.bf16 %v1630_v33, %v1630_v33  ;;  %v1436_v24 = vadd.f32 %v1417_v34, %v1279_v12  ;;  %v1678_v63 = vrot.slane %v1676_v3, 4  ;;  %v1543_v30 = vpop.f32.mrf.mxu0 }
 0x14e   : > { %1767 = vst.msk [vmem:[#allocation2 + $0xc] sm:$0xf] %vm361_vm8, %v1677_v5  ;;  %v1823_v12 = vshrl.u32 %v5082_v10, 16 }
 0x14f   : > { %v1680_v50 = vshrl.u32 %v1640_v11, 16  ;;  %v1683_v45 = vshll.u32 %v1640_v11, 16  ;;  %v1557_v46 = vadd.f32 %v1538_v35, %v1436_v24  ;;  %v1166_v35 = vadd.f32 %v1150_v39, %v5003_v32  ;;  %v1152_v32 = vpop.f32.mrf.mxu1 }
 0x150   : > { %v1045_v24 = vadd.f32 %v4986_v9, %v898_v8  ;;  %v1828_v40 = vor.u32 %v1827_v15, %v1823_v12 }
 0x151   : > { %v1682_v59 = vrot.slane %v1680_v50, 6  ;;  %v1685_v1 = vrot.slane %v1683_v45, 7  ;;  %v1571_v52 = vadd.f32 %v5043_v53, %v1557_v46 }
 0x152   : > { %v1167_v58 = vadd.f32 %v1152_v32, %v1045_v24 }
 0x153   : > { %v1686_v51 = vor.u32 %v1685_v1, %v1682_v59  ;;  %v1631_v6 = vmul.f32 %v5103_v49, %v1571_v52 }
 0x154   : > { %v1419_v7 = vpop.f32.mrf.mxu3 }
 0x155   : > { %v1687_v48 = vsel %vm5074_vm14, %v1678_v63, %v1686_v51  ;;  %v1641_v13 = vpack.c.bf16 %v1631_v6, %v1631_v6  ;;  %v1437_v23 = vadd.f32 %v1419_v7, %v1280_v62  ;;  %v5113_v0 = vld [vmem:[#allocation2 + $0x8] sm:$0xff]  ;;  %v1688_v38 = vrot.slane %v1686_v51, 4 }
 0x156   : > { %v5115_v36 = vld [vmem:[#allocation2 + $0x8] sm:$0xff]   ;;  %1768 = vst.msk [vmem:[#allocation2 + $0x10] sm:$0xf] %vm361_vm8, %v1687_v48  ;;  %4227 = vmatmul.msk.bf16.gmra.mxu2 %vm507_vm1, %v5113_v0  ;;  %v1972_v26 = vrot.slane %v5113_v0, 1  ;;  %v1830_v3 = vshll.u32 %v5113_v0, 16 }
 0x157   : > { %v2069_v20 = vunpack.c.l.b16 %v5115_v36  ;;  %v1690_v21 = vshrl.u32 %v1641_v13, 16  ;;  %v1693_v22 = vshll.u32 %v1641_v13, 16  ;;  %v1558_v57 = vadd.f32 %v1540_v43, %v1437_v23  ;;  %v1155_v48 = vpop.f32.mrf.mxu1 }
 0x158   : > { %v1973_v11 = vsel %vm1211_vm6, %v1971_v17, %v1972_v26  ;;  %v5134_v10 = vrot.slane %v1830_v3, 1  ;;  %v1281_v43 = vadd.f32 %v1265_v55, %v1166_v35  ;;  %v636_v55 = vadd.f32 %v4992_v14, %v4960_v42  ;;  %v5155_v17 = vpop.permute.xlu0 %1609  ;;  %v2594_v3 = vld [vmem:[#allocation2 + $0x8] sm:$0x8] }
 0x159   : > { %v2079_v33 = vpack.c.b16 %v2069_v20, %v2068_v18  ;;  %v1692_v34 = vrot.slane %v1690_v21, 6  ;;  %v1695_v39 = vrot.slane %v1693_v22, 7  ;;  %v1572_v5 = vadd.f32 %v5043_v53, %v1558_v57  ;;  %4232 = vmatmul.msk.bf16.vlgmr.msrb.gmra.mxu3 %vm507_vm1, %v1973_v11  ;;  %v1545_v18 = vpop.f32.mrf.mxu0  ;;  %v1270_v11 = vpop.f32.mrf.mxu2 }
 0x15a   : > { %v1833_v44 = vsel %vm679_vm3, %v1828_v40, %v5134_v10  ;;  %v785_v15 = vadd.f32 %v4996_v16, %v636_v55  ;;  %v1282_v22 = vadd.f32 %v1267_v41, %v1167_v58 }
 0x15b   : > { %v1696_v50 = vor.u32 %v1695_v39, %v1692_v34  ;;  %v1632_v45 = vmul.f32 %v5131_v4, %v1572_v5  ;;  %v2165_v47 = vshrl.u32 %v2079_v33, 16  ;;  %v2168_v59 = vshll.u32 %v2079_v33, 16  ;;  %4221 = vmatmul.msk.bf16.vlgmr.msra.gmra.mxu1 %vm507_vm1, %v1833_v44 }
 0x15c   : > { %v1422_v46 = vpop.f32.mrf.mxu3  ;;  %v2085_v60 = vrot.slane %v2079_v33, 1  ;;  %v1168_v33 = vadd.f32 %v1155_v48, %v5028_v31  ;;  %v2384_v39 = vunpack.c.h.b16 %v5115_v36 }
 0x15d   : > { %v1697_v9 = vsel %vm5074_vm14, %v1688_v38, %v1696_v50  ;;  %v1642_v1 = vpack.c.bf16 %v1632_v45, %v1632_v45  ;;  %v1438_v52 = vadd.f32 %v1422_v46, %v1281_v43  ;;  %v5142_v54 = vld [vmem:[#allocation2 + $0xc] sm:$0xff]  ;;  %v2167_v25 = vrot.slane %v2165_v47, 1 }
 0x15e   : > { %1769 = vst.msk [vmem:[#allocation2 + $0x14] sm:$0xf] %vm361_vm8, %v1697_v9  ;;  %v2086_v6 = vrot.slane %v5142_v54, 1  ;;  %v2170_v35 = vrot.slane %v2168_v59, 2  ;;  %v2173_v7 = vshrl.u32 %v5142_v54, 16  ;;  %v2176_v8 = vshll.u32 %v5142_v54, 16 }
 0x15f   : > { %v1700_v62 = vshrl.u32 %v1642_v1, 16  ;;  %v1703_v63 = vshll.u32 %v1642_v1, 16  ;;  %v1559_v51 = vadd.f32 %v1543_v30, %v1438_v52  ;;  %v1698_v57 = vrot.slane %v1696_v50, 4 }
 0x160   : > { %v2087_v14 = vsel %vm1211_vm6, %v2085_v60, %v2086_v6  ;;  %v2175_v32 = vrot.slane %v2173_v7, 1  ;;  %v2178_v21 = vrot.slane %v2176_v8, 2  ;;  %v2171_v5 = vor.u32 %v2170_v35, %v2167_v25  ;;  %v1157_v8 = vpop.f32.mrf.mxu1 }
 0x161   : > { %v1702_v13 = vrot.slane %v1700_v62, 6  ;;  %v1705_v23 = vrot.slane %v1703_v63, 7  ;;  %v1573_v42 = vadd.f32 %v5043_v53, %v1559_v51  ;;  %4254 = vmatmul.msk.bf16.vlgmr.msrb.gmra.mxu0 %vm507_vm1, %v2087_v14  ;;  %v900_v38 = vadd.f32 %v5036_v37, %v785_v15  ;;  %v5189_v51 = vpop.permute.xlu1 %1614 }
 0x162   : > { %v5161_v16 = vor.u32 %v2178_v21, %v2175_v32  ;;  %v2598_v50 = vunpack.c.l.b16 %v2594_v3  ;;  %v1283_v9 = vadd.f32 %v1270_v11, %v1168_v33  ;;  %v1834_v37 = vshrl.u32 %v5113_v0, 16 }
 0x163   : > { %v1706_v12 = vor.u32 %v1705_v23, %v1702_v13  ;;  %v1633_v30 = vmul.f32 %v5155_v17, %v1573_v42  ;;  %v1047_v63 = vadd.f32 %v5011_v19, %v900_v38  ;;  %v1548_v23 = vpop.f32.mrf.mxu0  ;;  %v5218_v38 = vpop.permute.xlu2 %1619 }
 0x164   : > { %v1424_v34 = vpop.f32.mrf.mxu3  ;;  %v5171_v31 = vsel %vm453_vm2, %v2171_v5, %v5161_v16  ;;  %v2599_v52 = vpack.c.b16 %v2384_v39, %v2598_v50  ;;  %v1836_v35 = vor.u32 %v1834_v37, %v5134_v10  ;;  %v4265_v50 = vld [vmem:[%s5958_s4 + $0xa] sm:$0x3] }
 0x165   : > { %v1707_v24 = vsel %vm5074_vm14, %v1698_v57, %v1706_v12  ;;  %v1643_v40 = vpack.c.bf16 %v1633_v30, %v1633_v30  ;;  %v1439_v43 = vadd.f32 %v1424_v34, %v1282_v22  ;;  %v5165_v41 = vld [vmem:[#allocation2 + $0x10] sm:$0xff]  ;;  %v1708_v25 = vrot.slane %v1706_v12, 4  ;;  %v1272_v22 = vpop.f32.mrf.mxu2 }
 0x166   : > { %1770 = vst.msk [vmem:[#allocation2 + $0x18] sm:$0xf] %vm361_vm8, %v1707_v24  ;;  %4228 = vmatmul.msk.bf16.gmra.mxu2 %vm507_vm1, %v5165_v41  ;;  %v1974_v47 = vrot.slane %v5165_v41, 1  ;;  %v5176_v59 = vld [vmem:[#allocation2 + $0x10] sm:$0xff]  ;;  %v1838_v1 = vshll.u32 %v5165_v41, 16  ;;  %v2600_v42 = vrot.slane %v2599_v52, 3  ;;  %v1169_v32 = vadd.f32 %v1157_v8, %v1047_v63 }
 0x167   : > { %v1710_v45 = vshrl.u32 %v1643_v40, 16  ;;  %v1713_v46 = vshll.u32 %v1643_v40, 16  ;;  %v1560_v44 = vadd.f32 %v1545_v18, %v1439_v43  ;;  %v2601_v0 = vrot.slane %v5176_v59, 3 }
 0x168   : > { %v1975_v62 = vsel %vm1211_vm6, %v1972_v26, %v1974_v47  ;;  %v5193_v7 = vrot.slane %v1838_v1, 1  ;;  %v1284_v43 = vadd.f32 %v1272_v22, %v1169_v32  ;;  %v2313_v1 = vsel %vm523_vm0, %v4265_v50, 0 }
 0x169   : > { %v1712_v55 = vrot.slane %v1710_v45, 6  ;;  %v1715_v58 = vrot.slane %v1713_v46, 7  ;;  %v1574_v60 = vadd.f32 %v5043_v53, %v1560_v44  ;;  %4233 = vmatmul.msk.bf16.gmra.mxu3 %vm507_vm1, %v1975_v62  ;;  %v5209_v21 = vsel %vm827_vm5, %v2600_v42, %v2601_v0  ;;  %2322 = vmatpush.bf16.msrb.mxu2 %v2313_v1 }
 0x16a   : > { %v1841_v19 = vsel %vm679_vm3, %v1836_v35, %v5193_v7 }
 0x16b   : > { %v1716_v48 = vor.u32 %v1715_v58, %v1712_v55  ;;  %v1634_v13 = vmul.f32 %v5189_v51, %v1574_v60  ;;  %4222 = vmatmul.msk.bf16.gmra.mxu1 %vm507_vm1, %v1841_v19  ;;  %v1550_v63 = vpop.f32.mrf.mxu0 }
 0x16c   : > { %v1427_v26 = vpop.f32.mrf.mxu3 }
 0x16d   : > { %v1717_v10 = vsel %vm5074_vm14, %v1708_v25, %v1716_v48  ;;  %v1644_v14 = vpack.c.bf16 %v1634_v13, %v1634_v13  ;;  %v1440_v15 = vadd.f32 %v1427_v26, %v1283_v9  ;;  %v5203_v18 = vld [vmem:[#allocation2 + $0x14] sm:$0xff]  ;;  %v1718_v44 = vrot.slane %v1716_v48, 4 }
 0x16e   : > { %1771 = vst.msk [vmem:[#allocation2 + $0x1c] sm:$0xf] %vm361_vm8, %v1717_v10  ;;  %v2088_v3 = vrot.slane %v5203_v18, 1  ;;  %v2182_v33 = vshrl.u32 %v5203_v18, 16  ;;  %v2185_v34 = vshll.u32 %v5203_v18, 16 }
 0x16f   : > { %v1720_v57 = vshrl.u32 %v1644_v14, 16  ;;  %v1723_v12 = vshll.u32 %v1644_v14, 16  ;;  %v1561_v30 = vadd.f32 %v1548_v23, %v1440_v15  ;;  %v1842_v23 = vshrl.u32 %v5165_v41, 16  ;;  %v5244_v14 = vpop.permute.xlu0 %1624 }
 0x170   : > { %v2089_v40 = vsel %vm1211_vm6, %v2086_v6, %v2088_v3  ;;  %v2184_v45 = vrot.slane %v2182_v33, 1  ;;  %v2187_v46 = vrot.slane %v2185_v34, 2 }
 0x171   : > { %v1722_v5 = vrot.slane %v1720_v57, 6  ;;  %v1725_v11 = vrot.slane %v1723_v12, 7  ;;  %v1575_v24 = vadd.f32 %v5043_v53, %v1561_v30  ;;  %4255 = vmatmul.msk.bf16.gmra.mxu0 %vm507_vm1, %v2089_v40  ;;  %v1844_v15 = vor.u32 %v1842_v23, %v5193_v7 }
 0x172   : > { %v2188_v6 = vor.u32 %v2187_v46, %v2184_v45  ;;  %v4271_v46 = vld [vmem:[%s5958_s4 + $0xc] sm:$0x3] }
 0x173   : > { %v1726_v9 = vor.u32 %v1725_v11, %v1722_v5  ;;  %v1635_v37 = vmul.f32 %v5218_v38, %v1575_v24 }
 0x174   : > { %v1429_v52 = vpop.f32.mrf.mxu3  ;;  %v5233_v25 = vsel %vm453_vm2, %v5161_v16, %v2188_v6 }
 0x175   : > { %v1727_v55 = vsel %vm5074_vm14, %v1718_v44, %v1726_v9  ;;  %v1645_v58 = vpack.c.bf16 %v1635_v37, %v1635_v37  ;;  %v1441_v60 = vadd.f32 %v1429_v52, %v1284_v43  ;;  %v5228_v62 = vld [vmem:[#allocation2 + $0x18] sm:$0xff]  ;;  %v1728_v57 = vrot.slane %v1726_v9, 4 }
 0x176   : > { %1772 = vst.msk [vmem:[#allocation2 + $0x20] sm:$0xf] %vm361_vm8, %v1727_v55  ;;  %4229 = vmatmul.msk.bf16.gmra.mxu2 %vm507_vm1, %v5228_v62  ;;  %v1976_v13 = vrot.slane %v5228_v62, 1  ;;  %v1846_v26 = vshll.u32 %v5228_v62, 16  ;;  %v5248_v22 = vld [vmem:[#allocation2 + $0x18] sm:$0xff]  ;;  %v2427_v55 = vsel %vm523_vm0, %v4271_v46, 0 }
 0x177   : > { %v1730_v35 = vshrl.u32 %v1645_v58, 16  ;;  %v1733_v8 = vshll.u32 %v1645_v58, 16  ;;  %v1562_v48 = vadd.f32 %v1550_v63, %v1441_v60  ;;  %v2603_v7 = vrot.slane %v5248_v22, 3  ;;  %2436 = vmatpush.bf16.msra.mxu3 %v2427_v55 }
 0x178   : > { %v1977_v16 = vsel %vm1211_vm6, %v1974_v47, %v1976_v13  ;;  %v1848_v32 = vrot.slane %v1846_v26, 1  ;;  %v1850_v26 = vshrl.u32 %v5228_v62, 16  ;;  %v2279_v62 = vld [vmem:[#allocation2 + $0x4] sm:$0xc] }
 0x179   : > { %v1732_v19 = vrot.slane %v1730_v35, 6  ;;  %v1735_v42 = vrot.slane %v1733_v8, 7  ;;  %v1576_v10 = vadd.f32 %v5043_v53, %v1562_v48  ;;  %4234 = vmatmul.msk.bf16.gmra.mxu3 %vm507_vm1, %v1977_v16  ;;  %v5270_v37 = vsel %vm827_vm5, %v2601_v0, %v2603_v7 }
 0x17a   : > { %v1849_v33 = vsel %vm679_vm3, %v1844_v15, %v1848_v32  ;;  %v1852_v16 = vor.u32 %v1850_v26, %v1848_v32 }
 0x17b   : > { %v1736_v12 = vor.u32 %v1735_v42, %v1732_v19  ;;  %v1636_v30 = vmul.f32 %v5244_v14, %v1576_v10  ;;  %4223 = vmatmul.msk.bf16.gmra.mxu1 %vm507_vm1, %v1849_v33  ;;  %v2473_v33 = vld [vmem:[#allocation2 + $0x30] sm:$0x7] }
 0x17d   : > { %v1737_v53 = vsel %vm5074_vm14, %v1728_v57, %v1736_v12  ;;  %v1646_v41 = vpack.c.bf16 %v1636_v30, %v1636_v30  ;;  %v5255_v47 = vld [vmem:[#allocation2 + $0x1c] sm:$0xff]  ;;  %v1738_v1 = vrot.slane %v1736_v12, 4 }
 0x17e   : > { %1773 = vst.msk [vmem:[#allocation2 + $0x24] sm:$0xf] %vm361_vm8, %v1737_v53  ;;  %v2090_v11 = vrot.slane %v5255_v47, 1  ;;  %v2191_v24 = vshrl.u32 %v5255_v47, 16  ;;  %v2194_v40 = vshll.u32 %v5255_v47, 16 }
 0x17f   : > { %v1740_v34 = vshrl.u32 %v1646_v41, 16  ;;  %v1743_v5 = vshll.u32 %v1646_v41, 16  ;;  %v4299_v53 = vld [vmem:[%s5958_s4 + $0x10] sm:$0x3]  ;;  %v2283_v41 = vunpack.c.l.b16 %v2279_v62 }
 0x180   : > { %v2091_v45 = vsel %vm1211_vm6, %v2088_v3, %v2090_v11  ;;  %v2193_v44 = vrot.slane %v2191_v24, 1  ;;  %v2196_v9 = vrot.slane %v2194_v40, 2  ;;  %v1777_v3 = vld [vmem:[#allocation2 + $0x2c] sm:$0x3] }
 0x181   : > { %v1742_v43 = vrot.slane %v1740_v34, 6  ;;  %v1745_v50 = vrot.slane %v1743_v5, 7  ;;  %4256 = vmatmul.msk.bf16.gmra.mxu0 %vm507_vm1, %v2091_v45  ;;  %v2477_v5 = vunpack.c.l.b16 %v2473_v33  ;;  %v2284_v40 = vpack.c.b16 %v2069_v20, %v2283_v41 }
 0x182   : > { %v2197_v58 = vor.u32 %v2196_v9, %v2193_v44  ;;  %v2287_v44 = vrot.slane %v5142_v54, 2 }
 0x183   : > { %v1746_v52 = vor.u32 %v1745_v50, %v1742_v43 }
 0x184   : > { %v5280_v0 = vsel %vm453_vm2, %v2188_v6, %v2197_v58  ;;  %v4293_v6 = vld [vmem:[%s5958_s4 + $0xe] sm:$0x3] }
 0x185   : > { %v1747_v60 = vsel %vm5074_vm14, %v1738_v1, %v1746_v52  ;;  %v1748_v63 = vrot.slane %v1746_v52, 4  ;;  %v4542_v35 = vld [vmem:[#allocation2 + $0x20] sm:$0xff]  ;;  %v2548_v30 = vsel %vm523_vm0, %v4293_v6, 0  ;;  %v5310_v1 = vpack.c.b16 %v2477_v5, %v2477_v5 }
 0x186   : > { %v5276_v8 = vld [vmem:[#allocation2 + $0x20] sm:$0xff]  ;;  %1774 = vst.msk [vmem:[#allocation2 + $0x28] sm:$0xf] %vm361_vm8, %v1747_v60  ;;  %4230 = vmatmul.msk.bf16.gmra.mxu2 %vm507_vm1, %v4542_v35  ;;  %v1978_v23 = vrot.slane %v4542_v35, 1  ;;  %v1854_v19 = vshll.u32 %v4542_v35, 16  ;;  %2557 = vmatpush.bf16.msra.mxu0 %v2548_v30  ;;  %v2491_v5 = vshll.u32 %v5176_v59, 16 }
 0x187   : > { %v1778_v48 = vsel %vm1776_vm9, %v1748_v63, %v1777_v3  ;;  %v2605_v42 = vrot.slane %v5276_v8, 3  ;;  %v2286_v3 = vrot.slane %v2284_v40, 2  ;;  %vm376_vm8 = vcmask 257024  }
 0x188   : > { %1779 = vst [vmem:[#allocation2 + $0x2c] sm:$0x3] %v1778_v48  ;;  %v1979_v10 = vsel %vm1211_vm6, %v1976_v13, %v1978_v23  ;;  %v1856_v15 = vrot.slane %v1854_v19, 1  ;;  %v2609_v19 = vrot.slane %v5310_v1, 3 }
 0x189   : > { %4235 = vmatmul.msk.bf16.gmra.mxu3 %vm507_vm1, %v1979_v10  ;;  %v5291_v57 = vsel %vm827_vm5, %v2603_v7, %v2605_v42  ;;  %v2627_v7 = vsel %vm523_vm0, %v4299_v53, 0  ;;  %vm2285_vm0 = vcmask 1045504   ;;  %v1858_v10 = vshrl.u32 %v4542_v35, 16  ;;  %v2359_v35 = vld [vmem:[#allocation2 + $0x8] sm:$0xc] }
 0x18a   : > { %v1857_v12 = vsel %vm679_vm3, %v1852_v16, %v1856_v15  ;;  %2636 = vmatpush.bf16.msra.mxu1 %v2627_v7  ;;  %v2488_v7 = vshrl.u32 %v5176_v59, 16  ;;  %378 = vst.msk [vmem:[#allocation3 + $0x4] sm:$0xf] %vm376_vm8, %v4625_v27 }
 0x18b   : > { %4224 = vmatmul.msk.bf16.gmra.mxu1 %vm507_vm1, %v1857_v12  ;;  %v1860_v30 = vor.u32 %v1858_v10, %v1856_v15  ;;  %v2401_v15 = vrot.slane %v5176_v59, 2  ;;  %v2405_v10 = vrot.slane %v5276_v8, 2  ;;  %377 = vst.msk [vmem:[#allocation3] sm:$0xf] %vm376_vm8, %v4625_v27 }
 0x18c   : > { %379 = vst.msk [vmem:[#allocation3 + $0x8] sm:$0xf] %vm376_vm8, %v4625_v27 }
 0x18d   : > { %v5296_v13 = vld [vmem:[#allocation2 + $0x24] sm:$0xff]  ;;  %380 = vst.msk [vmem:[#allocation3 + $0xc] sm:$0xf] %vm376_vm8, %v4625_v27 }
 0x18e   : > { %v1791_v32 = vld [vmem:[#allocation2 + $0x28] sm:$0x1]  ;;  %v2092_v24 = vrot.slane %v5296_v13, 1  ;;  %v2200_v50 = vshrl.u32 %v5296_v13, 16  ;;  %v2203_v46 = vshll.u32 %v5296_v13, 16 }
 0x18f   : > { %v1815_v34 = vunpack.c.l.b16 %v1791_v32  ;;  %v2054_v9 = vld [vmem:[#allocation2 + $0x2c] sm:$0x1]  ;;  %381 = vst.msk [vmem:[#allocation3 + $0x10] sm:$0xf] %vm376_vm8, %v4625_v27 }
 0x190   : > { %v2093_v45 = vsel %vm1211_vm6, %v2090_v11, %v2092_v24  ;;  %v2202_v52 = vrot.slane %v2200_v50, 1  ;;  %v2205_v55 = vrot.slane %v2203_v46, 2  ;;  %v5312_v20 = vld [vmem:[#allocation2 + $0x28] sm:$0xff]  ;;  %v2078_v48 = vunpack.c.l.b16 %v2054_v9  ;;  %382 = vst.msk [vmem:[#allocation3 + $0x14] sm:$0xf] %vm376_vm8, %v4625_v27 }
 0x191   : > { %v1821_v43 = vpack.c.b16 %v1815_v34, %v1815_v34  ;;  %4257 = vmatmul.msk.bf16.gmra.mxu0 %vm507_vm1, %v2093_v45  ;;  %v2288_v11 = vsel %vm2285_vm0, %v2286_v3, %v2287_v44  ;;  %v2607_v6 = vrot.slane %v5312_v20, 3  ;;  %v2383_v34 = vunpack.c.l.b16 %v2359_v35  ;;  %383 = vst.msk [vmem:[#allocation3 + $0x18] sm:$0xf] %vm376_vm8, %v4625_v27 }
 0x192   : > { %v5314_v26 = vor.u32 %v2205_v55, %v2202_v52  ;;  %v2084_v62 = vpack.c.b16 %v2078_v48, %v2078_v48  ;;  %v2490_v46 = vrot.slane %v2488_v7, 2  ;;  %v2291_v52 = vrot.slane %v5255_v47, 2  ;;  %384 = vst.msk [vmem:[#allocation3 + $0x1c] sm:$0xf] %vm376_vm8, %v4625_v27 }
 0x193   : > { %v1862_v60 = vshll.u32 %v1821_v43, 16  ;;  %v1980_v63 = vrot.slane %v1821_v43, 1  ;;  %v5327_v33 = vsel %vm827_vm5, %v2605_v42, %v2607_v6  ;;  %v5330_v32 = vsel %vm827_vm5, %v2607_v6, %v2609_v19  ;;  %385 = vst.msk [vmem:[#allocation3 + $0x20] sm:$0xf] %vm376_vm8, %v4625_v27 }
 0x194   : > { %v5321_v54 = vsel %vm453_vm2, %v2197_v58, %v5314_v26  ;;  %v2094_v58 = vrot.slane %v2084_v62, 1  ;;  %v2394_v42 = vpack.c.b16 %v2384_v39, %v2383_v34  ;;  %v2403_v55 = vrot.slane %v5248_v22, 2  ;;  %v2158_v62 = vld [vmem:[#allocation2 + $0x2c] sm:$0x3]  ;;  %386 = vst.msk [vmem:[#allocation3 + $0x24] sm:$0xf] %vm376_vm8, %v4625_v27 }
 0x195   : > { %v1864_v16 = vrot.slane %v1862_v60, 1  ;;  %v1981_v12 = vsel %vm1211_vm6, %v1978_v23, %v1980_v63  ;;  %v2289_v23 = vrot.slane %v5203_v18, 2  ;;  %v2493_v18 = vrot.slane %v2491_v5, 3  ;;  %387 = vst.msk [vmem:[#allocation3 + $0x28] sm:$0xf] %vm376_vm8, %v4625_v27 }
 0x196   : > { %4266 = vmatmul.msk.bf16.vlgmr.msrb.gmra.mxu2 %vm507_vm1, %v2288_v11  ;;  %v2095_v41 = vsel %vm1211_vm6, %v2092_v24, %v2094_v58  ;;  %v2400_v43 = vrot.slane %v2394_v42, 2  ;;  %v2480_v24 = vshrl.u32 %v2394_v42, 16  ;;  %v2483_v50 = vshll.u32 %v2394_v42, 16  ;;  %388 = vst.msk [vmem:[#allocation3 + $0x2c] sm:$0xf] %vm376_vm8, %v4625_v27 }
 0x197   : > { %v1865_v53 = vsel %vm679_vm3, %v1860_v30, %v1864_v16  ;;  %v2290_v40 = vsel %vm2285_vm0, %v2287_v44, %v2289_v23  ;;  %v2494_v9 = vor.u32 %v2493_v18, %v2490_v46  ;;  %v2497_v3 = vshrl.u32 %v5248_v22, 16 }
 0x198   : > { %v2402_v45 = vsel %vm2285_vm0, %v2400_v43, %v2401_v15  ;;  %v2482_v36 = vrot.slane %v2480_v24, 2  ;;  %v2485_v39 = vrot.slane %v2483_v50, 3  ;;  %v2500_v60 = vshll.u32 %v5248_v22, 16  ;;  %v2369_v50 = vld [vmem:[#allocation2 + $0x30] sm:$0x3] }
 0x199   : > { %4236 = vmatmul.msk.bf16.gmra.mxu3 %vm507_vm1, %v1981_v12  ;;  %v2292_v63 = vsel %vm2285_vm0, %v2289_v23, %v2291_v52  ;;  %v2499_v48 = vrot.slane %v2497_v3, 2  ;;  %v2293_v22 = vrot.slane %v5296_v13, 2  ;;  %v2506_v16 = vshrl.u32 %v5276_v8, 16 }
 0x19a   : > { %v2486_v59 = vor.u32 %v2485_v39, %v2482_v36  ;;  %v2502_v11 = vrot.slane %v2500_v60, 3  ;;  %v2509_v6 = vshll.u32 %v5276_v8, 16  ;;  %v2162_v35 = vunpack.c.l.b16 %v2158_v62 }
 0x19b   : > { %4225 = vmatmul.msk.bf16.gmra.mxu1 %vm507_vm1, %v1865_v53  ;;  %v2294_v12 = vsel %vm2285_vm0, %v2291_v52, %v2293_v22  ;;  %v2508_v30 = vrot.slane %v2506_v16, 2  ;;  %v2407_v42 = vrot.slane %v5312_v20, 2  ;;  %v2518_v7 = vshll.u32 %v5312_v20, 16 }
 0x19c   : > { %v2495_v44 = vsel %vm1326_vm7, %v2486_v59, %v2494_v9  ;;  %v2503_v47 = vor.u32 %v2502_v11, %v2499_v48  ;;  %v2511_v53 = vrot.slane %v2509_v6, 3  ;;  %v2393_v36 = vunpack.c.l.b16 %v2369_v50 }
 0x19d   : > { %v2520_v43 = vrot.slane %v2518_v7, 3  ;;  %v2524_v11 = vshrl.u32 %v5310_v1, 16 }
 0x19e   : > { %v2504_v19 = vsel %vm1326_vm7, %v2494_v9, %v2503_v47  ;;  %v2512_v13 = vor.u32 %v2511_v53, %v2508_v30  ;;  %v2399_v3 = vpack.c.b16 %v2393_v36, %v2393_v36 }
 0x19f   : > { %v2526_v6 = vrot.slane %v2524_v11, 2 }
 0x1a0   : > { %v2513_v8 = vsel %vm1326_vm7, %v2503_v47, %v2512_v13  ;;  %v2409_v48 = vrot.slane %v2399_v3, 2  ;;  %v2527_v47 = vshll.u32 %v5310_v1, 16 }
 0x1a1   : > { %4258 = vmatmul.msk.bf16.gmra.mxu0 %vm507_vm1, %v2095_v41  ;;  %v2163_v41 = vpack.c.b16 %v2162_v35, %v2162_v35 }
 0x1a2   : > { %v2410_v16 = vsel %vm2285_vm0, %v2407_v42, %v2409_v48 }
 0x1a3   : > { %v2295_v34 = vrot.slane %v2163_v41, 2  ;;  %v2212_v52 = vshll.u32 %v2163_v41, 16 }
 0x1a5   : > { %v2296_v5 = vsel %vm2285_vm0, %v2293_v22, %v2295_v34 }
 0x1a6   : > { %4267 = vmatmul.msk.bf16.gmra.mxu2 %vm507_vm1, %v2290_v40 }
 0x1a9   : > { %4288 = vmatmul.msk.bf16.vlgmr.msra.gmra.mxu3 %vm507_vm1, %v2402_v45 }
 0x1ab   : > { %4260 = vmatmul.msk.bf16.vlgmr.msrb.gmra.mxu1 %vm507_vm1, %v5171_v31  ;;  %v2404_v31 = vsel %vm2285_vm0, %v2401_v15, %v2403_v55  ;;  %v2515_v15 = vshrl.u32 %v5312_v20, 16 }
 0x1ad   : > { %v2517_v40 = vrot.slane %v2515_v15, 2 }
 0x1af   : > { %v2521_v18 = vor.u32 %v2520_v43, %v2517_v40 }
 0x1b1   : > { %4294 = vmatmul.msk.bf16.vlgmr.msra.gmra.mxu0 %vm507_vm1, %v2495_v44  ;;  %v2209_v44 = vshrl.u32 %v2163_v41, 16 }
 0x1b6   : > { %4268 = vmatmul.msk.bf16.gmra.mxu2 %vm507_vm1, %v2292_v63  ;;  %v2211_v63 = vrot.slane %v2209_v44, 1 }
 0x1b9   : > { %4289 = vmatmul.msk.bf16.gmra.mxu3 %vm507_vm1, %v2404_v31  ;;  %v2214_v31 = vrot.slane %v2212_v52, 2 }
 0x1bb   : > { %4261 = vmatmul.msk.bf16.gmra.mxu1 %vm507_vm1, %v5233_v25  ;;  %v2406_v25 = vsel %vm2285_vm0, %v2403_v55, %v2405_v10  ;;  %v2522_v55 = vsel %vm1326_vm7, %v2512_v13, %v2521_v18 }
 0x1c1   : > { %4295 = vmatmul.msk.bf16.gmra.mxu0 %vm507_vm1, %v2504_v19 }
 0x1c6   : > { %4269 = vmatmul.msk.bf16.gmra.mxu2 %vm507_vm1, %v2294_v12  ;;  %v2529_v12 = vrot.slane %v2527_v47, 3 }
 0x1c8   : > { %v2530_v1 = vor.u32 %v2529_v12, %v2526_v6 }
 0x1c9   : > { %v1940_v58 = vpop.f32.mrf.mxu2  ;;  %4290 = vmatmul.msk.bf16.gmra.mxu3 %vm507_vm1, %v2406_v25 }
 0x1ca   : > { %v2531_v41 = vsel %vm1326_vm7, %v2521_v18, %v2530_v1 }
 0x1cb   : > { %4262 = vmatmul.msk.bf16.gmra.mxu1 %vm507_vm1, %v5280_v0  ;;  %v2408_v0 = vsel %vm2285_vm0, %v2405_v10, %v2407_v42  ;;  %v2215_v10 = vor.u32 %v2214_v31, %v2211_v63 }
 0x1cd   : > { %v2216_v30 = vsel %vm453_vm2, %v5314_v26, %v2215_v10 }
 0x1d1   : > { %4296 = vmatmul.msk.bf16.gmra.mxu0 %vm507_vm1, %v2513_v8  ;;  %v5374_v23 = vpop.f32.mrf.mxu2 }
 0x1d6   : > { %4270 = vmatmul.msk.bf16.gmra.mxu2 %vm507_vm1, %v2296_v5 }
 0x1d8   : > { %v1893_v24 = vpop.f32.mrf.mxu1 }
 0x1d9   : > { %4291 = vmatmul.msk.bf16.gmra.mxu3 %vm507_vm1, %v2408_v0  ;;  %v1941_v45 = vadd.f32 %v1940_v58, %v1893_v24  ;;  %v1945_v20 = vpop.f32.mrf.mxu2 }
 0x1db   : > { %4263 = vmatmul.msk.bf16.gmra.mxu1 %vm507_vm1, %v5321_v54 }
 0x1dc   : > { %v2009_v46 = vpop.f32.mrf.mxu3 }
 0x1dd   : > { %v2034_v39 = vadd.f32 %v2009_v46, %v1941_v45 }
 0x1de   : > { %v2123_v9 = vpop.f32.mrf.mxu0 }
 0x1df   : > { %v5385_v59 = vadd.f32 %v2123_v9, %v2034_v39 }
 0x1e0   : > { %v5388_v60 = vpop.f32.mrf.mxu1 }
 0x1e1   : > { %4297 = vmatmul.msk.bf16.gmra.mxu0 %vm507_vm1, %v2522_v55  ;;  %v5397_v22 = vpop.f32.mrf.mxu2 }
 0x1e4   : > { %v5391_v54 = vpop.f32.mrf.mxu3 }
 0x1e6   : > { %v5395_v19 = vpop.f32.mrf.mxu0 }
 0x1e8   : > { %v1898_v62 = vpop.f32.mrf.mxu1 }
 0x1e9   : > { %4292 = vmatmul.msk.bf16.gmra.mxu3 %vm507_vm1, %v2410_v16  ;;  %v1946_v25 = vadd.f32 %v1945_v20, %v1898_v62  ;;  %v1950_v8 = vpop.f32.mrf.mxu2 }
 0x1eb   : > { %4264 = vmatmul.msk.bf16.gmra.mxu1 %vm507_vm1, %v2216_v30 }
 0x1ec   : > { %v2014_v53 = vpop.f32.mrf.mxu3 }
 0x1ed   : > { %v2036_v58 = vadd.f32 %v2014_v53, %v1946_v25 }
 0x1ee   : > { %v2128_v35 = vpop.f32.mrf.mxu0 }
 0x1ef   : > { %v2150_v13 = vadd.f32 %v2128_v35, %v2036_v58 }
 0x1f0   : > { %v5405_v34 = vpop.f32.mrf.mxu1 }
 0x1f1   : > { %4298 = vmatmul.msk.bf16.gmra.mxu0 %vm507_vm1, %v2531_v41  ;;  %v5412_v5 = vpop.f32.mrf.mxu2 }
 0x1f4   : > { %v5408_v42 = vpop.f32.mrf.mxu3 }
 0x1f6   : > { %v5410_v15 = vpop.f32.mrf.mxu0 }
 0x1f8   : > { %v1903_v7 = vpop.f32.mrf.mxu1 }
 0x1f9   : > { %v1951_v26 = vadd.f32 %v1950_v8, %v1903_v7  ;;  %v1955_v46 = vpop.f32.mrf.mxu2 }
 0x1fb   : > { %4300 = vmatmul.msk.bf16.vlgmr.msra.gmra.mxu1 %vm507_vm1, %v5209_v21 }
 0x1fc   : > { %v2019_v0 = vpop.f32.mrf.mxu3 }
 0x1fd   : > { %v2038_v40 = vadd.f32 %v2019_v0, %v1951_v26 }
 0x1fe   : > { %v2133_v43 = vpop.f32.mrf.mxu0 }
 0x1ff   : > { %v2152_v24 = vadd.f32 %v2133_v43, %v2038_v40 }
 0x200   : > { %v5416_v50 = vpop.f32.mrf.mxu1 }
 0x201   : > { %v5424_v21 = vpop.f32.mrf.mxu2 }
 0x204   : > { %v5418_v45 = vpop.f32.mrf.mxu3 }
 0x206   : > { %v5420_v18 = vpop.f32.mrf.mxu0 }
 0x208   : > { %v1908_v36 = vpop.f32.mrf.mxu1 }
 0x209   : > { %v1956_v20 = vadd.f32 %v1955_v46, %v1908_v36  ;;  %v1960_v31 = vpop.f32.mrf.mxu2 }
 0x20b   : > { %4301 = vmatmul.msk.bf16.gmra.mxu1 %vm507_vm1, %v5270_v37 }
 0x20c   : > { %v2024_v39 = vpop.f32.mrf.mxu3 }
 0x20d   : > { %v2040_v9 = vadd.f32 %v2024_v39, %v1956_v20  ;;  %v1943_v20 = vadd.f32 %v5374_v23, %v5388_v60  ;;  %v5500_v60 = vld [vmem:[%s5959_s5] ss:$0 sm:$0xff] }
 0x20e   : > { %v2138_v44 = vpop.f32.mrf.mxu0 }
 0x20f   : > { %v2154_v52 = vadd.f32 %v2138_v44, %v2040_v9  ;;  %v2035_v9 = vadd.f32 %v5391_v54, %v1943_v20  ;;  %v4556_v54 = vld [vmem:[%s5961_s7 + $0x8] sm:$0xff] }
 0x210   : > { %v5426_v55 = vpop.f32.mrf.mxu1  ;;  %3062 = vmatpush.bf16.msrb.mxu3 %v4556_v54 }
 0x214   : > { %v5428_v3 = vpop.f32.mrf.mxu3 }
 0x216   : > { %v5430_v63 = vpop.f32.mrf.mxu0 }
 0x218   : > { %v1913_v48 = vpop.f32.mrf.mxu1 }
 0x219   : > { %v1961_v11 = vadd.f32 %v1960_v31, %v1913_v48 }
 0x21b   : > { %4302 = vmatmul.msk.bf16.gmra.mxu1 %vm507_vm1, %v5291_v57  ;;  %v4558_v57 = vld [vmem:[%s5961_s7 + $0x18] sm:$0xff] }
 0x21c   : > { %v2029_v47 = vpop.f32.mrf.mxu3  ;;  %3006 = vmatpush.bf16.msra.mxu2 %v4558_v57 }
 0x21d   : > { %v2042_v37 = vadd.f32 %v2029_v47, %v1961_v11  ;;  %v2149_v11 = vadd.f32 %v5395_v19, %v2035_v9 }
 0x21e   : > { %v2143_v10 = vpop.f32.mrf.mxu0 }
 0x21f   : > { %v2156_v16 = vadd.f32 %v2143_v10, %v2042_v37 }
 0x220   : > { %v5434_v6 = vpop.f32.mrf.mxu1 }
 0x224   : > { %v5454_v41 = vpop.f32.mrf.mxu3 }
 0x228   : > { %v2244_v12 = vpop.f32.mrf.mxu1 }
 0x229   : > { %v2269_v62 = vadd.f32 %v2244_v12, %v5385_v59  ;;  %v5450_v59 = vpop.f32.mrf.mxu2 }
 0x22b   : > { %4303 = vmatmul.msk.bf16.gmra.mxu1 %vm507_vm1, %v5327_v33 }
 0x22c   : > { %v2438_v26 = vpop.f32.mrf.mxu3 }
 0x230   : > { %v2246_v25 = vpop.f32.mrf.mxu1 }
 0x231   : > { %v2324_v8 = vpop.f32.mrf.mxu2  ;;  %v2270_v37 = vadd.f32 %v2246_v25, %v2149_v11  ;;  %v5508_v25 = vld [vmem:[%s5960_s6] ss:$0 sm:$0xff] }
 0x238   : > { %v2249_v30 = vpop.f32.mrf.mxu1 }
 0x239   : > { %v5439_v53 = vadd.f32 %v2249_v30, %v2150_v13  ;;  %v5456_v13 = vpop.f32.mrf.mxu0  ;;  %v2326_v43 = vpop.f32.mrf.mxu2 }
 0x23a   : > { %v2350_v23 = vadd.f32 %v2326_v43, %v2270_v37 }
 0x23b   : > { %4304 = vmatmul.msk.bf16.gmra.mxu1 %vm507_vm1, %v5330_v32 }
 0x240   : > { %v5446_v1 = vpop.f32.mrf.mxu1 }
 0x241   : > { %v2559_v40 = vpop.f32.mrf.mxu0  ;;  %v2329_v44 = vpop.f32.mrf.mxu2 }
 0x242   : > { %v2351_v20 = vadd.f32 %v2329_v44, %v5439_v53 }
 0x248   : > { %v2254_v58 = vpop.f32.mrf.mxu1 }
 0x249   : > { %v5448_v35 = vadd.f32 %v2254_v58, %v2152_v24  ;;  %v2440_v24 = vpop.f32.mrf.mxu3  ;;  %v2561_v39 = vpop.f32.mrf.mxu0  ;;  %v1948_v58 = vadd.f32 %v5397_v22, %v5405_v34 }
 0x24a   : > { %v2331_v30 = vpop.f32.mrf.mxu2 }
 0x250   : > { %v5452_v33 = vpop.f32.mrf.mxu1 }
 0x251   : > { %v2443_v31 = vpop.f32.mrf.mxu3  ;;  %v2564_v10 = vpop.f32.mrf.mxu0 }
 0x252   : > { %v2334_v34 = vpop.f32.mrf.mxu2 }
 0x258   : > { %v2259_v32 = vpop.f32.mrf.mxu1 }
 0x259   : > { %v5460_v7 = vadd.f32 %v2259_v32, %v2154_v52  ;;  %v2349_v52 = vadd.f32 %v2324_v8, %v2269_v62  ;;  %v2445_v57 = vpop.f32.mrf.mxu3  ;;  %v2464_v32 = vadd.f32 %v2440_v24, %v2350_v23  ;;  %v2566_v9 = vpop.f32.mrf.mxu0 }
 0x25b   : > { %v2463_v47 = vadd.f32 %v2438_v26, %v2349_v52  ;;  %v4555_v26 = vld [vmem:[%s5961_s7] sm:$0xff] }
 0x25c   : > { %3063 = vmatpush.bf16.msrb.mxu3 %v4555_v26 }
 0x25d   : > { %v2584_v12 = vadd.f32 %v2559_v40, %v2463_v47  ;;  %v2037_v40 = vadd.f32 %v5408_v42, %v1948_v58 }
 0x25f   : > { %v2151_v22 = vadd.f32 %v5410_v15, %v2037_v40 }
 0x260   : > { %v5476_v0 = vpop.f32.mrf.mxu1 }
 0x261   : > { %v2272_v42 = vadd.f32 %v5446_v1, %v2151_v22  ;;  %v2448_v23 = vpop.f32.mrf.mxu3  ;;  %v2863_v1 = vld [vmem:[#allocation3 + $0x4] sm:$0xe] }
 0x268   : > { %v2264_v46 = vpop.f32.mrf.mxu1 }
 0x269   : > { %v5486_v36 = vadd.f32 %v2264_v46, %v2156_v16  ;;  %v4557_v16 = vld [vmem:[%s5961_s7 + $0x10] sm:$0xff]  ;;  %v2585_v46 = vadd.f32 %v2561_v39, %v2464_v32 }
 0x26a   : > { %3007 = vmatpush.bf16.msra.mxu2 %v4557_v16  ;;  %v2465_v16 = vadd.f32 %v2443_v31, %v2351_v20  ;;  %v2336_v20 = vpop.f32.mrf.mxu2 }
 0x270   : > { %v5491_v48 = vpop.f32.mrf.mxu1 }
 0x278   : > { %v2638_v19 = vpop.f32.mrf.mxu1 }
 0x279   : > { %v2663_v62 = vadd.f32 %v2638_v19, %v2584_v12  ;;  %v2586_v19 = vadd.f32 %v2564_v10, %v2465_v16 }
 0x27b   : > { %v2677_v8 = vmul.f32 %v5500_v60, %v2663_v62  ;;  %v2352_v62 = vadd.f32 %v2331_v30, %v2272_v42  ;;  %v4559_v42 = vld [vmem:[%s5961_s7 + $0x20] sm:$0xff] }
 0x27d   : > { %v2691_v43 = vadd.f32 %v5508_v25, %v2677_v8  ;;  %v2466_v10 = vadd.f32 %v2445_v57, %v2352_v62 }
 0x27f   : > { %vm2701_vm1 = vcmp.ge.f32.partialorder %v2691_v43, 0.0  ;;  %v2711_v52 = vmul.f32 0.01, %v2691_v43 }
 0x280   : > { %v2640_v11 = vpop.f32.mrf.mxu1 }
 0x281   : > { %v2721_v24 = vsel %vm2701_vm1, %v2691_v43, %v2711_v52  ;;  %v2664_v47 = vadd.f32 %v2640_v11, %v2585_v46  ;;  %v1953_v46 = vadd.f32 %v5412_v5, %v5416_v50  ;;  %v4560_v52 = vld [vmem:[%s5961_s7 + $0x28] sm:$0xff]  ;;  %v2587_v5 = vadd.f32 %v2566_v9, %v2466_v10 }
 0x282   : > { %v2731_v37 = vmul.f32 %v2721_v24, %v5047_v56  ;;  %v2569_v56 = vpop.f32.mrf.mxu0  ;;  %3143 = vmatpush.bf16.msrb.mxu0 %v4560_v52  ;;  %v2353_v50 = vadd.f32 %v2334_v34, %v5448_v35  ;;  %v1958_v10 = vadd.f32 %v5424_v21, %v5426_v55 }
 0x283   : > { %v2678_v12 = vmul.f32 %v5500_v60, %v2664_v47  ;;  %v2039_v24 = vadd.f32 %v5418_v45, %v1953_v46  ;;  %v4565_v46 = vld [vmem:[%s5961_s7 + $0x30] sm:$0xff] }
 0x284   : > { %v2741_v39 = vpack.c.bf16 %v2731_v37, %v2731_v37  ;;  %v2467_v35 = vadd.f32 %v2448_v23, %v2353_v50 }
 0x285   : > { %v2692_v53 = vadd.f32 %v5508_v25, %v2678_v12  ;;  %v2153_v45 = vadd.f32 %v5420_v18, %v2039_v24 }
 0x286   : > { %v2752_v44 = vshrl.u32 %v2741_v39, 16  ;;  %v2755_v54 = vshll.u32 %v2741_v39, 16  ;;  %3144 = vmatpush.bf16.msrb.mxu0 %v4559_v42 }
 0x287   : > { %vm2702_vm13 = vcmp.ge.f32.partialorder %v2692_v53, 0.0  ;;  %v2712_v15 = vmul.f32 0.01, %v2692_v53  ;;  %v2274_v34 = vadd.f32 %v5452_v33, %v2153_v45  ;;  %v4593_v45 = vld [vmem:[#allocation3] sm:$0xe] }
 0x288   : > { %v2754_v58 = vrot.slane %v2752_v44, 6  ;;  %v2757_v32 = vrot.slane %v2755_v54, 7  ;;  %v2643_v8 = vpop.f32.mrf.mxu1 }
 0x289   : > { %v2722_v31 = vsel %vm2702_vm13, %v2692_v53, %v2712_v15  ;;  %v2665_v26 = vadd.f32 %v2643_v8, %v2586_v19 }
 0x28a   : > { %v2758_v40 = vor.u32 %v2757_v32, %v2754_v58  ;;  %v2732_v43 = vmul.f32 %v2722_v31, %v5060_v28  ;;  %v2450_v28 = vpop.f32.mrf.mxu3  ;;  %v2571_v15 = vpop.f32.mrf.mxu0  ;;  %v4566_v32 = vld [vmem:[%s5961_s7 + $0x38] sm:$0xff] }
 0x28b   : > { %v2679_v30 = vmul.f32 %v5500_v60, %v2665_v26  ;;  %v2339_v31 = vpop.f32.mrf.mxu2  ;;  %3269 = vmatpush.bf16.msrb.mxu1 %v4566_v32  ;;  %v2588_v26 = vadd.f32 %v2569_v56, %v2467_v35 }
 0x28c   : > { %v2864_v11 = vsel %vm2862_vm15, %v2758_v40, %v2863_v1  ;;  %v2742_v22 = vpack.c.bf16 %v2732_v43, %v2732_v43  ;;  %v2759_v19 = vrot.slane %v2758_v40, 4  ;;  %v2354_v40 = vadd.f32 %v2336_v20, %v2274_v34 }
 0x28d   : > { %2865 = vst [vmem:[#allocation3 + $0x4] sm:$0xe] %v2864_v11  ;;  %v2693_v47 = vadd.f32 %v5508_v25, %v2679_v30 }
 0x28e   : > { %v2761_v37 = vshrl.u32 %v2742_v22, 16  ;;  %v2764_v16 = vshll.u32 %v2742_v22, 16 }
 0x28f   : > { %vm2703_vm10 = vcmp.ge.f32.partialorder %v2693_v47, 0.0  ;;  %v2713_v57 = vmul.f32 0.01, %v2693_v47  ;;  %3270 = vmatpush.bf16.msrb.mxu1 %v4565_v46 }
 0x290   : > { %v2763_v12 = vrot.slane %v2761_v37, 6  ;;  %v2766_v39 = vrot.slane %v2764_v16, 7  ;;  %v2645_v53 = vpop.f32.mrf.mxu1  ;;  %v2041_v37 = vadd.f32 %v5428_v3, %v1958_v10  ;;  %v4568_v3 = vld [vmem:[%s5961_s7 + $0x48] sm:$0xff] }
 0x291   : > { %v2723_v44 = vsel %vm2703_vm10, %v2693_v47, %v2713_v57  ;;  %v2666_v54 = vadd.f32 %v2645_v53, %v2587_v5  ;;  %v2468_v5 = vadd.f32 %v2450_v28, %v2354_v40  ;;  %v2355_v57 = vadd.f32 %v2339_v31, %v5460_v7  ;;  %3402 = vmatpush.bf16.msrb.mxu2 %v4568_v3 }
 0x292   : > { %v2767_v62 = vor.u32 %v2766_v39, %v2763_v12  ;;  %v2733_v9 = vmul.f32 %v2723_v44, %v5070_v61  ;;  %v2453_v30 = vpop.f32.mrf.mxu3  ;;  %v2574_v42 = vpop.f32.mrf.mxu0 }
 0x293   : > { %v2680_v58 = vmul.f32 %v5500_v60, %v2666_v54  ;;  %v2341_v7 = vpop.f32.mrf.mxu2  ;;  %v2589_v44 = vadd.f32 %v2571_v15, %v2468_v5  ;;  %v1963_v15 = vadd.f32 %v5450_v59, %v5434_v6 }
 0x294   : > { %v2768_v18 = vsel %vm5074_vm14, %v2759_v19, %v2767_v62  ;;  %v2743_v8 = vpack.c.bf16 %v2733_v9, %v2733_v9  ;;  %v5547_v1 = vld [vmem:[#allocation3] sm:$0xff]   ;;  %v2769_v56 = vrot.slane %v2767_v62, 4  ;;  %v2469_v62 = vadd.f32 %v2453_v30, %v2355_v57 }
 0x295   : > { %2866 = vst.msk [vmem:[#allocation3 + $0x8] sm:$0xf] %vm376_vm8, %v2768_v18  ;;  %v2694_v61 = vadd.f32 %v5508_v25, %v2680_v58  ;;  %4346 = vmatmul.msk.bf16.vlgmr.msrb.gmra.mxu3 %vm2984_vm4, %v5547_v1  ;;  %v4592_v53 = vld [vmem:[#allocation3] sm:$0xf0]  ;;  %v2931_v54 = vshll.u32 %v5547_v1, 16 }
 0x296   : > { %v2771_v33 = vshrl.u32 %v2743_v8, 16  ;;  %v2774_v23 = vshll.u32 %v2743_v8, 16  ;;  %v2590_v40 = vadd.f32 %v2574_v42, %v2469_v62  ;;  %v3181_v30 = vld [vmem:[#allocation3 + $0x4] sm:$0xe]  ;;  %v2043_v42 = vadd.f32 %v5454_v41, %v1963_v15 }
 0x297   : > { %vm2704_vm9 = vcmp.ge.f32.partialorder %v2694_v61, 0.0  ;;  %v2714_v43 = vmul.f32 0.01, %v2694_v61  ;;  %v3208_v5 = vunpack.c.l.b16 %v3181_v30 }
 0x298   : > { %v2773_v52 = vrot.slane %v2771_v33, 6  ;;  %v2776_v11 = vrot.slane %v2774_v23, 7  ;;  %v2648_v22 = vpop.f32.mrf.mxu1  ;;  %v2933_v23 = vrot.slane %v2931_v54, 1 }
 0x299   : > { %v2724_v24 = vsel %vm2704_vm9, %v2694_v61, %v2714_v43  ;;  %v2667_v47 = vadd.f32 %v2648_v22, %v2588_v26  ;;  %vm389_vm9 = vcmask 256000  }
 0x29a   : > { %v2777_v20 = vor.u32 %v2776_v11, %v2773_v52  ;;  %v2734_v16 = vmul.f32 %v2724_v24, %v5091_v2  ;;  %v2155_v2 = vadd.f32 %v5430_v63, %v2041_v37  ;;  %v4594_v63 = vor.u32 %v4593_v45, %v4592_v53  ;;  %v2455_v8 = vpop.f32.mrf.mxu3  ;;  %390 = vst.msk [vmem:[#allocation3 + $0x30] sm:$0x7] %vm389_vm9, %v4625_v27 }
 0x29b   : > { %v2681_v50 = vmul.f32 %v5500_v60, %v2667_v47 }
 0x29c   : > { %v2778_v21 = vsel %vm5074_vm14, %v2769_v56, %v2777_v20  ;;  %v2744_v55 = vpack.c.bf16 %v2734_v16, %v2734_v16  ;;  %v2276_v9 = vadd.f32 %v5476_v0, %v2155_v2  ;;  %v2779_v31 = vrot.slane %v2777_v20, 4  ;;  %v2576_v56 = vpop.f32.mrf.mxu0 }
 0x29d   : > { %2867 = vst.msk [vmem:[#allocation3 + $0xc] sm:$0xf] %vm376_vm8, %v2778_v21  ;;  %v2695_v12 = vadd.f32 %v5508_v25, %v2681_v50  ;;  %v3099_v59 = vrot.slane %v4594_v63, 1 }
 0x29e   : > { %v2781_v28 = vshrl.u32 %v2744_v55, 16  ;;  %v2784_v39 = vshll.u32 %v2744_v55, 16  ;;  %v2356_v43 = vadd.f32 %v2341_v7, %v2276_v9 }
 0x29f   : > { %vm2705_vm1 = vcmp.ge.f32.partialorder %v2695_v12, 0.0  ;;  %v2715_v19 = vmul.f32 0.01, %v2695_v12 }
 0x2a0   : > { %v2783_v35 = vrot.slane %v2781_v28, 6  ;;  %v2786_v34 = vrot.slane %v2784_v39, 7  ;;  %v2650_v58 = vpop.f32.mrf.mxu1 }
 0x2a1   : > { %v2725_v32 = vsel %vm2705_vm1, %v2695_v12, %v2715_v19  ;;  %v2668_v18 = vadd.f32 %v2650_v58, %v2589_v44  ;;  %v2344_v12 = vpop.f32.mrf.mxu2  ;;  %v2470_v44 = vadd.f32 %v2455_v8, %v2356_v43 }
 0x2a2   : > { %v2787_v61 = vor.u32 %v2786_v34, %v2783_v35  ;;  %v2735_v33 = vmul.f32 %v2725_v32, %v5103_v49  ;;  %v2929_v49 = vshrl.u32 %v5547_v1, 16  ;;  %v2357_v54 = vadd.f32 %v2344_v12, %v5486_v36  ;;  %v2458_v41 = vpop.f32.mrf.mxu3 }
 0x2a3   : > { %v2682_v26 = vmul.f32 %v5500_v60, %v2668_v18  ;;  %v2591_v63 = vadd.f32 %v2576_v56, %v2470_v44 }
 0x2a4   : > { %v2788_v0 = vsel %vm5074_vm14, %v2779_v31, %v2787_v61  ;;  %v2745_v46 = vpack.c.bf16 %v2735_v33, %v2735_v33  ;;  %v5578_v10 = vld [vmem:[#allocation3 + $0x8] sm:$0xff]  ;;  %v2934_v20 = vor.u32 %v2933_v23, %v2929_v49  ;;  %v2789_v3 = vrot.slane %v2787_v61, 4 }
 0x2a5   : > { %v5580_v52 = vld [vmem:[#allocation3 + $0x8] sm:$0xff]   ;;  %2868 = vst.msk [vmem:[#allocation3 + $0x10] sm:$0xf] %vm376_vm8, %v2788_v0  ;;  %v2696_v6 = vadd.f32 %v5508_v25, %v2682_v26  ;;  %4347 = vmatmul.msk.bf16.gmra.mxu3 %vm2984_vm4, %v5578_v10  ;;  %v3100_v47 = vrot.slane %v5578_v10, 1  ;;  %v2936_v37 = vshll.u32 %v5578_v10, 16  ;;  %v2471_v8 = vadd.f32 %v2458_v41, %v2357_v54  ;;  %v2579_v26 = vpop.f32.mrf.mxu0 }
 0x2a6   : > { %v3209_v11 = vunpack.c.l.b16 %v5580_v52  ;;  %v2791_v22 = vshrl.u32 %v2745_v46, 16  ;;  %v2794_v24 = vshll.u32 %v2745_v46, 16 }
 0x2a7   : > { %vm2706_vm11 = vcmp.ge.f32.partialorder %v2696_v6, 0.0  ;;  %v2716_v16 = vmul.f32 0.01, %v2696_v6  ;;  %v3101_v21 = vsel %vm1211_vm6, %v3099_v59, %v3100_v47  ;;  %v2938_v55 = vrot.slane %v2936_v37, 1 }
 0x2a8   : > { %v2793_v1 = vrot.slane %v2791_v22, 6  ;;  %v2796_v50 = vrot.slane %v2794_v24, 7  ;;  %v2653_v57 = vpop.f32.mrf.mxu1  ;;  %4363 = vmatmul.msk.bf16.vlgmr.msrb.gmra.mxu0 %vm2984_vm4, %v3101_v21  ;;  %v3219_v7 = vpack.c.b16 %v3209_v11, %v3208_v5  ;;  %v2940_v22 = vshrl.u32 %v5578_v10, 16 }
 0x2a9   : > { %v2726_v2 = vsel %vm2706_vm11, %v2696_v6, %v2716_v16  ;;  %v2669_v28 = vadd.f32 %v2653_v57, %v2590_v40  ;;  %v2939_v45 = vsel %vm679_vm3, %v2934_v20, %v2938_v55  ;;  %v2346_v59 = vpop.f32.mrf.mxu2  ;;  %v2592_v56 = vadd.f32 %v2579_v26, %v2471_v8  ;;  %v4570_v8 = vld [vmem:[%s5961_s7 + $0x58] sm:$0xff] }
 0x2aa   : > { %v2797_v39 = vor.u32 %v2796_v50, %v2793_v1  ;;  %v2736_v53 = vmul.f32 %v2726_v2, %v5131_v4  ;;  %4333 = vmatmul.msk.bf16.vlgmr.msra.gmra.mxu2 %vm2984_vm4, %v2939_v45  ;;  %v2157_v4 = vadd.f32 %v5456_v13, %v2043_v42  ;;  %v3225_v36 = vrot.slane %v3219_v7, 1  ;;  %v2460_v42 = vpop.f32.mrf.mxu3  ;;  %3493 = vmatpush.bf16.msra.mxu3 %v4570_v8 }
 0x2ab   : > { %v2683_v19 = vmul.f32 %v5500_v60, %v2669_v28  ;;  %v3317_v0 = vshrl.u32 %v3219_v7, 16  ;;  %v3320_v46 = vshll.u32 %v3219_v7, 16  ;;  %v2942_v50 = vor.u32 %v2940_v22, %v2938_v55 }
 0x2ac   : > { %v2798_v62 = vsel %vm5074_vm14, %v2789_v3, %v2797_v39  ;;  %v2746_v9 = vpack.c.bf16 %v2736_v53, %v2736_v53  ;;  %v5604_v35 = vld [vmem:[#allocation3 + $0xc] sm:$0xff]  ;;  %v2278_v61 = vadd.f32 %v5491_v48, %v2157_v4  ;;  %v2799_v30 = vrot.slane %v2797_v39, 4 }
 0x2ad   : > { %2869 = vst.msk [vmem:[#allocation3 + $0x14] sm:$0xf] %vm376_vm8, %v2798_v62  ;;  %v2697_v34 = vadd.f32 %v5508_v25, %v2683_v19  ;;  %v3226_v18 = vrot.slane %v5604_v35, 1  ;;  %v3325_v24 = vshrl.u32 %v5604_v35, 16  ;;  %v3328_v37 = vshll.u32 %v5604_v35, 16  ;;  %v4567_v53 = vld [vmem:[%s5961_s7 + $0x40] sm:$0xff] }
 0x2ae   : > { %v2801_v58 = vshrl.u32 %v2746_v9, 16  ;;  %v2804_v32 = vshll.u32 %v2746_v9, 16  ;;  %v2358_v20 = vadd.f32 %v2346_v59, %v2278_v61  ;;  %v3319_v57 = vrot.slane %v3317_v0, 1  ;;  %v3790_v62 = vld [vmem:[#allocation3 + $0x8] sm:$0x8]  ;;  %3403 = vmatpush.bf16.msrb.mxu2 %v4567_v53 }
 0x2af   : > { %vm2707_vm13 = vcmp.ge.f32.partialorder %v2697_v34, 0.0  ;;  %v2717_v31 = vmul.f32 0.01, %v2697_v34  ;;  %v3227_v13 = vsel %vm1211_vm6, %v3225_v36, %v3226_v18  ;;  %v3322_v21 = vrot.slane %v3320_v46, 2 }
 0x2b0   : > { %v2803_v33 = vrot.slane %v2801_v58, 6  ;;  %v2806_v15 = vrot.slane %v2804_v32, 7  ;;  %v2655_v23 = vpop.f32.mrf.mxu1  ;;  %4396 = vmatmul.msk.bf16.vlgmr.msrb.gmra.mxu1 %vm2984_vm4, %v3227_v13  ;;  %v3327_v45 = vrot.slane %v3325_v24, 1  ;;  %v3330_v55 = vrot.slane %v3328_v37, 2 }
 0x2b1   : > { %v2727_v40 = vsel %vm2707_vm13, %v2697_v34, %v2717_v31  ;;  %v2670_v43 = vadd.f32 %v2655_v23, %v2591_v63  ;;  %v2472_v9 = vadd.f32 %v2460_v42, %v2358_v20  ;;  %v3559_v58 = vunpack.c.h.b16 %v5580_v52  ;;  %v2581_v23 = vpop.f32.mrf.mxu0 }
 0x2b2   : > { %v2807_v49 = vor.u32 %v2806_v15, %v2803_v33  ;;  %v2737_v6 = vmul.f32 %v2727_v40, %v5155_v17  ;;  %v3323_v61 = vor.u32 %v3322_v21, %v3319_v57  ;;  %v5652_v33 = vor.u32 %v3330_v55, %v3327_v45 }
 0x2b3   : > { %v2684_v48 = vmul.f32 %v5500_v60, %v2670_v43  ;;  %v3797_v15 = vunpack.c.l.b16 %v3790_v62  ;;  %vm2875_vm11 = vcmask 254976  }
 0x2b4   : > { %v2808_v16 = vsel %vm5074_vm14, %v2799_v30, %v2807_v49  ;;  %v2747_v5 = vpack.c.bf16 %v2737_v6, %v2737_v6  ;;  %v5622_v1 = vld [vmem:[#allocation3 + $0x10] sm:$0xff]  ;;  %v2809_v32 = vrot.slane %v2807_v49, 4  ;;  %v5662_v43 = vsel %vm453_vm2, %v3323_v61, %v5652_v33  ;;  %vm2876_vm13 = vmand %vm2875_vm11, %vm1647_vm12 }
 0x2b5   : > { %2870 = vst.msk [vmem:[#allocation3 + $0x18] sm:$0xf] %vm376_vm8, %v2808_v16  ;;  %v2698_v17 = vadd.f32 %v5508_v25, %v2684_v48  ;;  %4348 = vmatmul.msk.bf16.gmra.mxu3 %vm2984_vm4, %v5622_v1  ;;  %v3102_v2 = vrot.slane %v5622_v1, 1  ;;  %v2944_v28 = vshll.u32 %v5622_v1, 16  ;;  %v5650_v31 = vld [vmem:[#allocation3 + $0x10] sm:$0xff]  ;;  %v3798_v0 = vpack.c.b16 %v3559_v58, %v3797_v15 }
 0x2b6   : > { %v2811_v12 = vshrl.u32 %v2747_v5, 16  ;;  %v2814_v3 = vshll.u32 %v2747_v5, 16  ;;  %v2593_v6 = vadd.f32 %v2581_v23, %v2472_v9  ;;  %v3800_v48 = vrot.slane %v5650_v31, 3 }
 0x2b7   : > { %vm2708_vm15 = vcmp.ge.f32.partialorder %v2698_v17, 0.0  ;;  %v2718_v39 = vmul.f32 0.01, %v2698_v17  ;;  %v3103_v19 = vsel %vm1211_vm6, %v3100_v47, %v3102_v2  ;;  %v5638_v41 = vrot.slane %v2944_v28, 1 }
 0x2b8   : > { %v2813_v7 = vrot.slane %v2811_v12, 6  ;;  %v2816_v44 = vrot.slane %v2814_v3, 7  ;;  %v2658_v54 = vpop.f32.mrf.mxu1  ;;  %4364 = vmatmul.msk.bf16.gmra.mxu0 %vm2984_vm4, %v3103_v19  ;;  %v3799_v57 = vrot.slane %v3798_v0, 3 }
 0x2b9   : > { %v2728_v4 = vsel %vm2708_vm15, %v2698_v17, %v2718_v39  ;;  %v2671_v34 = vadd.f32 %v2658_v54, %v2592_v56  ;;  %v2947_v10 = vsel %vm679_vm3, %v2942_v50, %v5638_v41  ;;  %v4569_v17 = vld [vmem:[%s5961_s7 + $0x50] sm:$0xff] }
 0x2ba   : > { %v2817_v36 = vor.u32 %v2816_v44, %v2813_v7  ;;  %v2738_v63 = vmul.f32 %v2728_v4, %v5189_v51  ;;  %4334 = vmatmul.msk.bf16.gmra.mxu2 %vm2984_vm4, %v2947_v10  ;;  %3494 = vmatpush.bf16.msra.mxu3 %v4569_v17 }
 0x2bb   : > { %v2685_v47 = vmul.f32 %v5500_v60, %v2671_v34 }
 0x2bc   : > { %v2818_v51 = vsel %vm5074_vm14, %v2809_v32, %v2817_v36  ;;  %v2748_v13 = vpack.c.bf16 %v2738_v63, %v2738_v63  ;;  %v5656_v26 = vld [vmem:[#allocation3 + $0x14] sm:$0xff]  ;;  %v2819_v22 = vrot.slane %v2817_v36, 4 }
 0x2bd   : > { %2871 = vst.msk [vmem:[#allocation3 + $0x1c] sm:$0xf] %vm376_vm8, %v2818_v51  ;;  %v2699_v40 = vadd.f32 %v5508_v25, %v2685_v47  ;;  %v3228_v49 = vrot.slane %v5656_v26, 1  ;;  %v3334_v50 = vshrl.u32 %v5656_v26, 16  ;;  %v3337_v12 = vshll.u32 %v5656_v26, 16 }
 0x2be   : > { %v2821_v46 = vshrl.u32 %v2748_v13, 16  ;;  %v2824_v30 = vshll.u32 %v2748_v13, 16 }
 0x2bf   : > { %vm2709_vm10 = vcmp.ge.f32.partialorder %v2699_v40, 0.0  ;;  %v2719_v59 = vmul.f32 0.01, %v2699_v40  ;;  %v3229_v20 = vsel %vm1211_vm6, %v3226_v18, %v3228_v49  ;;  %v5685_v18 = vsel %vm827_vm5, %v3799_v57, %v3800_v48 }
 0x2c0   : > { %v2823_v24 = vrot.slane %v2821_v46, 6  ;;  %v2826_v37 = vrot.slane %v2824_v30, 7  ;;  %v2660_v56 = vpop.f32.mrf.mxu1  ;;  %4397 = vmatmul.msk.bf16.gmra.mxu1 %vm2984_vm4, %v3229_v20  ;;  %v3336_v45 = vrot.slane %v3334_v50, 1  ;;  %v3339_v55 = vrot.slane %v3337_v12, 2  ;;  %v2877_v20 = vld [vmem:[#allocation3 + $0x2c] sm:$0x3] }
 0x2c1   : > { %v2729_v16 = vsel %vm2709_vm10, %v2699_v40, %v2719_v59  ;;  %v2672_v5 = vadd.f32 %v2660_v56, %v2593_v6  ;;  %v4576_v6 = vld [vmem:[%s5961_s7 + $0x68] sm:$0xff] }
 0x2c2   : > { %v2827_v21 = vor.u32 %v2826_v37, %v2823_v24  ;;  %v2739_v42 = vmul.f32 %v2729_v16, %v5218_v38  ;;  %v3340_v36 = vor.u32 %v3339_v55, %v3336_v45  ;;  %3619 = vmatpush.bf16.msra.mxu0 %v4576_v6  ;;  %v3440_v45 = vld [vmem:[#allocation3 + $0x4] sm:$0xc]  ;;  %v3657_v55 = vld [vmem:[#allocation3 + $0x30] sm:$0x7] }
 0x2c3   : > { %v2686_v3 = vmul.f32 %v5500_v60, %v2672_v5  ;;  %v2948_v60 = vshrl.u32 %v5622_v1, 16 }
 0x2c4   : > { %v2828_v28 = vsel %vm5074_vm14, %v2819_v22, %v2827_v21  ;;  %v2749_v39 = vpack.c.bf16 %v2739_v42, %v2739_v42  ;;  %v5689_v53 = vld [vmem:[#allocation3 + $0x18] sm:$0xff]  ;;  %v2829_v63 = vrot.slane %v2827_v21, 4  ;;  %v5710_v1 = vsel %vm453_vm2, %v5652_v33, %v3340_v36 }
 0x2c5   : > { %2872 = vst.msk [vmem:[#allocation3 + $0x20] sm:$0xf] %vm376_vm8, %v2828_v28  ;;  %v2700_v38 = vadd.f32 %v5508_v25, %v2686_v3  ;;  %4349 = vmatmul.msk.bf16.gmra.mxu3 %vm2984_vm4, %v5689_v53  ;;  %v3104_v44 = vrot.slane %v5689_v53, 1  ;;  %v2952_v54 = vshll.u32 %v5689_v53, 16  ;;  %v2950_v62 = vor.u32 %v2948_v60, %v5638_v41  ;;  %v5705_v61 = vld [vmem:[#allocation3 + $0x18] sm:$0xff]  ;;  %v4578_v60 = vld [vmem:[%s5961_s7 + $0x78] sm:$0xff] }
 0x2c6   : > { %v2831_v27 = vshrl.u32 %v2749_v39, 16  ;;  %v2834_v7 = vshll.u32 %v2749_v39, 16  ;;  %v3802_v13 = vrot.slane %v5705_v61, 3  ;;  %v2956_v42 = vshrl.u32 %v5689_v53, 16  ;;  %3620 = vmatpush.bf16.msra.mxu0 %v4575_v29  ;;  %3752 = vmatpush.bf16.msra.mxu1 %v4578_v60 }
 0x2c7   : > { %vm2710_vm1 = vcmp.ge.f32.partialorder %v2700_v38, 0.0  ;;  %v2720_v19 = vmul.f32 0.01, %v2700_v38  ;;  %v3105_v25 = vsel %vm1211_vm6, %v3102_v2, %v3104_v44  ;;  %v2954_v34 = vrot.slane %v2952_v54, 1 }
 0x2c8   : > { %v2833_v9 = vrot.slane %v2831_v27, 6  ;;  %v2836_v4 = vrot.slane %v2834_v7, 7  ;;  %4365 = vmatmul.msk.bf16.gmra.mxu0 %vm2984_vm4, %v3105_v25  ;;  %v5731_v56 = vsel %vm827_vm5, %v3800_v48, %v3802_v13  ;;  %v4580_v7 = vld [vmem:[%s5961_s7 + $0x88] sm:$0xff]  ;;  %v3576_v29 = vrot.slane %v5650_v31, 2 }
 0x2c9   : > { %v2730_v32 = vsel %vm2710_vm1, %v2700_v38, %v2720_v19  ;;  %v2955_v8 = vsel %vm679_vm3, %v2950_v62, %v2954_v34  ;;  %v2958_v28 = vor.u32 %v2956_v42, %v2954_v34  ;;  %v3447_v62 = vunpack.c.l.b16 %v3440_v45  ;;  %3843 = vmatpush.bf16.msra.mxu2 %v4580_v7 }
 0x2ca   : > { %v2837_v10 = vor.u32 %v2836_v4, %v2833_v9  ;;  %v2740_v47 = vmul.f32 %v2730_v32, %v5244_v14  ;;  %4335 = vmatmul.msk.bf16.gmra.mxu2 %vm2984_vm4, %v2955_v8  ;;  %v3664_v4 = vunpack.c.l.b16 %v3657_v55 }
 0x2cb   : > { %v3448_v34 = vpack.c.b16 %v3209_v11, %v3447_v62  ;;  %v4579_v62 = vld [vmem:[%s5961_s7 + $0x80] sm:$0xff] }
 0x2cc   : > { %v2838_v2 = vsel %vm5074_vm14, %v2829_v63, %v2837_v10  ;;  %v2750_v41 = vpack.c.bf16 %v2740_v47, %v2740_v47  ;;  %v5714_v15 = vld [vmem:[#allocation3 + $0x1c] sm:$0xff]  ;;  %v2839_v24 = vrot.slane %v2837_v10, 4  ;;  %v3450_v47 = vrot.slane %v5604_v35, 2 }
 0x2cd   : > { %2873 = vst.msk [vmem:[#allocation3 + $0x24] sm:$0xf] %vm376_vm8, %v2838_v2  ;;  %v3230_v51 = vrot.slane %v5714_v15, 1  ;;  %v3343_v40 = vshrl.u32 %v5714_v15, 16  ;;  %v3346_v0 = vshll.u32 %v5714_v15, 16  ;;  %v5774_v2 = vpack.c.b16 %v3664_v4, %v3664_v4  ;;  %3844 = vmatpush.bf16.msra.mxu2 %v4579_v62 }
 0x2ce   : > { %v2841_v23 = vshrl.u32 %v2750_v41, 16  ;;  %v2844_v14 = vshll.u32 %v2750_v41, 16  ;;  %v3684_v4 = vshrl.u32 %v5705_v61, 16 }
 0x2cf   : > { %v3231_v30 = vsel %vm1211_vm6, %v3228_v49, %v3230_v51  ;;  %v3345_v59 = vrot.slane %v3343_v40, 1  ;;  %v3348_v22 = vrot.slane %v3346_v0, 2 }
 0x2d0   : > { %v2843_v33 = vrot.slane %v2841_v23, 6  ;;  %v2846_v46 = vrot.slane %v2844_v14, 7  ;;  %4398 = vmatmul.msk.bf16.gmra.mxu1 %vm2984_vm4, %v3231_v30 }
 0x2d1   : > { %v3349_v49 = vor.u32 %v3348_v22, %v3345_v59 }
 0x2d2   : > { %v2847_v37 = vor.u32 %v2846_v46, %v2843_v33  ;;  %v3808_v46 = vrot.slane %v5774_v2, 3 }
 0x2d3   : > { %v5740_v57 = vsel %vm453_vm2, %v3340_v36, %v3349_v49 }
 0x2d4   : > { %v2848_v16 = vsel %vm5074_vm14, %v2839_v24, %v2847_v37  ;;  %v2849_v5 = vrot.slane %v2847_v37, 4  ;;  %v4554_v17 = vld [vmem:[#allocation3 + $0x20] sm:$0xff] }
 0x2d5   : > { %v5736_v50 = vld [vmem:[#allocation3 + $0x20] sm:$0xff]  ;;  %2874 = vst.msk [vmem:[#allocation3 + $0x28] sm:$0xf] %vm376_vm8, %v2848_v16  ;;  %4350 = vmatmul.msk.bf16.gmra.mxu3 %vm2984_vm4, %v4554_v17  ;;  %v3106_v48 = vrot.slane %v4554_v17, 1  ;;  %v2960_v12 = vshll.u32 %v4554_v17, 16  ;;  %v2964_v35 = vshrl.u32 %v4554_v17, 16 }
 0x2d6   : > { %v2878_v21 = vsel %vm2876_vm13, %v2849_v5, %v2877_v20  ;;  %v3804_v38 = vrot.slane %v5736_v50, 3  ;;  %v3531_v17 = vld [vmem:[#allocation3 + $0x8] sm:$0xc] }
 0x2d7   : > { %2879 = vst [vmem:[#allocation3 + $0x2c] sm:$0x3] %v2878_v21  ;;  %v3107_v3 = vsel %vm1211_vm6, %v3104_v44, %v3106_v48  ;;  %v2962_v39 = vrot.slane %v2960_v12, 1  ;;  %v4577_v44 = vld [vmem:[%s5961_s7 + $0x70] sm:$0xff]  ;;  %v3558_v42 = vunpack.c.l.b16 %v3531_v17  ;;  %v3541_v17 = vld [vmem:[#allocation3 + $0x30] sm:$0x3] }
 0x2d8   : > { %4366 = vmatmul.msk.bf16.gmra.mxu0 %vm2984_vm4, %v3107_v3  ;;  %v5755_v27 = vsel %vm827_vm5, %v3802_v13, %v3804_v38  ;;  %3753 = vmatpush.bf16.msra.mxu1 %v4577_v44  ;;  %v3449_v13 = vrot.slane %v3448_v34, 2  ;;  %v3675_v3 = vshrl.u32 %v5650_v31, 16 }
 0x2d9   : > { %v2963_v53 = vsel %vm679_vm3, %v2958_v28, %v2962_v39  ;;  %v2966_v24 = vor.u32 %v2964_v35, %v2962_v39  ;;  %v3569_v12 = vpack.c.b16 %v3559_v58, %v3558_v42  ;;  %v3678_v28 = vshll.u32 %v5650_v31, 16 }
 0x2da   : > { %4336 = vmatmul.msk.bf16.gmra.mxu2 %vm2984_vm4, %v2963_v53  ;;  %v3677_v55 = vrot.slane %v3675_v3, 2  ;;  %v3568_v42 = vunpack.c.l.b16 %v3541_v17 }
 0x2db   : > { %v3667_v60 = vshrl.u32 %v3569_v12, 16  ;;  %v3670_v53 = vshll.u32 %v3569_v12, 16 }
 0x2dc   : > { %v5764_v54 = vld [vmem:[#allocation3 + $0x24] sm:$0xff] }
 0x2dd   : > { %v2894_v19 = vld [vmem:[#allocation3 + $0x28] sm:$0x1]  ;;  %v3232_v25 = vrot.slane %v5764_v54, 1  ;;  %v3352_v36 = vshrl.u32 %v5764_v54, 16  ;;  %v3355_v10 = vshll.u32 %v5764_v54, 16  ;;  %v3669_v52 = vrot.slane %v3667_v60, 2 }
 0x2de   : > { %v2921_v9 = vunpack.c.l.b16 %v2894_v19  ;;  %v3191_v8 = vld [vmem:[#allocation3 + $0x2c] sm:$0x1]  ;;  %v3672_v58 = vrot.slane %v3670_v53, 3  ;;  %v3454_v19 = vrot.slane %v5714_v15, 2  ;;  %v3574_v60 = vpack.c.b16 %v3568_v42, %v3568_v42 }
 0x2df   : > { %v3233_v63 = vsel %vm1211_vm6, %v3230_v51, %v3232_v25  ;;  %v3354_v23 = vrot.slane %v3352_v36, 1  ;;  %v3357_v14 = vrot.slane %v3355_v10, 2  ;;  %v5776_v11 = vld [vmem:[#allocation3 + $0x28] sm:$0xff]  ;;  %v3218_v0 = vunpack.c.l.b16 %v3191_v8 }
 0x2e0   : > { %v2927_v32 = vpack.c.b16 %v2921_v9, %v2921_v9  ;;  %4399 = vmatmul.msk.bf16.gmra.mxu1 %vm2984_vm4, %v3233_v63  ;;  %v3451_v51 = vsel %vm2285_vm0, %v3449_v13, %v3450_v47  ;;  %v3806_v59 = vrot.slane %v5776_v11, 3  ;;  %v3673_v31 = vor.u32 %v3672_v58, %v3669_v52 }
 0x2e1   : > { %v5778_v33 = vor.u32 %v3357_v14, %v3354_v23  ;;  %v3224_v37 = vpack.c.b16 %v3218_v0, %v3218_v0  ;;  %v3578_v9 = vrot.slane %v5705_v61, 2  ;;  %v3580_v10 = vrot.slane %v5736_v50, 2  ;;  %v3307_v23 = vld [vmem:[#allocation3 + $0x2c] sm:$0x3] }
 0x2e2   : > { %v2968_v41 = vshll.u32 %v2927_v32, 16  ;;  %v3108_v40 = vrot.slane %v2927_v32, 1  ;;  %v5791_v20 = vsel %vm827_vm5, %v3804_v38, %v3806_v59  ;;  %v5794_v16 = vsel %vm827_vm5, %v3806_v59, %v3808_v46 }
 0x2e3   : > { %v5785_v6 = vsel %vm453_vm2, %v3349_v49, %v5778_v33  ;;  %v3234_v49 = vrot.slane %v3224_v37, 1  ;;  %v3575_v38 = vrot.slane %v3569_v12, 2  ;;  %v3579_v34 = vsel %vm2285_vm0, %v3576_v29, %v3578_v9 }
 0x2e4   : > { %v2970_v30 = vrot.slane %v2968_v41, 1  ;;  %v3109_v22 = vsel %vm1211_vm6, %v3106_v48, %v3108_v40  ;;  %v3452_v48 = vrot.slane %v5656_v26, 2  ;;  %v3680_v26 = vrot.slane %v3678_v28, 3 }
 0x2e5   : > { %4430 = vmatmul.msk.bf16.vlgmr.msra.gmra.mxu3 %vm2984_vm4, %v3451_v51  ;;  %v3235_v21 = vsel %vm1211_vm6, %v3232_v25, %v3234_v49  ;;  %v3577_v45 = vsel %vm2285_vm0, %v3575_v38, %v3576_v29  ;;  %v3687_v25 = vshll.u32 %v5705_v61, 16  ;;  %v3686_v32 = vrot.slane %v3684_v4, 2 }
 0x2e6   : > { %v2971_v5 = vsel %vm679_vm3, %v2966_v24, %v2970_v30  ;;  %v3453_v39 = vsel %vm2285_vm0, %v3450_v47, %v3452_v48  ;;  %v3681_v7 = vor.u32 %v3680_v26, %v3677_v55  ;;  %v3456_v61 = vrot.slane %v5764_v54, 2 }
 0x2e7   : > { %v3689_v36 = vrot.slane %v3687_v25, 3  ;;  %v3693_v47 = vshrl.u32 %v5736_v50, 16  ;;  %v3696_v8 = vshll.u32 %v5736_v50, 16  ;;  %v3314_v40 = vunpack.c.l.b16 %v3307_v23 }
 0x2e8   : > { %4367 = vmatmul.msk.bf16.gmra.mxu0 %vm2984_vm4, %v3109_v22  ;;  %v3682_v44 = vsel %vm1326_vm7, %v3673_v31, %v3681_v7  ;;  %v3457_v41 = vsel %vm2285_vm0, %v3454_v19, %v3456_v61  ;;  %v3582_v35 = vrot.slane %v5776_v11, 2  ;;  %v3702_v30 = vshrl.u32 %v5776_v11, 16 }
 0x2e9   : > { %v3690_v15 = vor.u32 %v3689_v36, %v3686_v32  ;;  %v3695_v14 = vrot.slane %v3693_v47, 2  ;;  %v3698_v13 = vrot.slane %v3696_v8, 3  ;;  %v3315_v51 = vpack.c.b16 %v3314_v40, %v3314_v40 }
 0x2ea   : > { %4337 = vmatmul.msk.bf16.gmra.mxu2 %vm2984_vm4, %v2971_v5  ;;  %v3705_v59 = vshll.u32 %v5776_v11, 16  ;;  %v3704_v5 = vrot.slane %v3702_v30, 2  ;;  %v3711_v52 = vshrl.u32 %v5774_v2, 16  ;;  %v3714_v58 = vshll.u32 %v5774_v2, 16 }
 0x2eb   : > { %v3691_v63 = vsel %vm1326_vm7, %v3681_v7, %v3690_v15  ;;  %v3699_v0 = vor.u32 %v3698_v13, %v3695_v14  ;;  %v3458_v46 = vrot.slane %v3315_v51, 2  ;;  %v3361_v12 = vshrl.u32 %v3315_v51, 16 }
 0x2ec   : > { %v3707_v49 = vrot.slane %v3705_v59, 3  ;;  %v3364_v29 = vshll.u32 %v3315_v51, 16  ;;  %v3713_v4 = vrot.slane %v3711_v52, 2  ;;  %v3716_v25 = vrot.slane %v3714_v58, 3 }
 0x2ed   : > { %v3700_v50 = vsel %vm1326_vm7, %v3690_v15, %v3699_v0  ;;  %v3459_v22 = vsel %vm2285_vm0, %v3456_v61, %v3458_v46 }
 0x2ee   : > { %v3366_v55 = vrot.slane %v3364_v29, 2  ;;  %v3717_v2 = vor.u32 %v3716_v25, %v3713_v4 }
 0x2f0   : > { %4400 = vmatmul.msk.bf16.gmra.mxu1 %vm2984_vm4, %v3235_v21  ;;  %v3708_v21 = vor.u32 %v3707_v49, %v3704_v5 }
 0x2f2   : > { %v3709_v38 = vsel %vm1326_vm7, %v3699_v0, %v3708_v21  ;;  %v3718_v47 = vsel %vm1326_vm7, %v3708_v21, %v3717_v2 }
 0x2f5   : > { %4431 = vmatmul.msk.bf16.gmra.mxu3 %vm2984_vm4, %v3453_v39 }
 0x2f8   : > { %4463 = vmatmul.msk.bf16.vlgmr.msra.gmra.mxu0 %vm2984_vm4, %v3577_v45  ;;  %v3363_v45 = vrot.slane %v3361_v12, 1 }
 0x2fa   : > { %4413 = vmatmul.msk.bf16.vlgmr.msrb.gmra.mxu2 %vm2984_vm4, %v5662_v43  ;;  %v3455_v43 = vsel %vm2285_vm0, %v3452_v48, %v3454_v19 }
 0x300   : > { %4480 = vmatmul.msk.bf16.vlgmr.msra.gmra.mxu1 %vm2984_vm4, %v3682_v44  ;;  %v3367_v44 = vor.u32 %v3366_v55, %v3363_v45 }
 0x302   : > { %v3368_v32 = vsel %vm453_vm2, %v5778_v33, %v3367_v44 }
 0x305   : > { %4432 = vmatmul.msk.bf16.gmra.mxu3 %vm2984_vm4, %v3455_v43 }
 0x308   : > { %4464 = vmatmul.msk.bf16.gmra.mxu0 %vm2984_vm4, %v3579_v34 }
 0x30a   : > { %4414 = vmatmul.msk.bf16.gmra.mxu2 %vm2984_vm4, %v5710_v1  ;;  %v3581_v1 = vsel %vm2285_vm0, %v3578_v9, %v3580_v10 }
 0x310   : > { %4481 = vmatmul.msk.bf16.gmra.mxu1 %vm2984_vm4, %v3691_v63 }
 0x315   : > { %4433 = vmatmul.msk.bf16.gmra.mxu3 %vm2984_vm4, %v3457_v41 }
 0x318   : > { %4465 = vmatmul.msk.bf16.gmra.mxu0 %vm2984_vm4, %v3581_v1  ;;  %v3065_v54 = vpop.f32.mrf.mxu3 }
 0x31a   : > { %4415 = vmatmul.msk.bf16.gmra.mxu2 %vm2984_vm4, %v5740_v57  ;;  %v3583_v57 = vsel %vm2285_vm0, %v3580_v10, %v3582_v35 }
 0x320   : > { %4482 = vmatmul.msk.bf16.gmra.mxu1 %vm2984_vm4, %v3700_v50  ;;  %v3067_v24 = vpop.f32.mrf.mxu3 }
 0x325   : > { %v3146_v37 = vpop.f32.mrf.mxu0  ;;  %4434 = vmatmul.msk.bf16.gmra.mxu3 %vm2984_vm4, %v3459_v22 }
 0x328   : > { %4466 = vmatmul.msk.bf16.gmra.mxu0 %vm2984_vm4, %v3583_v57  ;;  %v3070_v39 = vpop.f32.mrf.mxu3 }
 0x32a   : > { %4416 = vmatmul.msk.bf16.gmra.mxu2 %vm2984_vm4, %v5785_v6  ;;  %v3584_v6 = vrot.slane %v3574_v60, 2 }
 0x32c   : > { %v3585_v9 = vsel %vm2285_vm0, %v3582_v35, %v3584_v6 }
 0x32d   : > { %v3009_v48 = vpop.f32.mrf.mxu2  ;;  %v3148_v11 = vpop.f32.mrf.mxu0 }
 0x32e   : > { %v3066_v3 = vadd.f32 %v3065_v54, %v3009_v48  ;;  %v3272_v28 = vpop.f32.mrf.mxu1 }
 0x330   : > { %v3171_v53 = vadd.f32 %v3146_v37, %v3066_v3  ;;  %4483 = vmatmul.msk.bf16.gmra.mxu1 %vm2984_vm4, %v3709_v38  ;;  %v3072_v34 = vpop.f32.mrf.mxu3 }
 0x332   : > { %v5852_v26 = vadd.f32 %v3272_v28, %v3171_v53 }
 0x335   : > { %v3011_v7 = vpop.f32.mrf.mxu2  ;;  %v3151_v31 = vpop.f32.mrf.mxu0 }
 0x336   : > { %v3068_v19 = vadd.f32 %v3067_v24, %v3011_v7  ;;  %v3274_v62 = vpop.f32.mrf.mxu1 }
 0x338   : > { %v3172_v43 = vadd.f32 %v3148_v11, %v3068_v19  ;;  %4467 = vmatmul.msk.bf16.gmra.mxu0 %vm2984_vm4, %v3585_v9  ;;  %v3075_v23 = vpop.f32.mrf.mxu3 }
 0x33a   : > { %v5860_v36 = vadd.f32 %v3274_v62, %v3172_v43  ;;  %4417 = vmatmul.msk.bf16.gmra.mxu2 %vm2984_vm4, %v3368_v32 }
 0x33d   : > { %v3014_v15 = vpop.f32.mrf.mxu2  ;;  %v3153_v63 = vpop.f32.mrf.mxu0 }
 0x33e   : > { %v3071_v61 = vadd.f32 %v3070_v39, %v3014_v15  ;;  %v3277_v10 = vpop.f32.mrf.mxu1 }
 0x340   : > { %v3173_v8 = vadd.f32 %v3151_v31, %v3071_v61  ;;  %4484 = vmatmul.msk.bf16.gmra.mxu1 %vm2984_vm4, %v3718_v47  ;;  %v3077_v0 = vpop.f32.mrf.mxu3 }
 0x342   : > { %v3299_v41 = vadd.f32 %v3277_v10, %v3173_v8 }
 0x345   : > { %v3016_v1 = vpop.f32.mrf.mxu2  ;;  %v3156_v14 = vpop.f32.mrf.mxu0 }
 0x346   : > { %v3073_v13 = vadd.f32 %v3072_v34, %v3016_v1  ;;  %v3279_v33 = vpop.f32.mrf.mxu1 }
 0x348   : > { %v3174_v40 = vadd.f32 %v3153_v63, %v3073_v13  ;;  %v3080_v57 = vpop.f32.mrf.mxu3 }
 0x34a   : > { %v3300_v54 = vadd.f32 %v3279_v33, %v3174_v40  ;;  %4497 = vmatmul.msk.bf16.vlgmr.msra.gmra.mxu2 %vm2984_vm4, %v5685_v18 }
 0x34d   : > { %v3019_v51 = vpop.f32.mrf.mxu2  ;;  %v3158_v35 = vpop.f32.mrf.mxu0 }
 0x34e   : > { %v3076_v50 = vadd.f32 %v3075_v23, %v3019_v51  ;;  %v3282_v46 = vpop.f32.mrf.mxu1 }
 0x350   : > { %v3175_v30 = vadd.f32 %v3156_v14, %v3076_v50  ;;  %v3082_v11 = vpop.f32.mrf.mxu3 }
 0x352   : > { %v3301_v59 = vadd.f32 %v3282_v46, %v3175_v30 }
 0x355   : > { %v3021_v22 = vpop.f32.mrf.mxu2  ;;  %v3161_v49 = vpop.f32.mrf.mxu0 }
 0x356   : > { %v3078_v24 = vadd.f32 %v3077_v0, %v3021_v22  ;;  %v3284_v37 = vpop.f32.mrf.mxu1 }
 0x358   : > { %v3176_v5 = vadd.f32 %v3158_v35, %v3078_v24  ;;  %v3085_v53 = vpop.f32.mrf.mxu3  ;;  %v5892_v24 = vld [vmem:[%s5962_s8] ss:$0 sm:$0xff] }
 0x35a   : > { %v3302_v17 = vadd.f32 %v3284_v37, %v3176_v5  ;;  %4498 = vmatmul.msk.bf16.gmra.mxu2 %vm2984_vm4, %v5731_v56 }
 0x35d   : > { %v3024_v21 = vpop.f32.mrf.mxu2  ;;  %v3163_v29 = vpop.f32.mrf.mxu0 }
 0x35e   : > { %v3081_v42 = vadd.f32 %v3080_v57, %v3024_v21  ;;  %v3287_v18 = vpop.f32.mrf.mxu1 }
 0x360   : > { %v3177_v48 = vadd.f32 %v3161_v49, %v3081_v42  ;;  %v3087_v7 = vpop.f32.mrf.mxu3  ;;  %v5897_v49 = vld [vmem:[%s5963_s9] ss:$0 sm:$0xff] }
 0x362   : > { %v3303_v12 = vadd.f32 %v3287_v18, %v3177_v48 }
 0x365   : > { %v3026_v3 = vpop.f32.mrf.mxu2  ;;  %v3166_v45 = vpop.f32.mrf.mxu0 }
 0x366   : > { %v3083_v28 = vadd.f32 %v3082_v11, %v3026_v3  ;;  %v3289_v39 = vpop.f32.mrf.mxu1 }
 0x368   : > { %v3178_v38 = vadd.f32 %v3163_v29, %v3083_v28 }
 0x36a   : > { %v3304_v60 = vadd.f32 %v3289_v39, %v3178_v38  ;;  %4499 = vmatmul.msk.bf16.gmra.mxu2 %vm2984_vm4, %v5755_v27 }
 0x36d   : > { %v3029_v55 = vpop.f32.mrf.mxu2  ;;  %v3168_v19 = vpop.f32.mrf.mxu0 }
 0x36e   : > { %v3086_v6 = vadd.f32 %v3085_v53, %v3029_v55  ;;  %v3292_v56 = vpop.f32.mrf.mxu1 }
 0x370   : > { %v3179_v52 = vadd.f32 %v3166_v45, %v3086_v6 }
 0x372   : > { %v3305_v58 = vadd.f32 %v3292_v56, %v3179_v52 }
 0x375   : > { %v3031_v31 = vpop.f32.mrf.mxu2  ;;  %v3622_v1 = vpop.f32.mrf.mxu0 }
 0x376   : > { %v3088_v44 = vadd.f32 %v3087_v7, %v3031_v31  ;;  %v3294_v9 = vpop.f32.mrf.mxu1 }
 0x378   : > { %v3180_v62 = vadd.f32 %v3168_v19, %v3088_v44 }
 0x37a   : > { %v3306_v4 = vadd.f32 %v3294_v9, %v3180_v62  ;;  %4500 = vmatmul.msk.bf16.gmra.mxu2 %vm2984_vm4, %v5791_v20 }
 0x37d   : > { %v3405_v25 = vpop.f32.mrf.mxu2  ;;  %v3624_v40 = vpop.f32.mrf.mxu0 }
 0x37e   : > { %v3430_v27 = vadd.f32 %v3405_v25, %v5852_v26  ;;  %v3496_v26 = vpop.f32.mrf.mxu3  ;;  %v3755_v13 = vpop.f32.mrf.mxu1 }
 0x380   : > { %v3521_v0 = vadd.f32 %v3496_v26, %v3430_v27 }
 0x382   : > { %v3647_v35 = vadd.f32 %v3622_v1, %v3521_v0 }
 0x385   : > { %v3407_v43 = vpop.f32.mrf.mxu2  ;;  %v3627_v30 = vpop.f32.mrf.mxu0 }
 0x386   : > { %v3431_v34 = vadd.f32 %v3407_v43, %v5860_v36 }
 0x38a   : > { %4501 = vmatmul.msk.bf16.gmra.mxu2 %vm2984_vm4, %v5794_v16  ;;  %v3498_v16 = vpop.f32.mrf.mxu3 }
 0x38b   : > { %v3522_v22 = vadd.f32 %v3498_v16, %v3431_v34 }
 0x38d   : > { %v3410_v32 = vpop.f32.mrf.mxu2  ;;  %v3648_v21 = vadd.f32 %v3624_v40, %v3522_v22  ;;  %v3629_v48 = vpop.f32.mrf.mxu0 }
 0x38e   : > { %v3432_v2 = vadd.f32 %v3410_v32, %v3299_v41 }
 0x392   : > { %v3501_v51 = vpop.f32.mrf.mxu3 }
 0x395   : > { %v3412_v15 = vpop.f32.mrf.mxu2 }
 0x396   : > { %v3433_v63 = vadd.f32 %v3412_v15, %v3300_v54  ;;  %v3757_v54 = vpop.f32.mrf.mxu1 }
 0x397   : > { %v3781_v11 = vadd.f32 %v3757_v54, %v3648_v21 }
 0x39d   : > { %v3415_v61 = vpop.f32.mrf.mxu2 }
 0x39e   : > { %v5877_v10 = vadd.f32 %v3415_v61, %v3301_v59  ;;  %v3780_v59 = vadd.f32 %v3755_v13, %v3647_v35  ;;  %v3760_v37 = vpop.f32.mrf.mxu1 }
 0x3a5   : > { %v3417_v47 = vpop.f32.mrf.mxu2 }
 0x3a6   : > { %v5879_v8 = vadd.f32 %v3417_v47, %v3302_v17  ;;  %v3503_v17 = vpop.f32.mrf.mxu3  ;;  %v3762_v38 = vpop.f32.mrf.mxu1 }
 0x3a7   : > { %v3524_v56 = vadd.f32 %v3503_v17, %v3433_v63 }
 0x3a9   : > { %v3650_v19 = vadd.f32 %v3629_v48, %v3524_v56 }
 0x3ab   : > { %v3783_v27 = vadd.f32 %v3762_v38, %v3650_v19 }
 0x3ad   : > { %v3420_v20 = vpop.f32.mrf.mxu2 }
 0x3ae   : > { %v5881_v23 = vadd.f32 %v3420_v20, %v3303_v12  ;;  %v3523_v12 = vadd.f32 %v3501_v51, %v3432_v2  ;;  %v3506_v45 = vpop.f32.mrf.mxu3  ;;  %v3765_v9 = vpop.f32.mrf.mxu1 }
 0x3af   : > { %v3525_v43 = vadd.f32 %v3506_v45, %v5877_v10 }
 0x3b5   : > { %v3422_v14 = vpop.f32.mrf.mxu2 }
 0x3b6   : > { %v5883_v36 = vadd.f32 %v3422_v14, %v3304_v60  ;;  %v3649_v60 = vadd.f32 %v3627_v30, %v3523_v12  ;;  %v3508_v25 = vpop.f32.mrf.mxu3  ;;  %v3767_v26 = vpop.f32.mrf.mxu1 }
 0x3b7   : > { %v3526_v14 = vadd.f32 %v3508_v25, %v5879_v8 }
 0x3b8   : > { %v3782_v6 = vadd.f32 %v3760_v37, %v3649_v60 }
 0x3bd   : > { %v3425_v33 = vpop.f32.mrf.mxu2 }
 0x3be   : > { %v5885_v41 = vadd.f32 %v3425_v33, %v3305_v58  ;;  %v3632_v58 = vpop.f32.mrf.mxu0  ;;  %v3511_v13 = vpop.f32.mrf.mxu3 }
 0x3bf   : > { %v3651_v61 = vadd.f32 %v3632_v58, %v3525_v43  ;;  %v3527_v30 = vadd.f32 %v3511_v13, %v5881_v23 }
 0x3c1   : > { %v3784_v1 = vadd.f32 %v3765_v9, %v3651_v61 }
 0x3c5   : > { %v3427_v50 = vpop.f32.mrf.mxu2 }
 0x3c6   : > { %v5887_v46 = vadd.f32 %v3427_v50, %v3306_v4  ;;  %v3634_v63 = vpop.f32.mrf.mxu0 }
 0x3c7   : > { %v3652_v54 = vadd.f32 %v3634_v63, %v3526_v14 }
 0x3c9   : > { %v3785_v35 = vadd.f32 %v3767_v26, %v3652_v54 }
 0x3cd   : > { %v3846_v57 = vpop.f32.mrf.mxu2 }
 0x3ce   : > { %v3871_v5 = vadd.f32 %v3846_v57, %v3780_v59  ;;  %v3637_v51 = vpop.f32.mrf.mxu0  ;;  %v3770_v59 = vpop.f32.mrf.mxu1 }
 0x3cf   : > { %v3653_v17 = vadd.f32 %v3637_v51, %v3527_v30 }
 0x3d0   : > { %v3885_v42 = vmul.f32 %v5892_v24, %v3871_v5  ;;  %v3513_v5 = vpop.f32.mrf.mxu3 }
 0x3d1   : > { %v3786_v48 = vadd.f32 %v3770_v59, %v3653_v17 }
 0x3d2   : > { %v3899_v18 = vadd.f32 %v5897_v49, %v3885_v42 }
 0x3d4   : > { %vm3909_vm2 = vcmp.ge.f32.partialorder %v3899_v18, 0.0  ;;  %v3919_v29 = vmul.f32 0.01, %v3899_v18 }
 0x3d5   : > { %v3848_v3 = vpop.f32.mrf.mxu2 }
 0x3d6   : > { %v3929_v28 = vsel %vm3909_vm2, %v3899_v18, %v3919_v29  ;;  %v3872_v39 = vadd.f32 %v3848_v3, %v3781_v11  ;;  %v3639_v18 = vpop.f32.mrf.mxu0  ;;  %v3528_v11 = vadd.f32 %v3513_v5, %v5883_v36 }
 0x3d7   : > { %3939 = vst.msk [vmem:[%s5905_s17] sm:$0xff] %vm2984_vm4, %v3929_v28  ;;  %v3772_v28 = vpop.f32.mrf.mxu1 }
 0x3d8   : > { %v3886_v53 = vmul.f32 %v5892_v24, %v3872_v39  ;;  %v3654_v39 = vadd.f32 %v3639_v18, %v3528_v11  ;;  %v3516_v60 = vpop.f32.mrf.mxu3 }
 0x3da   : > { %v3900_v55 = vadd.f32 %v5897_v49, %v3886_v53  ;;  %v3787_v45 = vadd.f32 %v3772_v28, %v3654_v39 }
 0x3dc   : > { %vm3910_vm3 = vcmp.ge.f32.partialorder %v3900_v55, 0.0  ;;  %v3920_v52 = vmul.f32 0.01, %v3900_v55 }
 0x3dd   : > { %v3851_v7 = vpop.f32.mrf.mxu2 }
 0x3de   : > { %v3930_v31 = vsel %vm3910_vm3, %v3900_v55, %v3920_v52  ;;  %v3873_v44 = vadd.f32 %v3851_v7, %v3782_v6  ;;  %v3529_v55 = vadd.f32 %v3516_v60, %v5885_v41  ;;  %v3642_v6 = vpop.f32.mrf.mxu0 }
 0x3df   : > { %3940 = vst.msk [vmem:[%s5905_s17 + $0x8] sm:$0xff] %vm2984_vm4, %v3930_v31 }
 0x3e0   : > { %v3887_v62 = vmul.f32 %v5892_v24, %v3873_v44  ;;  %v3655_v7 = vadd.f32 %v3642_v6, %v3529_v55  ;;  %v3775_v44 = vpop.f32.mrf.mxu1 }
 0x3e2   : > { %v3901_v4 = vadd.f32 %v5897_v49, %v3887_v62  ;;  %v3518_v62 = vpop.f32.mrf.mxu3  ;;  %v3788_v9 = vadd.f32 %v3775_v44, %v3655_v7 }
 0x3e4   : > { %vm3911_vm5 = vcmp.ge.f32.partialorder %v3901_v4, 0.0  ;;  %v3921_v34 = vmul.f32 0.01, %v3901_v4 }
 0x3e5   : > { %v3853_v32 = vpop.f32.mrf.mxu2 }
 0x3e6   : > { %v3931_v2 = vsel %vm3911_vm5, %v3901_v4, %v3921_v34  ;;  %v3874_v15 = vadd.f32 %v3853_v32, %v3783_v27  ;;  %v3530_v4 = vadd.f32 %v3518_v62, %v5887_v46  ;;  %v3644_v34 = vpop.f32.mrf.mxu0 }
 0x3e7   : > { %3941 = vst.msk [vmem:[%s5905_s17 + $0x10] sm:$0xff] %vm2984_vm4, %v3931_v2 }
 0x3e8   : > { %v3888_v47 = vmul.f32 %v5892_v24, %v3874_v15  ;;  %v3656_v32 = vadd.f32 %v3644_v34, %v3530_v4  ;;  %v3777_v63 = vpop.f32.mrf.mxu1 }
 0x3ea   : > { %v3902_v20 = vadd.f32 %v5897_v49, %v3888_v47  ;;  %v3789_v61 = vadd.f32 %v3777_v63, %v3656_v32 }
 0x3ec   : > { %vm3912_vm6 = vcmp.ge.f32.partialorder %v3902_v20, 0.0  ;;  %v3922_v10 = vmul.f32 0.01, %v3902_v20 }
 0x3ed   : > { %v3856_v16 = vpop.f32.mrf.mxu2 }
 0x3ee   : > { %v3932_v33 = vsel %vm3912_vm6, %v3902_v20, %v3922_v10  ;;  %v3875_v40 = vadd.f32 %v3856_v16, %v3784_v1 }
 0x3ef   : > { %3942 = vst.msk [vmem:[%s5905_s17 + $0x18] sm:$0xff] %vm2984_vm4, %v3932_v33 }
 0x3f0   : > { %v3889_v0 = vmul.f32 %v5892_v24, %v3875_v40 }
 0x3f2   : > { %v3903_v50 = vadd.f32 %v5897_v49, %v3889_v0 }
 0x3f4   : > { %vm3913_vm7 = vcmp.ge.f32.partialorder %v3903_v50, 0.0  ;;  %v3923_v8 = vmul.f32 0.01, %v3903_v50 }
 0x3f5   : > { %v3858_v22 = vpop.f32.mrf.mxu2 }
 0x3f6   : > { %v3933_v37 = vsel %vm3913_vm7, %v3903_v50, %v3923_v8  ;;  %v3876_v57 = vadd.f32 %v3858_v22, %v3785_v35 }
 0x3f7   : > { %3943 = vst.msk [vmem:[%s5905_s17 + $0x20] sm:$0xff] %vm2984_vm4, %v3933_v37 }
 0x3f8   : > { %v3890_v21 = vmul.f32 %v5892_v24, %v3876_v57 }
 0x3fa   : > { %v3904_v42 = vadd.f32 %v5897_v49, %v3890_v21 }
 0x3fc   : > { %vm3914_vm12 = vcmp.ge.f32.partialorder %v3904_v42, 0.0  ;;  %v3924_v23 = vmul.f32 0.01, %v3904_v42 }
 0x3fd   : > { %v3861_v12 = vpop.f32.mrf.mxu2 }
 0x3fe   : > { %v3934_v29 = vsel %vm3914_vm12, %v3904_v42, %v3924_v23  ;;  %v3877_v3 = vadd.f32 %v3861_v12, %v3786_v48 }
 0x3ff   : > { %3944 = vst.msk [vmem:[%s5905_s17 + $0x28] sm:$0xff] %vm2984_vm4, %v3934_v29 }
 0x400   : > { %v3891_v38 = vmul.f32 %v5892_v24, %v3877_v3 }
 0x402   : > { %v3905_v53 = vadd.f32 %v5897_v49, %v3891_v38 }
 0x404   : > { %vm3915_vm14 = vcmp.ge.f32.partialorder %v3905_v53, 0.0  ;;  %v3925_v36 = vmul.f32 0.01, %v3905_v53 }
 0x405   : > { %v3863_v56 = vpop.f32.mrf.mxu2 }
 0x406   : > { %v3935_v52 = vsel %vm3915_vm14, %v3905_v53, %v3925_v36  ;;  %v3878_v58 = vadd.f32 %v3863_v56, %v3787_v45 }
 0x407   : > { %3945 = vst.msk [vmem:[%s5905_s17 + $0x30] sm:$0xff] %vm2984_vm4, %v3935_v52 }
 0x408   : > { %v3892_v31 = vmul.f32 %v5892_v24, %v3878_v58 }
 0x40a   : > { %v3906_v19 = vadd.f32 %v5897_v49, %v3892_v31 }
 0x40c   : > { %vm3916_vm0 = vcmp.ge.f32.partialorder %v3906_v19, 0.0  ;;  %v3926_v41 = vmul.f32 0.01, %v3906_v19 }
 0x40d   : > { %v3866_v25 = vpop.f32.mrf.mxu2 }
 0x40e   : > { %v3936_v27 = vsel %vm3916_vm0, %v3906_v19, %v3926_v41  ;;  %v3879_v43 = vadd.f32 %v3866_v25, %v3788_v9 }
 0x40f   : > { %3946 = vst.msk [vmem:[%s5905_s17 + $0x38] sm:$0xff] %vm2984_vm4, %v3936_v27 }
 0x410   : > { %v3893_v2 = vmul.f32 %v5892_v24, %v3879_v43 }
 0x412   : > { %v3907_v15 = vadd.f32 %v5897_v49, %v3893_v2 }
 0x414   : > { %vm3917_vm8 = vcmp.ge.f32.partialorder %v3907_v15, 0.0  ;;  %v3927_v47 = vmul.f32 0.01, %v3907_v15 }
 0x415   : > { %v3868_v46 = vpop.f32.mrf.mxu2 }
 0x416   : > { %v3937_v20 = vsel %vm3917_vm8, %v3907_v15, %v3927_v47  ;;  %v3880_v26 = vadd.f32 %v3868_v46, %v3789_v61 }
 0x417   : > { %3947 = vst.msk [vmem:[%s5905_s17 + $0x40] sm:$0xff] %vm2984_vm4, %v3937_v20 }
 0x418   : > { %v3894_v1 = vmul.f32 %v5892_v24, %v3880_v26 }
 0x41a   : > { %v3908_v14 = vadd.f32 %v5897_v49, %v3894_v1 }
 0x41c   : > { %vm3918_vm15 = vcmp.ge.f32.partialorder %v3908_v14, 0.0  ;;  %v3928_v10 = vmul.f32 0.01, %v3908_v14 }
 0x41e   : > { %v3938_v13 = vsel %vm3918_vm15, %v3908_v14, %v3928_v10 }
 0x41f   : > { %3948 = vst.msk [vmem:[%s5905_s17 + $0x48] sm:$0xff] %vm2984_vm4, %v3938_v13 }
 0x420 PF: > { %s20_s13 = sadd.s32 1, %s4623_s13  }
 0x421   : > { %p17_p4 = scmp.ge.s32.totalorder %s20_s13, 4  }
 0x423   :  { %19 = sbr.rel (!%p17_p4) target bundleno = 1 (0x1), region = 114 }

</bundles_post_ra>
